<compile_context>
chip_gen: v7x
topology: tpu7x:2x2x1
jax: 0.10.0
libtpu: 0.0.40
codegen_flags: <defaults>
</compile_context>

<pallas_src>
import jax
import jax.numpy as jnp
from jax.experimental import pallas as pl
from jax.experimental.pallas import tpu as pltpu


def _lrelu(h):
    # leaky_relu(h, 0.2) for any sign of h
    return jnp.maximum(h, 0.2 * h)


# ------------------------------- kernel ------------------------------------

def disc_sa_kernel(x_ref,
                   w1_ref, b1_ref,
                   w2_ref, b2_ref,
                   w3_ref, b3_ref,
                   weff_ref,
                   beff_ref,            # SMEM scalar
                   out_ref):
    # In-kernel cast: free VPU filler instead of a separate XLA pass.
    xb = x_ref[...].astype(jnp.bfloat16)                          # (T, D_in)

    # fc1/fc2 + leaky_relu(0.2): bf16 MXU operands, f32 accumulation, bias add
    # in f32, leaky-relu on packed bf16 vregs (halves VALU work on v6e/v7x).
    h1 = jnp.dot(xb, w1_ref[...],
                 preferred_element_type=jnp.float32) + b1_ref[...]
    h1 = _lrelu(h1.astype(jnp.bfloat16))                          # (T, 1024)
    h2 = jnp.dot(h1, w2_ref[...],
                 preferred_element_type=jnp.float32) + b2_ref[...]
    h2 = _lrelu(h2.astype(jnp.bfloat16))                          # (T, 512)
    # fc3 output only feeds the folded elementwise tail -> keep it f32.
    h3 = _lrelu(jnp.dot(h2, w3_ref[...],
                        preferred_element_type=jnp.float32) + b3_ref[...])

    # SelfAttention on h3.view(B, C, 1, 1): spatial size N = width*height = 1,
    # so the (N x N) softmax is exactly 1.0 and
    #     out = gamma * value_conv(h3) + h3
    # is affine in h3. The value-conv + gamma-mix + fc4 tail is folded offline
    # into   w_eff = gamma*wv^T@w4^T + w4^T,   b_eff = gamma*(bv.w4) + b4,
    # so only logits = h3 @ w_eff + b_eff remains here (VPU mul + XLU reduce).
    # TODO(synk): this exploits N == 1; a general-N attention would need the
    # full query/key/softmax path.
    h3t = h3.T                                                    # (C, T) native-tile transpose
    logits = jnp.sum(h3t * weff_ref[...], axis=0, keepdims=True) + beff_ref[0]
    # sigmoid on the lane-dense (1, T) row; approx reciprocal -> idle EUP slot.
    out_ref[0] = pl.reciprocal(1.0 + jnp.exp(-logits), approx=True)


# ------------------------------- wrapper ------------------------------------

def discriminator_sa(x, params, *, batch_tile=256):
    """Fused forward pass. x: (B, d_input_dim) f32 -> (B, 1) f32."""
    B, d_in = x.shape
    p = params

    n_tiles = pl.cdiv(B, batch_tile)
    b_pad = n_tiles * batch_tile
    if b_pad != B:
        x = jnp.pad(x, ((0, b_pad - B), (0, 0)))

    def full2d(a):
        # Full-array weight/bias block; constant index_map -> fetched once,
        # never re-DMA'd across the (parallel) batch grid.
        return pl.BlockSpec(a.shape, lambda i: (0, 0))

    smem = pl.BlockSpec(memory_space=pltpu.MemorySpace.SMEM)

    in_specs = [
        pl.BlockSpec((batch_tile, d_in), lambda i: (i, 0)),    # x tile
        full2d(p["w1"]), full2d(p["b1"]),
        full2d(p["w2"]), full2d(p["b2"]),
        full2d(p["w3"]), full2d(p["b3"]),
        full2d(p["w_eff"]),
        smem,                                                  # b_eff
    ]
    # Lane-dense output: one (1, 1, batch_tile) row per grid step.
    out_spec = pl.BlockSpec((1, 1, batch_tile), lambda i: (i, 0, 0))

    out = pl.pallas_call(
        disc_sa_kernel,
        out_shape=jax.ShapeDtypeStruct((n_tiles, 1, batch_tile), jnp.float32),
        grid_spec=pltpu.PrefetchScalarGridSpec(
            num_scalar_prefetch=0,
            grid=(n_tiles,),
            in_specs=in_specs,
            out_specs=out_spec,
        ),
        compiler_params=pltpu.CompilerParams(
            dimension_semantics=("parallel",),   # shards batch tiles across TCs
            vmem_limit_bytes=32 << 20,           # working set is a few MiB
        ),
    )(x, p["w1"], p["b1"], p["w2"], p["b2"], p["w3"], p["b3"],
      p["w_eff"], p["b_eff"])

    return out.reshape(-1)[:B][:, None]


# ------------------------- parameter construction ---------------------------

def _spectral_normalize(w):
    # spectral_norm reparametrization: W / sigma_max(W)  (exact SVD; PyTorch
    # uses a power-iteration estimate of the same quantity).
    s = jnp.linalg.svd(w, compute_uv=False)[0]
    return w / s


def make_params(key, d_input_dim):
    dims1, dims2, dims3 = 1024, 512, 256       # fc1/fc2/fc3 widths
    c = dims3                                   # attention in_dim = 256
    c8 = c // 8                                 # 32

    ks = jax.random.split(key, 8)

    def lin(k, out_f, in_f, scale=0.05):
        kw, kb = jax.random.split(k)
        w = scale * jax.random.normal(kw, (out_f, in_f), jnp.float32)
        b = scale * jax.random.normal(kb, (out_f,), jnp.float32)
        return _spectral_normalize(w), b

    w1, b1 = lin(ks[0], dims1, d_input_dim)
    w2, b2 = lin(ks[1], dims2, dims1)
    w3, b3 = lin(ks[2], dims3, dims2)
    w4, b4 = lin(ks[3], 1, dims3)
    # SelfAttention 1x1 convs: weight (out_c, in_c, 1, 1) -> (out_c, in_c)
    wq, bq = lin(ks[4], c8, c)
    wk, bk = lin(ks[5], c8, c)
    wv, bv = lin(ks[6], c, c)
    # nn.Parameter(torch.zeros(1)) at init; use a nonzero value here so the
    # value branch actually contributes to the checked output.
    gamma = jnp.full((1,), 0.3, jnp.float32)

    # bf16 MXU copy of the value weight (what the reference uses); the fold is
    # computed from the same quantized values so kernel/reference stay tight.
    wvT_bf16 = wv.T.astype(jnp.bfloat16)

    # Fold of value-conv + gamma-mix + fc4 (exact for the 1x1 spatial map):
    #   logits = h3 @ (gamma*wv^T@w4^T + w4^T) + (gamma*bv.w4 + b4)
    w4T = w4.T                                                     # (256, 1)
    w_eff = gamma[0] * (wvT_bf16.astype(jnp.float32) @ w4T) + w4T  # (256, 1)
    b_eff = gamma[0] * jnp.dot(bv, w4[0]) + b4                     # (1,)

    return dict(
        # MXU weights stored (in, out) in bf16; accumulation stays f32.
        w1=w1.T.astype(jnp.bfloat16), b1=b1[None, :],
        w2=w2.T.astype(jnp.bfloat16), b2=b2[None, :],
        w3=w3.T.astype(jnp.bfloat16), b3=b3[None, :],
        # kernel-side folded tail (f32, applied on the VPU, not the MXU)
        w_eff=w_eff.astype(jnp.float32),
        b_eff=b_eff.astype(jnp.float32),
        # reference-only full-attention parameters (q/k are mathematically
        # dead for the 1x1 spatial map; the kernel never loads them).
        wq=wq.T.astype(jnp.bfloat16), bq=bq[None, :],
        wk=wk.T.astype(jnp.bfloat16), bk=bk[None, :],
        wv=wvT_bf16, bv=bv[None, :],
        w4=w4, b4=b4, gamma=gamma,
    )


# ------------------------------- reference ----------------------------------

def reference(x, p):
    """Pure-JAX forward with the FULL attention math (incl. softmax over the
    singleton spatial axis and un-folded value-conv / gamma / fc4) to prove
    the kernel's algebraic simplifications are numerically exact."""
    def layer(a, w, b):
        h = jnp.dot(a.astype(jnp.bfloat16), w,
                    preferred_element_type=jnp.float32) + b
        return _lrelu(h.astype(jnp.bfloat16))

    def bdot(a, w):
        return jnp.dot(a.astype(jnp.bfloat16), w,
                       preferred_element_type=jnp.float32)

    h = layer(x, p["w1"], p["b1"])
    h = layer(h, p["w2"], p["b2"])
    h3 = _lrelu(bdot(h, p["w3"]) + p["b3"])                # (B, 256) f32

    # SelfAttention over an (B, C, 1, 1) map.
    q = bdot(h3, p["wq"]) + p["bq"]
    k = bdot(h3, p["wk"]) + p["bk"]
    v = bdot(h3, p["wv"]) + p["bv"]
    s = jnp.sum(q * k, axis=-1, keepdims=True)             # bmm(query, key): (B, 1)
    attn = jax.nn.softmax(s, axis=-1)                      # softmax over 1 elem == 1
    att = p["gamma"][0] * (v * attn) + h3                  # gamma * out + x

    logits = att @ p["w4"].T + p["b4"]                     # fc4
    return jax.nn.sigmoid(logits)


# --------------------------------- main --------------------------------------

if __name__ == "__main__":
    key = jax.random.PRNGKey(0)
    k_x, k_p = jax.random.split(key)

    # 256 rows -> a single 256-row grid step (fills the 256-row MXU on
    # v6e/v7x); hidden widths 1024/512/256 are fixed by the module.
    B, D_IN = 256, 64
    x = jax.random.normal(k_x, (B, D_IN), jnp.float32)
    params = make_params(k_p, D_IN)

    y = jax.block_until_ready(discriminator_sa(x, params, batch_tile=256))
    y_ref = jax.block_until_ready(reference(x, params))

    assert y.shape == (B, 1)
    max_err = float(jnp.max(jnp.abs(y - y_ref)))
    # Sigmoid outputs in [0,1]; 5e-3 absolute covers bf16 rounding, the folded
    # tail's precomputation order, and the approx-EUP reciprocal.
    assert jnp.allclose(y, y_ref, atol=5e-3, rtol=5e-3), max_err

    print("KERNEL_OK")
</pallas_src>

<mosaic_0001>
module attributes {stable_mosaic.version = 11 : i64} {
  func.func @disc_sa_kernel(%arg0: i32, %arg1: memref<256x64xf32, #tpu.memory_space<vmem>>, %arg2: memref<64x1024xbf16, #tpu.memory_space<vmem>>, %arg3: memref<1x1024xf32, #tpu.memory_space<vmem>>, %arg4: memref<1024x512xbf16, #tpu.memory_space<vmem>>, %arg5: memref<1x512xf32, #tpu.memory_space<vmem>>, %arg6: memref<512x256xbf16, #tpu.memory_space<vmem>>, %arg7: memref<1x256xf32, #tpu.memory_space<vmem>>, %arg8: memref<256x1xf32, #tpu.memory_space<vmem>>, %arg9: memref<1xf32, #tpu.memory_space<smem>>, %arg10: memref<1x1x256xf32, #tpu.memory_space<vmem>>) attributes {dimension_semantics = [#tpu.dimension_semantics<parallel>], iteration_bounds = array<i64: 1>, scalar_prefetch = 0 : i64, scratch_operands = 0 : i64, tpu.core_type = #tpu.core_type<tc>, window_params = [{transform_indices = @transform_0, window_bounds = array<i64: 256, 64>}, {pipeline_mode = #tpu.pipeline_mode<synchronous>, transform_indices = @transform_1, window_bounds = array<i64: 64, 1024>}, {pipeline_mode = #tpu.pipeline_mode<synchronous>, transform_indices = @transform_2, window_bounds = array<i64: 1, 1024>}, {pipeline_mode = #tpu.pipeline_mode<synchronous>, transform_indices = @transform_3, window_bounds = array<i64: 1024, 512>}, {pipeline_mode = #tpu.pipeline_mode<synchronous>, transform_indices = @transform_4, window_bounds = array<i64: 1, 512>}, {pipeline_mode = #tpu.pipeline_mode<synchronous>, transform_indices = @transform_5, window_bounds = array<i64: 512, 256>}, {pipeline_mode = #tpu.pipeline_mode<synchronous>, transform_indices = @transform_6, window_bounds = array<i64: 1, 256>}, {pipeline_mode = #tpu.pipeline_mode<synchronous>, transform_indices = @transform_7, window_bounds = array<i64: 256, 1>}, {transform_indices = @transform_8, window_bounds = array<i64: 1>}, {transform_indices = @transform_9, window_bounds = array<i64: 1, 1, 256>}]} {
    %c0 = arith.constant 0 : index
    %c0_0 = arith.constant 0 : index
    %0 = vector.load %arg1[%c0, %c0_0] : memref<256x64xf32, #tpu.memory_space<vmem>>, vector<256x64xf32>
    %1 = arith.truncf %0 : vector<256x64xf32> to vector<256x64xbf16>
    %c0_1 = arith.constant 0 : index
    %c0_2 = arith.constant 0 : index
    %2 = vector.load %arg2[%c0_1, %c0_2] : memref<64x1024xbf16, #tpu.memory_space<vmem>>, vector<64x1024xbf16>
    %cst = arith.constant dense<0.000000e+00> : vector<256x1024xf32>
    %3 = tpu.matmul %1, %2, %cst {dimension_numbers = #tpu.dot_dimension_numbers<[1], [0], [0], [1], [0, 0, 1, 1], [], []>} : vector<256x64xbf16>, vector<64x1024xbf16>, vector<256x1024xf32> -> vector<256x1024xf32>
    %c0_3 = arith.constant 0 : index
    %c0_4 = arith.constant 0 : index
    %4 = vector.load %arg3[%c0_3, %c0_4] : memref<1x1024xf32, #tpu.memory_space<vmem>>, vector<1x1024xf32>
    %5 = vector.broadcast %4 : vector<1x1024xf32> to vector<256x1024xf32>
    %6 = arith.addf %3, %5 : vector<256x1024xf32>
    %7 = arith.truncf %6 : vector<256x1024xf32> to vector<256x1024xbf16>
    %cst_5 = arith.constant 2.001950e-01 : bf16
    %8 = vector.broadcast %cst_5 : bf16 to vector<256x1024xbf16>
    %9 = arith.mulf %8, %7 : vector<256x1024xbf16>
    %10 = arith.maximumf %7, %9 : vector<256x1024xbf16>
    %c0_6 = arith.constant 0 : index
    %c0_7 = arith.constant 0 : index
    %11 = vector.load %arg4[%c0_6, %c0_7] : memref<1024x512xbf16, #tpu.memory_space<vmem>>, vector<1024x512xbf16>
    %cst_8 = arith.constant dense<0.000000e+00> : vector<256x512xf32>
    %12 = tpu.matmul %10, %11, %cst_8 {dimension_numbers = #tpu.dot_dimension_numbers<[1], [0], [0], [1], [0, 0, 1, 1], [], []>} : vector<256x1024xbf16>, vector<1024x512xbf16>, vector<256x512xf32> -> vector<256x512xf32>
    %c0_9 = arith.constant 0 : index
    %c0_10 = arith.constant 0 : index
    %13 = vector.load %arg5[%c0_9, %c0_10] : memref<1x512xf32, #tpu.memory_space<vmem>>, vector<1x512xf32>
    %14 = vector.broadcast %13 : vector<1x512xf32> to vector<256x512xf32>
    %15 = arith.addf %12, %14 : vector<256x512xf32>
    %16 = arith.truncf %15 : vector<256x512xf32> to vector<256x512xbf16>
    %cst_11 = arith.constant 2.001950e-01 : bf16
    %17 = vector.broadcast %cst_11 : bf16 to vector<256x512xbf16>
    %18 = arith.mulf %17, %16 : vector<256x512xbf16>
    %19 = arith.maximumf %16, %18 : vector<256x512xbf16>
    %c0_12 = arith.constant 0 : index
    %c0_13 = arith.constant 0 : index
    %20 = vector.load %arg6[%c0_12, %c0_13] : memref<512x256xbf16, #tpu.memory_space<vmem>>, vector<512x256xbf16>
    %cst_14 = arith.constant dense<0.000000e+00> : vector<256x256xf32>
    %21 = tpu.matmul %19, %20, %cst_14 {dimension_numbers = #tpu.dot_dimension_numbers<[1], [0], [0], [1], [0, 0, 1, 1], [], []>} : vector<256x512xbf16>, vector<512x256xbf16>, vector<256x256xf32> -> vector<256x256xf32>
    %c0_15 = arith.constant 0 : index
    %c0_16 = arith.constant 0 : index
    %22 = vector.load %arg7[%c0_15, %c0_16] : memref<1x256xf32, #tpu.memory_space<vmem>>, vector<1x256xf32>
    %23 = vector.broadcast %22 : vector<1x256xf32> to vector<256x256xf32>
    %24 = arith.addf %21, %23 : vector<256x256xf32>
    %cst_17 = arith.constant 2.000000e-01 : f32
    %25 = vector.broadcast %cst_17 : f32 to vector<256x256xf32>
    %26 = arith.mulf %25, %24 : vector<256x256xf32>
    %27 = arith.maximumf %24, %26 : vector<256x256xf32>
    %28 = tpu.transpose %27, [1, 0] : vector<256x256xf32> -> vector<256x256xf32>
    %c0_18 = arith.constant 0 : index
    %c0_19 = arith.constant 0 : index
    %29 = vector.load %arg8[%c0_18, %c0_19] : memref<256x1xf32, #tpu.memory_space<vmem>>, vector<256x1xf32>
    %30 = vector.broadcast %29 : vector<256x1xf32> to vector<256x256xf32>
    %31 = arith.mulf %28, %30 : vector<256x256xf32>
    %cst_20 = arith.constant dense<0.000000e+00> : vector<256xf32>
    %32 = vector.multi_reduction <add>, %31, %cst_20 [0] : vector<256x256xf32> to vector<256xf32>
    %33 = vector.shape_cast %32 : vector<256xf32> to vector<1x256xf32>
    %c0_21 = arith.constant 0 : index
    %34 = memref.load %arg9[%c0_21] : memref<1xf32, #tpu.memory_space<smem>>
    %35 = vector.broadcast %34 : f32 to vector<1x256xf32>
    %36 = arith.addf %33, %35 : vector<1x256xf32>
    %cst_22 = arith.constant 0.000000e+00 : f32
    %37 = vector.broadcast %cst_22 : f32 to vector<1x256xf32>
    %38 = arith.subf %37, %36 : vector<1x256xf32>
    %39 = math.exp %38 : vector<1x256xf32>
    %cst_23 = arith.constant 1.000000e+00 : f32
    %40 = vector.broadcast %cst_23 : f32 to vector<1x256xf32>
    %41 = arith.addf %40, %39 : vector<1x256xf32>
    %42 = tpu.reciprocal %41 {approx = true} : vector<1x256xf32> -> vector<1x256xf32>
    %c0_24 = arith.constant 0 : index
    %c0_25 = arith.constant 0 : index
    %c0_26 = arith.constant 0 : index
    %43 = vector.load %arg10[%c0_24, %c0_25, %c0_26] : memref<1x1x256xf32, #tpu.memory_space<vmem>>, vector<1x1x256xf32>
    %44 = vector.shape_cast %43 : vector<1x1x256xf32> to vector<1x256xf32>
    %45 = vector.shape_cast %42 : vector<1x256xf32> to vector<1x1x256xf32>
    tpu.vector_store %arg10[%c0_24, %c0_25, %c0_26], %45 {strides = array<i32>} : memref<1x1x256xf32, #tpu.memory_space<vmem>>, vector<1x1x256xf32>,
    return
  }
  func.func @transform_0(%arg0: i32) -> (i32, i32) {
    %c0_i32 = arith.constant 0 : i32
    %c0_i32_0 = arith.constant 0 : i32
    return %arg0, %c0_i32 : i32, i32
  }
  func.func @transform_1(%arg0: i32) -> (i32, i32) {
    %c0_i32 = arith.constant 0 : i32
    %c0_i32_0 = arith.constant 0 : i32
    %c0_i32_1 = arith.constant 0 : i32
    return %c0_i32, %c0_i32_0 : i32, i32
  }
  func.func @transform_2(%arg0: i32) -> (i32, i32) {
    %c0_i32 = arith.constant 0 : i32
    %c0_i32_0 = arith.constant 0 : i32
    %c0_i32_1 = arith.constant 0 : i32
    return %c0_i32, %c0_i32_0 : i32, i32
  }
  func.func @transform_3(%arg0: i32) -> (i32, i32) {
    %c0_i32 = arith.constant 0 : i32
    %c0_i32_0 = arith.constant 0 : i32
    %c0_i32_1 = arith.constant 0 : i32
    return %c0_i32, %c0_i32_0 : i32, i32
  }
  func.func @transform_4(%arg0: i32) -> (i32, i32) {
    %c0_i32 = arith.constant 0 : i32
    %c0_i32_0 = arith.constant 0 : i32
    %c0_i32_1 = arith.constant 0 : i32
    return %c0_i32, %c0_i32_0 : i32, i32
  }
  func.func @transform_5(%arg0: i32) -> (i32, i32) {
    %c0_i32 = arith.constant 0 : i32
    %c0_i32_0 = arith.constant 0 : i32
    %c0_i32_1 = arith.constant 0 : i32
    return %c0_i32, %c0_i32_0 : i32, i32
  }
  func.func @transform_6(%arg0: i32) -> (i32, i32) {
    %c0_i32 = arith.constant 0 : i32
    %c0_i32_0 = arith.constant 0 : i32
    %c0_i32_1 = arith.constant 0 : i32
    return %c0_i32, %c0_i32_0 : i32, i32
  }
  func.func @transform_7(%arg0: i32) -> (i32, i32) {
    %c0_i32 = arith.constant 0 : i32
    %c0_i32_0 = arith.constant 0 : i32
    %c0_i32_1 = arith.constant 0 : i32
    return %c0_i32, %c0_i32_0 : i32, i32
  }
  func.func @transform_8(%arg0: i32) -> i32 {
    %c0_i32 = arith.constant 0 : i32
    %c0_i32_0 = arith.constant 0 : i32
    return %c0_i32 : i32
  }
  func.func @transform_9(%arg0: i32) -> (i32, i32, i32) {
    %c0_i32 = arith.constant 0 : i32
    %c0_i32_0 = arith.constant 0 : i32
    %c0_i32_1 = arith.constant 0 : i32
    return %arg0, %c0_i32, %c0_i32_0 : i32, i32, i32
  }
}

</mosaic_0001>

<bundles_post_ra>
// kernel: tpu_custom_call.1
= control target key start
LH: loop header
LB: loop body
LE: loop exit
PB: predicated region body
PF: predicated region fallthrough
CT: control target
= control target key end

     0   :  { %15 = vsyncpa [#allocation4], 0  ;;  %s10105_s0 = inlined_call_operand.vmem [shape: f32[256,64], index: 0, kind: input, shape index: {}]   ;;  %s10106_s1 = inlined_call_operand.hbm [shape: bf16[64,1024], index: 1, kind: input, shape index: {}]   ;;  %s10107_s2 = inlined_call_operand.vmem [shape: f32[1,1024], index: 2, kind: input, shape index: {}]   ;;  %s10108_s3 = inlined_call_operand.hbm [shape: bf16[1024,512], index: 3, kind: input, shape index: {}]   ;;  %s10109_s4 = inlined_call_operand.vmem [shape: f32[1,512], index: 4, kind: input, shape index: {}]   ;;  %s10110_s5 = inlined_call_operand.vmem [shape: bf16[512,256], index: 5, kind: input, shape index: {}]   ;;  %s10111_s6 = inlined_call_operand.vmem [shape: f32[1,256], index: 6, kind: input, shape index: {}]   ;;  %s10112_s7 = inlined_call_operand.vmem [shape: f32[256,1], index: 7, kind: input, shape index: {}]   ;;  %s10113_s8 = inlined_call_operand.<no memory space> [shape: f32[1], index: 8, kind: input, shape index: {}]   ;;  %s10114_s9 = inlined_call_operand.hbm [shape: f32[1,1,256], index: 9, kind: output, shape index: {}]  }
   0x1   :  { %16 = vsyncpa [#allocation7], 0 }
   0x2   :  { %17 = vsyncpa [#allocation5], 0  ;;  %s7894_s30 = smov [#allocation3]   ;;  %s7822_s13 = scalar_lea.hbm %s10106_s1, 4096 }
   0x3   :  { %s25_s10 = sshll.u32 %s7894_s30, 4  ;;  %p7823_p0 = scmp.ne.s32.totalorder %s10106_s1, %s7822_s13  ;;  %s26_s10 = int_to_ptr.vmem [resolvable:$true] %s25_s10 }
   0x4   :  { %p7826_p1 = scmp.lt.u32.totalorder %s7822_s13, %s10106_s1 }
   0x6   :  { %p7828_p2 = pnand %p7826_p1, %p7823_p0 }
   0x8   :  { %7831 = shalt.err (!%p7828_p2)
}
   0x9   :  { %s7832_s18 = scalar_lea.vmem %s26_s10, 4096  ;;  %p7837_p4 = scmp.lt.s32.totalorder %s26_s10, %s26_s10 }
   0xa   :  { %p7833_p3 = scmp.ne.s32.totalorder %s26_s10, %s7832_s18  ;;  %p7838_p5 = scmp.lt.s32.totalorder %s7832_s18, %s7832_s18 }
   0xc   :  { %p7839_p6 = por %p7838_p5, %p7837_p4 }
   0xe   :  { %p7840_p7 = pnand %p7839_p6, %p7833_p3 }
  0x10   :  { %7843 = shalt.err (!%p7840_p7)
}
  0x11   :  { %s7895_s19 = smov 512   ;;  %s7896_s20 = smov 32  }
  0x12   :  { %31 = dma.hbm_to_vmem [thread:$0]  %s10106_s1, 4096, %s26_s10, [#allocation4], %s7895_s19, %s7895_s19, %s7896_s20  }
  0x13   :  { %s7897_s23 = smov [#allocation6]   ;;  %s7844_s27 = scalar_lea.hbm %s10108_s3, 32768 }
  0x14   :  { %s39_s24 = sshll.u32 %s7897_s23, 4  ;;  %p7845_p8 = scmp.ne.s32.totalorder %s10108_s3, %s7844_s27  ;;  %s40_s24 = int_to_ptr.vmem [resolvable:$true] %s39_s24 }
  0x15   :  { %p7848_p9 = scmp.lt.u32.totalorder %s7844_s27, %s10108_s3 }
  0x17   :  { %p7850_p10 = pnand %p7848_p9, %p7845_p8 }
  0x19   :  { %7853 = shalt.err (!%p7850_p10)
}
  0x1a   :  { %s7854_s12 = scalar_lea.vmem %s40_s24, 32768  ;;  %p7859_p12 = scmp.lt.s32.totalorder %s40_s24, %s40_s24 }
  0x1b   :  { %p7855_p11 = scmp.ne.s32.totalorder %s40_s24, %s7854_s12  ;;  %p7860_p13 = scmp.lt.s32.totalorder %s7854_s12, %s7854_s12 }
  0x1d   :  { %p7861_p0 = por %p7860_p13, %p7859_p12 }
  0x1f   :  { %p7862_p1 = pnand %p7861_p0, %p7855_p11 }
  0x21   :  { %7865 = shalt.err (!%p7862_p1)
}
  0x22   :  { %s7898_s1 = smov 256   ;;  %s7899_s10 = smov 16  }
  0x23   :  { %45 = dma.hbm_to_vmem [thread:$0]  %s10108_s3, 32768, %s40_s24, [#allocation7], %s7898_s1, %s7898_s1, %s7899_s10  }
  0x24   :  { %7888 = dma.done.wait [#allocation4], 4096  }
  0x25   :  { %7889 = vsyncadd [#allocation4], 4294963200 }
  0x26   :  { %7890 = dma.done.wait [#allocation7], 32768  }
  0x27   :  { %7891 = vsyncadd [#allocation7], 4294934528  ;;  %v10116_v0 = vmov 0   ;;  %v112_v1 = vld [vmem:[#allocation3] sm:$0xff]  ;;  %v113_v16 = vld [vmem:[#allocation3 + $0x8] sm:$0xff]  ;;  %vm346_vm0 = vcmask 523264  }
  0x28   :  { %427 = vmatprep.mubr.bf16.mxu1 %v10116_v0  ;;  %813 = vmatprep.mubr.bf16.mxu0 %v10116_v0  ;;  %v116_v2 = vld [vmem:[#allocation3 + $0x20] sm:$0xff]  ;;  %v117_v17 = vld [vmem:[#allocation3 + $0x28] sm:$0xff]  ;;  %v114_v21 = vld [vmem:[#allocation3 + $0x10] sm:$0xff] }
  0x29   :  { %7331 = vset.pattern.permute.xlu1 %v10116_v0  ;;  %7332 = vset.pattern.permute.xlu0 %v10116_v0  ;;  %v120_v3 = vld [vmem:[#allocation3 + $0x40] sm:$0xff]  ;;  %v6267_v4 = vcombine.high %v112_v1, %v116_v2  ;;  %v6266_v5 = vcombine.low %v112_v1, %v116_v2  ;;  %v65_v19 = vld [vmem:[%s10105_s0 + $0x8] sm:$0xff]  ;;  %v118_v22 = vld [vmem:[#allocation3 + $0x30] sm:$0xff]  ;;  %v6269_v24 = vcombine.high %v113_v16, %v117_v17 }
  0x2a   :  { %v124_v6 = vld [vmem:[#allocation3 + $0x60] sm:$0xff]  ;;  %v122_v23 = vld [vmem:[#allocation3 + $0x50] sm:$0xff]  ;;  %v6271_v25 = vcombine.high %v114_v21, %v118_v22  ;;  %v6270_v26 = vcombine.low %v114_v21, %v118_v22  ;;  %v121_v28 = vld [vmem:[#allocation3 + $0x48] sm:$0xff]  ;;  %v6268_v34 = vcombine.low %v113_v16, %v117_v17 }
  0x2b   :  { %v6275_v7 = vcombine.high %v120_v3, %v124_v6  ;;  %v128_v8 = vld [vmem:[#allocation3 + $0x80] sm:$0xff]  ;;  %395 = vmatprep.subr.bf16.mxu1 %v6267_v4  ;;  %v6274_v10 = vcombine.low %v120_v3, %v124_v6  ;;  %v126_v27 = vld [vmem:[#allocation3 + $0x70] sm:$0xff]  ;;  %v125_v29 = vld [vmem:[#allocation3 + $0x68] sm:$0xff] }
  0x2c   :  { %v132_v9 = vld [vmem:[#allocation3 + $0xa0] sm:$0xff]  ;;  %396 = vmatpush1.bf16.msra.mxu1 %v6266_v5  ;;  %v6279_v30 = vcombine.high %v122_v23, %v126_v27  ;;  %781 = vmatprep.subr.bf16.mxu0 %v6271_v25  ;;  %v130_v32 = vld [vmem:[#allocation3 + $0x90] sm:$0xff]  ;;  %v6277_v35 = vcombine.high %v121_v28, %v125_v29  ;;  %v129_v36 = vld [vmem:[#allocation3 + $0x88] sm:$0xff]  ;;  %v6278_v38 = vcombine.low %v122_v23, %v126_v27 }
  0x2d   :  { %397 = vmatprep.subr.bf16.mxu1 %v6275_v7  ;;  %v6283_v11 = vcombine.high %v128_v8, %v132_v9  ;;  %v136_v12 = vld [vmem:[#allocation3 + $0xc0] sm:$0xff]  ;;  %v6282_v14 = vcombine.low %v128_v8, %v132_v9  ;;  %v134_v33 = vld [vmem:[#allocation3 + $0xb0] sm:$0xff]  ;;  %782 = vmatpush1.bf16.msra.mxu0 %v6270_v26  ;;  %v133_v37 = vld [vmem:[#allocation3 + $0xa8] sm:$0xff]  ;;  %v6276_v46 = vcombine.low %v121_v28, %v125_v29 }
  0x2e   :  { %v140_v13 = vld [vmem:[#allocation3 + $0xe0] sm:$0xff]  ;;  %783 = vmatprep.subr.bf16.mxu0 %v6279_v30  ;;  %v66_v39 = vld [vmem:[%s10105_s0 + $0x10] sm:$0xff]  ;;  %v67_v40 = vld [vmem:[%s10105_s0 + $0x18] sm:$0xff]  ;;  %v6287_v41 = vcombine.high %v130_v32, %v134_v33  ;;  %v6285_v50 = vcombine.high %v129_v36, %v133_v37  ;;  %v6286_v51 = vcombine.low %v130_v32, %v134_v33  ;;  %v6284_v54 = vcombine.low %v129_v36, %v133_v37 }
  0x2f   :  { %v6291_v15 = vcombine.high %v136_v12, %v140_v13  ;;  %v64_v18 = vld [vmem:[%s10105_s0] sm:$0xff]  ;;  %v6290_v20 = vcombine.low %v136_v12, %v140_v13  ;;  %v138_v42 = vld [vmem:[#allocation3 + $0xd0] sm:$0xff]  ;;  %v7997_v44 = vld [vmem:[#allocation3 + $0x18] sm:$0xff]  ;;  %v8004_v53 = vpack.c.bf16 %v67_v40, %v66_v39 }
  0x30   :  { %398 = vmatpush1.bf16.msra.mxu1 %v6274_v10  ;;  %v7987_v31 = vpack.c.bf16 %v65_v19, %v64_v18  ;;  %v142_v43 = vld [vmem:[#allocation3 + $0xf0] sm:$0xff]  ;;  %v7999_v45 = vld [vmem:[#allocation3 + $0x38] sm:$0xff]  ;;  %v137_v47 = vld [vmem:[#allocation3 + $0xc8] sm:$0xff] }
  0x31   :  { %399 = vmatprep.subr.bf16.mxu1 %v6283_v11  ;;  %v141_v48 = vld [vmem:[#allocation3 + $0xe8] sm:$0xff]  ;;  %v6272_v49 = vcombine.low %v7997_v44, %v7999_v45  ;;  %784 = vmatpush1.bf16.msra.mxu0 %v6278_v38  ;;  %v6295_v52 = vcombine.high %v138_v42, %v142_v43  ;;  %v7335_v55 = vld [vmem:[#allocation6 + $0x4] ss:$16 sps:$4 sm:$0xff]   ;;  %v6294_v56 = vcombine.low %v138_v42, %v142_v43  ;;  %v7333_v61 = vld [vmem:[#allocation6] ss:$16 sps:$4 sm:$0xff]  }
  0x32   :  { %785 = vmatprep.subr.bf16.mxu0 %v6287_v41  ;;  %v6293_v57 = vcombine.high %v137_v47, %v141_v48  ;;  %v68_v58 = vld [vmem:[%s10105_s0 + $0x20] sm:$0xff]  ;;  %v69_v59 = vld [vmem:[%s10105_s0 + $0x28] sm:$0xff]  ;;  %v6292_v60 = vcombine.low %v137_v47, %v141_v48  ;;  %v6273_v62 = vcombine.high %v7997_v44, %v7999_v45  ;;  %v70_v3 = vld [vmem:[%s10105_s0 + $0x30] sm:$0xff] }
  0x33   :  { %v7338_v63 = vld [vmem:[#allocation6 + $0x24] ss:$16 sps:$4 sm:$0xff]   ;;  %v8017_v1 = vpack.c.bf16 %v69_v59, %v68_v58  ;;  %v7336_v2 = vld [vmem:[#allocation6 + $0x20] ss:$16 sps:$4 sm:$0xff]   ;;  %v71_v4 = vld [vmem:[%s10105_s0 + $0x38] sm:$0xff] }
  0x34   :  { %400 = vmatpush1.bf16.msra.mxu1 %v6282_v14  ;;  %v7341_v5 = vld [vmem:[#allocation6 + $0x44] ss:$16 sps:$4 sm:$0xff]   ;;  %v7339_v6 = vld [vmem:[#allocation6 + $0x40] ss:$16 sps:$4 sm:$0xff]   ;;  %v8031_v7 = vpack.c.bf16 %v71_v4, %v70_v3  ;;  %v73_v9 = vld [vmem:[%s10105_s0 + $0x48] sm:$0xff] }
  0x35   :  { %401 = vmatprep.subr.bf16.mxu1 %v6291_v15  ;;  %786 = vmatpush1.bf16.msra.mxu0 %v6286_v51  ;;  %v72_v8 = vld [vmem:[%s10105_s0 + $0x40] sm:$0xff]  ;;  %v74_v13 = vld [vmem:[%s10105_s0 + $0x50] sm:$0xff]  ;;  %v75_v14 = vld [vmem:[%s10105_s0 + $0x58] sm:$0xff] }
  0x36   :  { %787 = vmatprep.subr.bf16.mxu0 %v6295_v52  ;;  %v7342_v10 = vld [vmem:[#allocation6 + $0x60] ss:$16 sps:$4 sm:$0xff]   ;;  %v7344_v11 = vld [vmem:[#allocation6 + $0x64] ss:$16 sps:$4 sm:$0xff]   ;;  %v8045_v12 = vpack.c.bf16 %v73_v9, %v72_v8  ;;  %v8059_v17 = vpack.c.bf16 %v75_v14, %v74_v13  ;;  %v77_v19 = vld [vmem:[%s10105_s0 + $0x68] sm:$0xff] }
  0x37   :  { %v7345_v15 = vld [vmem:[#allocation6 + $0x80] ss:$16 sps:$4 sm:$0xff]   ;;  %v7347_v16 = vld [vmem:[#allocation6 + $0x84] ss:$16 sps:$4 sm:$0xff]   ;;  %v81_v29 = vld [vmem:[%s10105_s0 + $0x88] sm:$0xff] }
  0x38   :  { %402 = vmatpush1.bf16.msra.mxu1 %v6290_v20  ;;  %v76_v18 = vld [vmem:[%s10105_s0 + $0x60] sm:$0xff]  ;;  %v78_v23 = vld [vmem:[%s10105_s0 + $0x70] sm:$0xff]  ;;  %v83_v37 = vld [vmem:[%s10105_s0 + $0x98] sm:$0xff] }
  0x39   :  { %588 = vmatprep.subr.bf16.mxu1 %v6269_v24  ;;  %788 = vmatpush1.bf16.msra.mxu0 %v6294_v56  ;;  %v7348_v20 = vld [vmem:[#allocation6 + $0xa0] ss:$16 sps:$4 sm:$0xff]   ;;  %v7350_v21 = vld [vmem:[#allocation6 + $0xa4] ss:$16 sps:$4 sm:$0xff]   ;;  %v8073_v22 = vpack.c.bf16 %v77_v19, %v76_v18  ;;  %v79_v24 = vld [vmem:[%s10105_s0 + $0x78] sm:$0xff] }
  0x3a   :  { %3109 = vmatprep.subr.bf16.mxu0 %v7335_v55  ;;  %v7351_v25 = vld [vmem:[#allocation6 + $0xc0] ss:$16 sps:$4 sm:$0xff]   ;;  %v7353_v26 = vld [vmem:[#allocation6 + $0xc4] ss:$16 sps:$4 sm:$0xff]   ;;  %v8087_v27 = vpack.c.bf16 %v79_v24, %v78_v23  ;;  %v85_v43 = vld [vmem:[%s10105_s0 + $0xa8] sm:$0xff] }
  0x3b   :  { %6298 = vmatmul.mubr.msk.bf16.vlgmr.msra.gmra.mrb[0].mxu1 %vm346_vm0, %v7987_v31  ;;  %v80_v28 = vld [vmem:[%s10105_s0 + $0x80] sm:$0xff]  ;;  %v82_v36 = vld [vmem:[%s10105_s0 + $0x90] sm:$0xff]  ;;  %v87_v55 = vld [vmem:[%s10105_s0 + $0xb8] sm:$0xff] }
  0x3c   :  { %589 = vmatpush1.bf16.msra.mxu1 %v6268_v34  ;;  %437 = vmatprep.mubr.bf16.mxu1 %v10116_v0  ;;  %v7354_v30 = vld [vmem:[#allocation6 + $0xe0] ss:$16 sps:$4 sm:$0xff]   ;;  %v7356_v32 = vld [vmem:[#allocation6 + $0xe4] ss:$16 sps:$4 sm:$0xff]   ;;  %v8101_v33 = vpack.c.bf16 %v81_v29, %v80_v28  ;;  %v8115_v40 = vpack.c.bf16 %v83_v37, %v82_v36  ;;  %v93_v9 = vld [vmem:[%s10105_s0 + $0xe8] sm:$0xff] }
  0x3d   :  { %590 = vmatprep.subr.bf16.mxu1 %v6277_v35  ;;  %6330 = vmatmul.mubr.msk.bf16.vlgmr.msra.gmra.mrb[0].mxu0 %vm346_vm0, %v7987_v31  ;;  %v7359_v34 = vld [vmem:[#allocation6 + $0x104] ss:$16 sps:$4 sm:$0xff]   ;;  %v7357_v35 = vld [vmem:[#allocation6 + $0x100] ss:$16 sps:$4 sm:$0xff]   ;;  %v95_v13 = vld [vmem:[%s10105_s0 + $0xf8] sm:$0xff] }
  0x3e   :  { %823 = vmatprep.mubr.bf16.mxu0 %v10116_v0  ;;  %3110 = vmatpush1.bf16.msra.mxu0 %v7333_v61  ;;  %v7360_v38 = vld [vmem:[#allocation6 + $0x120] ss:$16 sps:$4 sm:$0xff]   ;;  %v7362_v39 = vld [vmem:[#allocation6 + $0x124] ss:$16 sps:$4 sm:$0xff]   ;;  %v89_v61 = vld [vmem:[%s10105_s0 + $0xc8] sm:$0xff] }
  0x3f   :  { %3111 = vmatprep.subr.bf16.mxu0 %v7338_v63  ;;  %v7365_v41 = vld [vmem:[#allocation6 + $0x144] ss:$16 sps:$4 sm:$0xff]   ;;  %v7366_v47 = vld [vmem:[#allocation6 + $0x160] ss:$16 sps:$4 sm:$0xff]   ;;  %v131_v19 = vld [vmem:[#allocation3 + $0x98] sm:$0xff] }
  0x40   :  { %591 = vmatpush1.bf16.msra.mxu1 %v6276_v46  ;;  %v84_v42 = vld [vmem:[%s10105_s0 + $0xa0] sm:$0xff]  ;;  %v86_v52 = vld [vmem:[%s10105_s0 + $0xb0] sm:$0xff]  ;;  %v139_v24 = vld [vmem:[#allocation3 + $0xd8] sm:$0xff] }
  0x41   :  { %592 = vmatprep.subr.bf16.mxu1 %v6285_v50  ;;  %v7363_v46 = vld [vmem:[#allocation6 + $0x140] ss:$16 sps:$4 sm:$0xff]   ;;  %v7368_v48 = vld [vmem:[#allocation6 + $0x164] ss:$16 sps:$4 sm:$0xff]   ;;  %v8129_v50 = vpack.c.bf16 %v85_v43, %v84_v42  ;;  %v8143_v58 = vpack.c.bf16 %v87_v55, %v86_v52  ;;  %v7386_v45 = vld [vmem:[#allocation6 + $0xc] ss:$16 sps:$4 sm:$0xff]  }
  0x42   :  { %3112 = vmatpush1.bf16.msra.mxu0 %v7336_v2  ;;  %v7371_v51 = vld [vmem:[#allocation6 + $0x184] ss:$16 sps:$4 sm:$0xff]   ;;  %v7378_v2 = vld [vmem:[#allocation6 + $0x1e0] ss:$16 sps:$4 sm:$0xff]  }
  0x43   :  { %6299 = vmatmul.mubr.msk.bf16.gmra.mrb[4].mxu1 %vm346_vm0, %v8004_v53  ;;  %3113 = vmatprep.subr.bf16.mxu0 %v7341_v5  ;;  %v7374_v56 = vld [vmem:[#allocation6 + $0x1a4] ss:$16 sps:$4 sm:$0xff]   ;;  %v91_v5 = vld [vmem:[%s10105_s0 + $0xd8] sm:$0xff] }
  0x44   :  { %447 = vmatprep.mubr.bf16.mxu1 %v10116_v0  ;;  %593 = vmatpush1.bf16.msra.mxu1 %v6284_v54  ;;  %v7369_v54 = vld [vmem:[#allocation6 + $0x180] ss:$16 sps:$4 sm:$0xff]   ;;  %v7377_v59 = vld [vmem:[#allocation6 + $0x1c4] ss:$16 sps:$4 sm:$0xff]  }
  0x45   :  { %594 = vmatprep.subr.bf16.mxu1 %v6293_v57  ;;  %6331 = vmatmul.mubr.msk.bf16.gmra.mrb[4].mxu0 %vm346_vm0, %v8004_v53  ;;  %v7372_v57 = vld [vmem:[#allocation6 + $0x1a0] ss:$16 sps:$4 sm:$0xff]   ;;  %v7380_v63 = vld [vmem:[#allocation6 + $0x1e4] ss:$16 sps:$4 sm:$0xff]  }
  0x46   :  { %833 = vmatprep.mubr.bf16.mxu0 %v10116_v0  ;;  %3114 = vmatpush1.bf16.msra.mxu0 %v7339_v6  ;;  %v90_v4 = vld [vmem:[%s10105_s0 + $0xd0] sm:$0xff]  ;;  %v92_v8 = vld [vmem:[%s10105_s0 + $0xe0] sm:$0xff] }
  0x47   :  { %3115 = vmatprep.subr.bf16.mxu0 %v7344_v11  ;;  %v8171_v6 = vpack.c.bf16 %v91_v5, %v90_v4  ;;  %v94_v11 = vld [vmem:[%s10105_s0 + $0xf0] sm:$0xff] }
  0x48   :  { %595 = vmatpush1.bf16.msra.mxu1 %v6292_v60  ;;  %v88_v60 = vld [vmem:[%s10105_s0 + $0xc0] sm:$0xff]  ;;  %v8199_v14 = vpack.c.bf16 %v95_v13, %v94_v11 }
  0x49   :  { %974 = vmatprep.subr.bf16.mxu1 %v6273_v62  ;;  %v7375_v62 = vld [vmem:[#allocation6 + $0x1c0] ss:$16 sps:$4 sm:$0xff]   ;;  %v8157_v3 = vpack.c.bf16 %v89_v61, %v88_v60  ;;  %v7389_v11 = vld [vmem:[#allocation6 + $0x224] ss:$16 sps:$4 sm:$0xff]  }
  0x4a   :  { %3116 = vmatpush1.bf16.msra.mxu0 %v7342_v10  ;;  %v8185_v10 = vpack.c.bf16 %v93_v9, %v92_v8 }
  0x4b   :  { %6300 = vmatmul.mubr.msk.bf16.gmra.mrb[8].mxu1 %vm346_vm0, %v8017_v1  ;;  %3117 = vmatprep.subr.bf16.mxu0 %v7347_v16  ;;  %v127_v16 = vld [vmem:[#allocation3 + $0x78] sm:$0xff] }
  0x4c   :  { %457 = vmatprep.mubr.bf16.mxu1 %v10116_v0 }
  0x4d   :  { %6332 = vmatmul.mubr.msk.bf16.gmra.mrb[8].mxu0 %vm346_vm0, %v8017_v1 }
  0x4e   :  { %843 = vmatprep.mubr.bf16.mxu0 %v10116_v0  ;;  %3118 = vmatpush1.bf16.msra.mxu0 %v7345_v15  ;;  %v123_v15 = vld [vmem:[#allocation3 + $0x58] sm:$0xff] }
  0x4f   :  { %3119 = vmatprep.subr.bf16.mxu0 %v7350_v21  ;;  %v6281_v18 = vcombine.high %v123_v15, %v127_v16  ;;  %v6280_v21 = vcombine.low %v123_v15, %v127_v16 }
  0x52   :  { %3120 = vmatpush1.bf16.msra.mxu0 %v7348_v20  ;;  %v135_v20 = vld [vmem:[#allocation3 + $0xb8] sm:$0xff] }
  0x53   :  { %6301 = vmatmul.mubr.msk.bf16.gmra.mrb[12].mxu1 %vm346_vm0, %v8031_v7  ;;  %3121 = vmatprep.subr.bf16.mxu0 %v7353_v26  ;;  %v6289_v23 = vcombine.high %v131_v19, %v135_v20  ;;  %v7383_v26 = vld [vmem:[#allocation6 + $0x204] ss:$16 sps:$4 sm:$0xff]   ;;  %v6288_v28 = vcombine.low %v131_v19, %v135_v20 }
  0x54   :  { %467 = vmatprep.mubr.bf16.mxu1 %v10116_v0 }
  0x55   :  { %6333 = vmatmul.mubr.msk.bf16.gmra.mrb[12].mxu0 %vm346_vm0, %v8031_v7 }
  0x56   :  { %853 = vmatprep.mubr.bf16.mxu0 %v10116_v0  ;;  %3122 = vmatpush1.bf16.msra.mxu0 %v7351_v25  ;;  %v143_v25 = vld [vmem:[#allocation3 + $0xf8] sm:$0xff] }
  0x57   :  { %3123 = vmatprep.subr.bf16.mxu0 %v7356_v32  ;;  %v6297_v29 = vcombine.high %v139_v24, %v143_v25  ;;  %v6296_v44 = vcombine.low %v139_v24, %v143_v25 }
  0x5a   :  { %3124 = vmatpush1.bf16.msra.mxu0 %v7354_v30 }
  0x5b   :  { %6302 = vmatmul.mubr.msk.bf16.gmra.mrb[16].mxu1 %vm346_vm0, %v8045_v12  ;;  %3125 = vmatprep.subr.bf16.mxu0 %v7359_v34  ;;  %v144_v34 = vld [vmem:[%s10107_s2] sm:$0xff] }
  0x5c   :  { %477 = vmatprep.mubr.bf16.mxu1 %v10116_v0 }
  0x5d   :  { %6334 = vmatmul.mubr.msk.bf16.gmra.mrb[16].mxu0 %vm346_vm0, %v8045_v12 }
  0x5e   :  { %863 = vmatprep.mubr.bf16.mxu0 %v10116_v0  ;;  %3126 = vmatpush1.bf16.msra.mxu0 %v7357_v35 }
  0x5f   :  { %3127 = vmatprep.subr.bf16.mxu0 %v7362_v39 }
  0x62   :  { %3128 = vmatpush1.bf16.msra.mxu0 %v7360_v38 }
  0x63   :  { %6303 = vmatmul.mubr.msk.bf16.gmra.mrb[20].mxu1 %vm346_vm0, %v8059_v17  ;;  %3129 = vmatprep.subr.bf16.mxu0 %v7365_v41 }
  0x64   :  { %487 = vmatprep.mubr.bf16.mxu1 %v10116_v0 }
  0x65   :  { %6335 = vmatmul.mubr.msk.bf16.gmra.mrb[20].mxu0 %vm346_vm0, %v8059_v17 }
  0x66   :  { %873 = vmatprep.mubr.bf16.mxu0 %v10116_v0  ;;  %3130 = vmatpush1.bf16.msra.mxu0 %v7363_v46 }
  0x67   :  { %3131 = vmatprep.subr.bf16.mxu0 %v7368_v48 }
  0x6a   :  { %3132 = vmatpush1.bf16.msra.mxu0 %v7366_v47 }
  0x6b   :  { %6304 = vmatmul.mubr.msk.bf16.gmra.mrb[24].mxu1 %vm346_vm0, %v8073_v22  ;;  %3133 = vmatprep.subr.bf16.mxu0 %v7371_v51 }
  0x6c   :  { %497 = vmatprep.mubr.bf16.mxu1 %v10116_v0 }
  0x6d   :  { %6336 = vmatmul.mubr.msk.bf16.gmra.mrb[24].mxu0 %vm346_vm0, %v8073_v22 }
  0x6e   :  { %883 = vmatprep.mubr.bf16.mxu0 %v10116_v0  ;;  %3134 = vmatpush1.bf16.msra.mxu0 %v7369_v54 }
  0x6f   :  { %3135 = vmatprep.subr.bf16.mxu0 %v7374_v56 }
  0x72   :  { %3136 = vmatpush1.bf16.msra.mxu0 %v7372_v57 }
  0x73   :  { %6305 = vmatmul.mubr.msk.bf16.gmra.mrb[28].mxu1 %vm346_vm0, %v8087_v27  ;;  %3137 = vmatprep.subr.bf16.mxu0 %v7377_v59 }
  0x74   :  { %507 = vmatprep.mubr.bf16.mxu1 %v10116_v0 }
  0x75   :  { %6337 = vmatmul.mubr.msk.bf16.gmra.mrb[28].mxu0 %vm346_vm0, %v8087_v27 }
  0x76   :  { %893 = vmatprep.mubr.bf16.mxu0 %v10116_v0  ;;  %3138 = vmatpush1.bf16.msra.mxu0 %v7375_v62 }
  0x77   :  { %3139 = vmatprep.subr.bf16.mxu0 %v7380_v63  ;;  %v7381_v63 = vld [vmem:[#allocation6 + $0x200] ss:$16 sps:$4 sm:$0xff]  }
  0x7a   :  { %3140 = vmatpush1.bf16.msra.mxu0 %v7378_v2 }
  0x7b   :  { %6306 = vmatmul.mubr.msk.bf16.gmra.mrb[32].mxu1 %vm346_vm0, %v8101_v33  ;;  %3302 = vmatprep.subr.bf16.mxu0 %v7383_v26  ;;  %v7395_v26 = vld [vmem:[#allocation6 + $0x244] ss:$16 sps:$4 sm:$0xff]  }
  0x7c   :  { %517 = vmatprep.mubr.bf16.mxu1 %v10116_v0 }
  0x7d   :  { %6338 = vmatmul.mubr.msk.bf16.gmra.mrb[32].mxu0 %vm346_vm0, %v8101_v33 }
  0x7e   :  { %903 = vmatprep.mubr.bf16.mxu0 %v10116_v0 }
  0x83   :  { %6307 = vmatmul.mubr.msk.bf16.gmra.mrb[36].mxu1 %vm346_vm0, %v8115_v40 }
  0x84   :  { %527 = vmatprep.mubr.bf16.mxu1 %v10116_v0 }
  0x85   :  { %6339 = vmatmul.mubr.msk.bf16.gmra.mrb[36].mxu0 %vm346_vm0, %v8115_v40 }
  0x86   :  { %913 = vmatprep.mubr.bf16.mxu0 %v10116_v0 }
  0x8b   :  { %6308 = vmatmul.mubr.msk.bf16.gmra.mrb[40].mxu1 %vm346_vm0, %v8129_v50 }
  0x8c   :  { %537 = vmatprep.mubr.bf16.mxu1 %v10116_v0 }
  0x8d   :  { %6340 = vmatmul.mubr.msk.bf16.gmra.mrb[40].mxu0 %vm346_vm0, %v8129_v50 }
  0x8e   :  { %923 = vmatprep.mubr.bf16.mxu0 %v10116_v0 }
  0x93   :  { %6309 = vmatmul.mubr.msk.bf16.gmra.mrb[44].mxu1 %vm346_vm0, %v8143_v58 }
  0x94   :  { %547 = vmatprep.mubr.bf16.mxu1 %v10116_v0 }
  0x95   :  { %6341 = vmatmul.mubr.msk.bf16.gmra.mrb[44].mxu0 %vm346_vm0, %v8143_v58 }
  0x96   :  { %933 = vmatprep.mubr.bf16.mxu0 %v10116_v0 }
  0x9b   :  { %6310 = vmatmul.mubr.msk.bf16.gmra.mrb[48].mxu1 %vm346_vm0, %v8157_v3 }
  0x9c   :  { %557 = vmatprep.mubr.bf16.mxu1 %v10116_v0 }
  0x9d   :  { %6342 = vmatmul.mubr.msk.bf16.gmra.mrb[48].mxu0 %vm346_vm0, %v8157_v3 }
  0x9e   :  { %943 = vmatprep.mubr.bf16.mxu0 %v10116_v0 }
  0xa3   :  { %6311 = vmatmul.mubr.msk.bf16.gmra.mrb[52].mxu1 %vm346_vm0, %v8171_v6 }
  0xa4   :  { %567 = vmatprep.mubr.bf16.mxu1 %v10116_v0 }
  0xa5   :  { %6343 = vmatmul.mubr.msk.bf16.gmra.mrb[52].mxu0 %vm346_vm0, %v8171_v6 }
  0xa6   :  { %953 = vmatprep.mubr.bf16.mxu0 %v10116_v0 }
  0xab   :  { %6312 = vmatmul.mubr.msk.bf16.gmra.mrb[56].mxu1 %vm346_vm0, %v8185_v10 }
  0xac   :  { %577 = vmatprep.mubr.bf16.mxu1 %v10116_v0 }
  0xad   :  { %6344 = vmatmul.mubr.msk.bf16.gmra.mrb[56].mxu0 %vm346_vm0, %v8185_v10 }
  0xae   :  { %963 = vmatprep.mubr.bf16.mxu0 %v10116_v0 }
  0xb3   :  { %6313 = vmatmul.mubr.msk.bf16.gmra.mrb[60].mxu1 %vm346_vm0, %v8199_v14 }
  0xb4   :  { %620 = vmatprep.mubr.bf16.mxu1 %v10116_v0 }
  0xb5   :  { %6345 = vmatmul.mubr.msk.bf16.gmra.mrb[60].mxu0 %vm346_vm0, %v8199_v14 }
  0xbb   :  { %6314 = vmatmul.mubr.msk.bf16.vlgmr.msra.gmra.mrb[64].mxu1 %vm346_vm0, %v7987_v31 }
  0xbc   :  { %975 = vmatpush1.bf16.msra.mxu1 %v6272_v49  ;;  %630 = vmatprep.mubr.bf16.mxu1 %v10116_v0  ;;  %v10115_v49 = vlaneseq }
  0xbd   :  { %976 = vmatprep.subr.bf16.mxu1 %v6281_v18 }
  0xbe   :  { %v8246_v30 = vshrl.u32 %v10115_v49, 7 }
  0xc0   :  { %977 = vmatpush1.bf16.msra.mxu1 %v6280_v21  ;;  %10181 = vst [vmem:[#allocation12_spill] sm:$0xff] %v8246_v30  ;;  %v8249_v32 = vsub.s32 0, %v8246_v30  ;;  %v8255_v35 = vsub.s32 1, %v8246_v30  ;;  %v164_v54 = vsub.s32 4, %v8246_v30  ;;  %v168_v56 = vsub.s32 5, %v8246_v30 }
  0xc1   :  { %978 = vmatprep.subr.bf16.mxu1 %v6289_v23  ;;  %v7387_v21 = vld [vmem:[#allocation6 + $0x220] ss:$16 sps:$4 sm:$0xff]  }
  0xc2   :  { %10182 = vst [vmem:[#allocation13_spill] sm:$0xff] %v8249_v32  ;;  %10183 = vst [vmem:[#allocation14_spill] sm:$0xff] %v8255_v35  ;;  %v8261_v36 = vrot.slane %v144_v34, %v8249_v32  ;;  %v8264_v38 = vrot.slane %v144_v34, %v8255_v35  ;;  %v8277_v2 = vrot.slane %v144_v34, %v164_v54  ;;  %v7438_v35 = vld [vmem:[#allocation6 + $0x340] ss:$16 sps:$4 sm:$0xff]  }
  0xc3   :  { %6315 = vmatmul.mubr.msk.bf16.gmra.mrb[68].mxu1 %vm346_vm0, %v8004_v53  ;;  %v8283_v13 = vrot.slane %v144_v34, %v168_v56 }
  0xc4   :  { %640 = vmatprep.mubr.bf16.mxu1 %v10116_v0  ;;  %979 = vmatpush1.bf16.msra.mxu1 %v6288_v28 }
  0xc5   :  { %980 = vmatprep.subr.bf16.mxu1 %v6297_v29 }
  0xc8   :  { %981 = vmatpush1.bf16.msra.mxu1 %v6296_v44 }
  0xc9   :  { %3881 = vmatprep.subr.bf16.mxu1 %v7386_v45 }
  0xcb   :  { %6316 = vmatmul.mubr.msk.bf16.gmra.mrb[72].mxu1 %vm346_vm0, %v8017_v1 }
  0xcc   :  { %650 = vmatprep.mubr.bf16.mxu1 %v10116_v0 }
  0xd3   :  { %6317 = vmatmul.mubr.msk.bf16.gmra.mrb[76].mxu1 %vm346_vm0, %v8031_v7 }
  0xd4   :  { %660 = vmatprep.mubr.bf16.mxu1 %v10116_v0 }
  0xdb   :  { %6318 = vmatmul.mubr.msk.bf16.gmra.mrb[80].mxu1 %vm346_vm0, %v8045_v12 }
  0xdc   :  { %670 = vmatprep.mubr.bf16.mxu1 %v10116_v0 }
  0xe3   :  { %6319 = vmatmul.mubr.msk.bf16.gmra.mrb[84].mxu1 %vm346_vm0, %v8059_v17 }
  0xe4   :  { %680 = vmatprep.mubr.bf16.mxu1 %v10116_v0 }
  0xeb   :  { %6320 = vmatmul.mubr.msk.bf16.gmra.mrb[88].mxu1 %vm346_vm0, %v8073_v22 }
  0xec   :  { %690 = vmatprep.mubr.bf16.mxu1 %v10116_v0 }
  0xf3   :  { %6321 = vmatmul.mubr.msk.bf16.gmra.mrb[92].mxu1 %vm346_vm0, %v8087_v27 }
  0xf4   :  { %700 = vmatprep.mubr.bf16.mxu1 %v10116_v0 }
  0xfb   :  { %6322 = vmatmul.mubr.msk.bf16.gmra.mrb[96].mxu1 %vm346_vm0, %v8101_v33 }
  0xfc   :  { %710 = vmatprep.mubr.bf16.mxu1 %v10116_v0 }
 0x103   :  { %6323 = vmatmul.mubr.msk.bf16.gmra.mrb[100].mxu1 %vm346_vm0, %v8115_v40 }
 0x104   :  { %720 = vmatprep.mubr.bf16.mxu1 %v10116_v0 }
 0x10b   :  { %6324 = vmatmul.mubr.msk.bf16.gmra.mrb[104].mxu1 %vm346_vm0, %v8129_v50 }
 0x10c   :  { %730 = vmatprep.mubr.bf16.mxu1 %v10116_v0 }
 0x10e   :  { %v429_v37 = vpop.f32.mrb[0].mxu1 }
 0x10f   :  { %v431_v39 = vpop.f32.mrb[1].mxu1  ;;  %v430_v42 = vadd.f32 %v429_v37, %v8261_v36 }
 0x110   :  { %v433_v41 = vpop.f32.mrb[2].mxu1  ;;  %v432_v47 = vadd.f32 %v431_v39, %v8264_v38  ;;  %v815_v19 = vpop.f32.mrb[0].mxu0 }
 0x111   :  { %v434_v43 = vadd.f32 %v433_v41, %v8261_v36  ;;  %v435_v46 = vpop.f32.mrb[3].mxu1  ;;  %v816_v23 = vadd.f32 %v815_v19, %v8277_v2  ;;  %v817_v24 = vpop.f32.mrb[1].mxu0 }
 0x112   :  { %v436_v48 = vadd.f32 %v435_v46, %v8264_v38  ;;  %v818_v28 = vadd.f32 %v817_v24, %v8283_v13  ;;  %v819_v29 = vpop.f32.mrb[2].mxu0  ;;  %v7393_v46 = vld [vmem:[#allocation6 + $0x240] ss:$16 sps:$4 sm:$0xff]  }
 0x113   :  { %v1167_v51 = vpack.c.bf16 %v434_v43, %v430_v42  ;;  %6325 = vmatmul.mubr.msk.bf16.gmra.mrb[108].mxu1 %vm346_vm0, %v8143_v58  ;;  %v820_v34 = vadd.f32 %v819_v29, %v8277_v2  ;;  %v821_v37 = vpop.f32.mrb[3].mxu0  ;;  %v7405_v29 = vld [vmem:[#allocation6 + $0x280] ss:$16 sps:$4 sm:$0xff]  }
 0x114   :  { %v1168_v52 = vpack.c.bf16 %v436_v48, %v432_v47  ;;  %740 = vmatprep.mubr.bf16.mxu1 %v10116_v0  ;;  %v822_v41 = vadd.f32 %v821_v37, %v8283_v13 }
 0x115   :  { %v1295_v55 = vmul.bf16 1045249613, %v1167_v51  ;;  %v8298_v47 = vpack.c.bf16 %v820_v34, %v816_v23 }
 0x116   :  { %v1296_v57 = vmul.bf16 1045249613, %v1168_v52  ;;  %v439_v59 = vpop.f32.mrb[4].mxu1  ;;  %v8304_v56 = vpack.c.bf16 %v822_v41, %v818_v28  ;;  %v7413_v41 = vld [vmem:[#allocation6 + $0x2a4] ss:$16 sps:$4 sm:$0xff]  }
 0x117   :  { %v441_v60 = vpop.f32.mrb[5].mxu1  ;;  %v8279_v4 = vmax.bf16 %v1295_v55, %v1167_v51  ;;  %v440_v5 = vadd.f32 %v439_v59, %v8261_v36  ;;  %v7401_v55 = vld [vmem:[#allocation6 + $0x264] ss:$16 sps:$4 sm:$0xff]  }
 0x118   :  { %v443_v61 = vpop.f32.mrb[6].mxu1  ;;  %v8275_v62 = vmax.bf16 %v1296_v57, %v1168_v52  ;;  %v442_v15 = vadd.f32 %v441_v60, %v8264_v38 }
 0x119   :  { %v444_v8 = vadd.f32 %v443_v61, %v8261_v36  ;;  %v445_v9 = vpop.f32.mrb[7].mxu1  ;;  %v825_v61 = vpop.f32.mrb[4].mxu0 }
 0x11a   :  { %v446_v16 = vadd.f32 %v445_v9, %v8264_v38  ;;  %3141 = vmatprep.mubr.bf16.mxu0 %v8275_v62  ;;  %v827_v9 = vpop.f32.mrb[5].mxu0 }
 0x11b   :  { %v1175_v18 = vpack.c.bf16 %v444_v8, %v440_v5  ;;  %6326 = vmatmul.mubr.msk.bf16.gmra.mrb[112].mxu1 %vm346_vm0, %v8157_v3  ;;  %3142 = vmatmul.mubr.bf16.vlgmr.msra.gmra.mrb[64].mxu0 %v8279_v4  ;;  %v7399_v5 = vld [vmem:[#allocation6 + $0x260] ss:$16 sps:$4 sm:$0xff]   ;;  %v826_v8 = vadd.f32 %v825_v61, %v8277_v2 }
 0x11c   :  { %v1176_v20 = vpack.c.bf16 %v446_v16, %v442_v15  ;;  %750 = vmatprep.mubr.bf16.mxu1 %v10116_v0  ;;  %3303 = vmatpush1.bf16.msra.mxu0 %v7381_v63  ;;  %v7407_v15 = vld [vmem:[#allocation6 + $0x284] ss:$16 sps:$4 sm:$0xff]   ;;  %v828_v16 = vadd.f32 %v827_v9, %v8283_v13 }
 0x11d   :  { %v1303_v25 = vmul.bf16 1045249613, %v1175_v18  ;;  %3304 = vmatprep.subr.bf16.mxu0 %v7389_v11 }
 0x11e   :  { %v1304_v44 = vmul.bf16 1045249613, %v1176_v20  ;;  %v449_v45 = vpop.f32.mrb[8].mxu1 }
 0x11f   :  { %v451_v39 = vpop.f32.mrb[9].mxu1  ;;  %v450_v48 = vadd.f32 %v449_v45, %v8261_v36  ;;  %v8302_v54 = vmax.bf16 %v1303_v25, %v1175_v18  ;;  %v829_v18 = vpop.f32.mrb[6].mxu0 }
 0x120   :  { %v453_v42 = vpop.f32.mrb[10].mxu1  ;;  %v8296_v43 = vmax.bf16 %v1304_v44, %v1176_v20  ;;  %3305 = vmatpush1.bf16.msra.mxu0 %v7387_v21  ;;  %v452_v57 = vadd.f32 %v451_v39, %v8264_v38  ;;  %v830_v21 = vadd.f32 %v829_v18, %v8277_v2  ;;  %v831_v23 = vpop.f32.mrb[7].mxu0 }
 0x121   :  { %v454_v51 = vadd.f32 %v453_v42, %v8261_v36  ;;  %v455_v52 = vpop.f32.mrb[11].mxu1  ;;  %3306 = vmatprep.subr.bf16.mxu0 %v7395_v26  ;;  %v832_v25 = vadd.f32 %v831_v23, %v8283_v13  ;;  %v7417_v23 = vld [vmem:[#allocation6 + $0x2c0] ss:$16 sps:$4 sm:$0xff]  }
 0x122   :  { %v456_v59 = vadd.f32 %v455_v52, %v8264_v38  ;;  %3151 = vmatprep.mubr.bf16.mxu0 %v8296_v43  ;;  %v8319_v44 = vpack.c.bf16 %v830_v21, %v826_v8  ;;  %v835_v52 = vpop.f32.mrb[8].mxu0 }
 0x123   :  { %v1183_v60 = vpack.c.bf16 %v454_v51, %v450_v48  ;;  %6327 = vmatmul.mubr.msk.bf16.gmra.mrb[116].mxu1 %vm346_vm0, %v8171_v6  ;;  %3152 = vmatmul.mubr.bf16.gmra.mrb[68].mxu0 %v8302_v54  ;;  %v8325_v42 = vpack.c.bf16 %v832_v25, %v828_v16 }
 0x124   :  { %v1184_v63 = vpack.c.bf16 %v456_v59, %v452_v57  ;;  %760 = vmatprep.mubr.bf16.mxu1 %v10116_v0  ;;  %3307 = vmatpush1.bf16.msra.mxu0 %v7393_v46  ;;  %v7411_v57 = vld [vmem:[#allocation6 + $0x2a0] ss:$16 sps:$4 sm:$0xff]   ;;  %v836_v59 = vadd.f32 %v835_v52, %v8277_v2 }
 0x125   :  { %v1311_v11 = vmul.bf16 1045249613, %v1183_v60  ;;  %3308 = vmatprep.subr.bf16.mxu0 %v7401_v55 }
 0x126   :  { %v1312_v19 = vmul.bf16 1045249613, %v1184_v63  ;;  %v459_v20 = vpop.f32.mrb[12].mxu1 }
 0x127   :  { %v461_v24 = vpop.f32.mrb[13].mxu1  ;;  %v460_v45 = vadd.f32 %v459_v20, %v8261_v36  ;;  %v8323_v39 = vmax.bf16 %v1311_v11, %v1183_v60  ;;  %v837_v60 = vpop.f32.mrb[9].mxu0 }
 0x128   :  { %v463_v26 = vpop.f32.mrb[14].mxu1  ;;  %v8317_v28 = vmax.bf16 %v1312_v19, %v1184_v63  ;;  %3309 = vmatpush1.bf16.msra.mxu0 %v7399_v5  ;;  %v462_v46 = vadd.f32 %v461_v24, %v8264_v38  ;;  %v7419_v63 = vld [vmem:[#allocation6 + $0x2c4] ss:$16 sps:$4 sm:$0xff]   ;;  %v838_v5 = vadd.f32 %v837_v60, %v8283_v13  ;;  %v839_v8 = vpop.f32.mrb[10].mxu0 }
 0x129   :  { %v464_v34 = vadd.f32 %v463_v26, %v8261_v36  ;;  %v465_v37 = vpop.f32.mrb[15].mxu1  ;;  %3310 = vmatprep.subr.bf16.mxu0 %v7407_v15  ;;  %v840_v15 = vadd.f32 %v839_v8, %v8277_v2  ;;  %v841_v16 = vpop.f32.mrb[11].mxu0 }
 0x12a   :  { %v466_v48 = vadd.f32 %v465_v37, %v8264_v38  ;;  %3161 = vmatprep.mubr.bf16.mxu0 %v8317_v28  ;;  %v842_v19 = vadd.f32 %v841_v16, %v8283_v13  ;;  %v845_v52 = vpop.f32.mrb[12].mxu0 }
 0x12b   :  { %v1191_v51 = vpack.c.bf16 %v464_v34, %v460_v45  ;;  %6328 = vmatmul.mubr.msk.bf16.gmra.mrb[120].mxu1 %vm346_vm0, %v8185_v10  ;;  %3162 = vmatmul.mubr.bf16.gmra.mrb[72].mxu0 %v8323_v39  ;;  %v8340_v24 = vpack.c.bf16 %v840_v15, %v836_v59  ;;  %v7425_v34 = vld [vmem:[#allocation6 + $0x2e4] ss:$16 sps:$4 sm:$0xff]   ;;  %v847_v59 = vpop.f32.mrb[13].mxu0 }
 0x12c   :  { %v1192_v55 = vpack.c.bf16 %v466_v48, %v462_v46  ;;  %770 = vmatprep.mubr.bf16.mxu1 %v10116_v0  ;;  %3311 = vmatpush1.bf16.msra.mxu0 %v7405_v29  ;;  %v8346_v37 = vpack.c.bf16 %v842_v19, %v838_v5  ;;  %v849_v5 = vpop.f32.mrb[14].mxu0 }
 0x12d   :  { %v1319_v61 = vmul.bf16 1045249613, %v1191_v51  ;;  %3312 = vmatprep.subr.bf16.mxu0 %v7413_v41  ;;  %10184 = vst [vmem:[#allocation15_spill] sm:$0xff] %v8340_v24  ;;  %v851_v15 = vpop.f32.mrb[15].mxu0 }
 0x12e   :  { %v1320_v9 = vmul.bf16 1045249613, %v1192_v55  ;;  %v469_v11 = vpop.f32.mrb[16].mxu1  ;;  %10185 = vst [vmem:[#allocation16_spill] sm:$0xff] %v8346_v37 }
 0x12f   :  { %v471_v18 = vpop.f32.mrb[17].mxu1  ;;  %v470_v25 = vadd.f32 %v469_v11, %v8261_v36  ;;  %v8344_v45 = vmax.bf16 %v1319_v61, %v1191_v51  ;;  %v7423_v51 = vld [vmem:[#allocation6 + $0x2e0] ss:$16 sps:$4 sm:$0xff]   ;;  %v7431_v61 = vld [vmem:[#allocation6 + $0x304] ss:$16 sps:$4 sm:$0xff]   ;;  %v850_v11 = vadd.f32 %v849_v5, %v8277_v2 }
 0x130   :  { %v473_v20 = vpop.f32.mrb[18].mxu1  ;;  %v8338_v21 = vmax.bf16 %v1320_v9, %v1192_v55  ;;  %3313 = vmatpush1.bf16.msra.mxu0 %v7411_v57  ;;  %v472_v41 = vadd.f32 %v471_v18, %v8264_v38  ;;  %v846_v57 = vadd.f32 %v845_v52, %v8277_v2  ;;  %v852_v18 = vadd.f32 %v851_v15, %v8283_v13  ;;  %v7429_v52 = vld [vmem:[#allocation6 + $0x300] ss:$16 sps:$4 sm:$0xff]  }
 0x131   :  { %v474_v26 = vadd.f32 %v473_v20, %v8261_v36  ;;  %v475_v29 = vpop.f32.mrb[19].mxu1  ;;  %3314 = vmatprep.subr.bf16.mxu0 %v7419_v63  ;;  %v848_v63 = vadd.f32 %v847_v59, %v8283_v13  ;;  %v7435_v15 = vld [vmem:[#allocation6 + $0x320] ss:$16 sps:$4 sm:$0xff]  }
 0x132   :  { %v476_v46 = vadd.f32 %v475_v29, %v8264_v38  ;;  %3171 = vmatprep.mubr.bf16.mxu0 %v8338_v21 }
 0x133   :  { %v1199_v48 = vpack.c.bf16 %v474_v26, %v470_v25  ;;  %6329 = vmatmul.mubr.msk.bf16.gmra.mrb[124].mxu1 %vm346_vm0, %v8199_v14  ;;  %3172 = vmatmul.mubr.bf16.gmra.mrb[76].mxu0 %v8344_v45  ;;  %v8361_v25 = vpack.c.bf16 %v850_v11, %v846_v57  ;;  %v8367_v59 = vpack.c.bf16 %v852_v18, %v848_v63  ;;  %v7398_v63 = vld [vmem:[#allocation6 + $0x4c] ss:$16 sps:$4 sm:$0xff]  }
 0x134   :  { %v1200_v55 = vpack.c.bf16 %v476_v46, %v472_v41  ;;  %1006 = vmatprep.mubr.bf16.mxu1 %v10116_v0  ;;  %3315 = vmatpush1.bf16.msra.mxu0 %v7417_v23  ;;  %v7384_v23 = vld [vmem:[#allocation6 + $0x8] ss:$16 sps:$4 sm:$0xff]   ;;  %v7392_v46 = vld [vmem:[#allocation6 + $0x2c] ss:$16 sps:$4 sm:$0xff]  }
 0x135   :  { %v1327_v60 = vmul.bf16 1045249613, %v1199_v48  ;;  %3316 = vmatprep.subr.bf16.mxu0 %v7425_v34  ;;  %10186 = vst [vmem:[#allocation17_spill] sm:$0xff] %v8361_v25  ;;  %10187 = vst [vmem:[#allocation18_spill] sm:$0xff] %v8367_v59  ;;  %v7447_v25 = vld [vmem:[#allocation6 + $0x380] ss:$16 sps:$4 sm:$0xff]  }
 0x136   :  { %v1328_v8 = vmul.bf16 1045249613, %v1200_v55  ;;  %v479_v9 = vpop.f32.mrb[20].mxu1 }
 0x137   :  { %v481_v16 = vpop.f32.mrb[21].mxu1  ;;  %v480_v26 = vadd.f32 %v479_v9, %v8261_v36  ;;  %v8365_v41 = vmax.bf16 %v1327_v60, %v1199_v48  ;;  %v855_v48 = vpop.f32.mrb[16].mxu0 }
 0x138   :  { %v483_v19 = vpop.f32.mrb[22].mxu1  ;;  %v8359_v20 = vmax.bf16 %v1328_v8, %v1200_v55  ;;  %3317 = vmatpush1.bf16.msra.mxu0 %v7423_v51  ;;  %v482_v5 = vadd.f32 %v481_v16, %v8264_v38  ;;  %v7437_v51 = vld [vmem:[#allocation6 + $0x324] ss:$16 sps:$4 sm:$0xff]   ;;  %v856_v8 = vadd.f32 %v855_v48, %v8277_v2  ;;  %v857_v9 = vpop.f32.mrb[17].mxu0 }
 0x139   :  { %v484_v29 = vadd.f32 %v483_v19, %v8261_v36  ;;  %v485_v34 = vpop.f32.mrb[23].mxu1  ;;  %3318 = vmatprep.subr.bf16.mxu0 %v7431_v61  ;;  %v7390_v61 = vld [vmem:[#allocation6 + $0x28] ss:$16 sps:$4 sm:$0xff]   ;;  %v858_v16 = vadd.f32 %v857_v9, %v8283_v13  ;;  %v859_v18 = vpop.f32.mrb[18].mxu0 }
 0x13a   :  { %v486_v55 = vadd.f32 %v485_v34, %v8264_v38  ;;  %3181 = vmatprep.mubr.bf16.mxu0 %v8359_v20 }
 0x13b   :  { %v1207_v57 = vpack.c.bf16 %v484_v29, %v480_v26  ;;  %6346 = vmatmul.mubr.msk.bf16.vlgmr.msra.gmra.mrb[128].mxu1 %vm346_vm0, %v7987_v31  ;;  %3182 = vmatmul.mubr.bf16.gmra.mrb[80].mxu0 %v8365_v41  ;;  %v7440_v26 = vld [vmem:[#allocation6 + $0x344] ss:$16 sps:$4 sm:$0xff]   ;;  %v861_v29 = vpop.f32.mrb[19].mxu0 }
 0x13c   :  { %v1208_v60 = vpack.c.bf16 %v486_v55, %v482_v5  ;;  %3882 = vmatpush1.bf16.msra.mxu1 %v7384_v23  ;;  %1016 = vmatprep.mubr.bf16.mxu1 %v10116_v0  ;;  %v860_v23 = vadd.f32 %v859_v18, %v8277_v2  ;;  %v862_v5 = vadd.f32 %v861_v29, %v8283_v13  ;;  %v7404_v18 = vld [vmem:[#allocation6 + $0x6c] ss:$16 sps:$4 sm:$0xff]  }
 0x13d   :  { %v1335_v11 = vmul.bf16 1045249613, %v1207_v57  ;;  %3883 = vmatprep.subr.bf16.mxu1 %v7392_v46  ;;  %3319 = vmatpush1.bf16.msra.mxu0 %v7429_v52  ;;  %v7396_v46 = vld [vmem:[#allocation6 + $0x48] ss:$16 sps:$4 sm:$0xff]  }
 0x13e   :  { %v1336_v31 = vmul.bf16 1045249613, %v1208_v60  ;;  %v489_v19 = vpop.f32.mrb[24].mxu1  ;;  %3320 = vmatprep.subr.bf16.mxu0 %v7437_v51  ;;  %v8383_v52 = vpack.c.bf16 %v860_v23, %v856_v8  ;;  %v8388_v32 = vpack.c.bf16 %v862_v5, %v858_v16  ;;  %v7410_v16 = vld [vmem:[#allocation6 + $0x8c] ss:$16 sps:$4 sm:$0xff]  }
 0x13f   :  { %v491_v34 = vpop.f32.mrb[25].mxu1  ;;  %v490_v55 = vadd.f32 %v489_v19, %v8261_v36  ;;  %v8386_v51 = vmax.bf16 %v1335_v11, %v1207_v57  ;;  %v865_v57 = vpop.f32.mrb[20].mxu0  ;;  %v10190_v11 = vmov 0  }
 0x140   :  { %v493_v48 = vpop.f32.mrb[26].mxu1  ;;  %v8381_v49 = vmax.bf16 %v1336_v31, %v1208_v60  ;;  %3884 = vmatpush1.bf16.msra.mxu1 %v7390_v61  ;;  %10188 = vst [vmem:[#allocation19_spill] sm:$0xff] %v8383_v52  ;;  %10189 = vst [vmem:[#allocation20_spill] sm:$0xff] %v8388_v32  ;;  %v492_v19 = vadd.f32 %v491_v34, %v8264_v38  ;;  %v7446_v61 = vld [vmem:[#allocation6 + $0x364] ss:$16 sps:$4 sm:$0xff]   ;;  %v866_v31 = vadd.f32 %v865_v57, %v8277_v2 }
 0x141   :  { %v494_v9 = vadd.f32 %v493_v48, %v8261_v36  ;;  %v495_v0 = vpop.f32.mrb[27].mxu1  ;;  %3885 = vmatprep.subr.bf16.mxu1 %v7398_v63  ;;  %3321 = vmatpush1.bf16.msra.mxu0 %v7435_v15  ;;  %v7402_v15 = vld [vmem:[#allocation6 + $0x68] ss:$16 sps:$4 sm:$0xff]  }
 0x142   :  { %v496_v60 = vadd.f32 %v495_v0, %v8264_v38  ;;  %3191 = vmatprep.mubr.bf16.mxu0 %v8381_v49  ;;  %3322 = vmatprep.subr.bf16.mxu0 %v7440_v26  ;;  %v867_v0 = vpop.f32.mrb[21].mxu0  ;;  %v7444_v26 = vld [vmem:[#allocation6 + $0x360] ss:$16 sps:$4 sm:$0xff]  }
 0x143   :  { %v1215_v8 = vpack.c.bf16 %v494_v9, %v490_v55  ;;  %6347 = vmatmul.mubr.msk.bf16.gmra.mrb[132].mxu1 %vm346_vm0, %v8004_v53  ;;  %3192 = vmatmul.mubr.bf16.gmra.mrb[84].mxu0 %v8386_v51  ;;  %v868_v29 = vadd.f32 %v867_v0, %v8283_v13  ;;  %v869_v34 = vpop.f32.mrb[22].mxu0  ;;  %v7449_v55 = vld [vmem:[#allocation6 + $0x384] ss:$16 sps:$4 sm:$0xff]  }
 0x144   :  { %v1216_v63 = vpack.c.bf16 %v496_v60, %v492_v19  ;;  %1026 = vmatprep.mubr.bf16.mxu1 %v10190_v11  ;;  %3886 = vmatpush1.bf16.msra.mxu1 %v7396_v46  ;;  %v870_v48 = vadd.f32 %v869_v34, %v8277_v2  ;;  %v871_v9 = vpop.f32.mrb[23].mxu0  ;;  %v7416_v34 = vld [vmem:[#allocation6 + $0xac] ss:$16 sps:$4 sm:$0xff]  }
 0x145   :  { %v1343_v23 = vmul.bf16 1045249613, %v1215_v8  ;;  %3887 = vmatprep.subr.bf16.mxu1 %v7404_v18  ;;  %3323 = vmatpush1.bf16.msra.mxu0 %v7438_v35  ;;  %v872_v19 = vadd.f32 %v871_v9, %v8283_v13  ;;  %v7408_v35 = vld [vmem:[#allocation6 + $0x88] ss:$16 sps:$4 sm:$0xff]  }
 0x146   :  { %v1344_v53 = vmul.bf16 1045249613, %v1216_v63  ;;  %v499_v5 = vpop.f32.mrb[28].mxu1  ;;  %3324 = vmatprep.subr.bf16.mxu0 %v7446_v61  ;;  %v8404_v18 = vpack.c.bf16 %v870_v48, %v866_v31 }
 0x147   :  { %v501_v46 = vpop.f32.mrb[29].mxu1  ;;  %v500_v60 = vadd.f32 %v499_v5, %v8261_v36  ;;  %v8407_v61 = vmax.bf16 %v1343_v23, %v1215_v8  ;;  %v8409_v59 = vpack.c.bf16 %v872_v19, %v868_v29  ;;  %v875_v8 = vpop.f32.mrb[24].mxu0  ;;  %v7414_v23 = vld [vmem:[#allocation6 + $0xa8] ss:$16 sps:$4 sm:$0xff]   ;;  %v7458_v19 = vld [vmem:[#allocation6 + $0x3c4] ss:$16 sps:$4 sm:$0xff]  }
 0x148   :  { %v503_v57 = vpop.f32.mrb[30].mxu1  ;;  %v8402_v52 = vmax.bf16 %v1344_v53, %v1216_v63  ;;  %3888 = vmatpush1.bf16.msra.mxu1 %v7402_v15  ;;  %10191 = vst [vmem:[#allocation21_spill] sm:$0xff] %v8404_v18  ;;  %v502_v5 = vadd.f32 %v501_v46, %v8264_v38  ;;  %v7455_v15 = vld [vmem:[#allocation6 + $0x3a4] ss:$16 sps:$4 sm:$0xff]   ;;  %v876_v29 = vadd.f32 %v875_v8, %v8277_v2 }
 0x149   :  { %v504_v0 = vadd.f32 %v503_v57, %v8261_v36  ;;  %v505_v32 = vpop.f32.mrb[31].mxu1  ;;  %3889 = vmatprep.subr.bf16.mxu1 %v7410_v16  ;;  %3325 = vmatpush1.bf16.msra.mxu0 %v7444_v26  ;;  %10192 = vst [vmem:[#allocation22_spill] sm:$0xff] %v8409_v59  ;;  %v7422_v26 = vld [vmem:[#allocation6 + $0xcc] ss:$16 sps:$4 sm:$0xff]   ;;  %v7456_v59 = vld [vmem:[#allocation6 + $0x3c0] ss:$16 sps:$4 sm:$0xff]  }
 0x14a   :  { %v506_v63 = vadd.f32 %v505_v32, %v8264_v38  ;;  %3201 = vmatprep.mubr.bf16.mxu0 %v8402_v52  ;;  %3326 = vmatprep.subr.bf16.mxu0 %v7449_v55  ;;  %v877_v32 = vpop.f32.mrb[25].mxu0  ;;  %v7453_v55 = vld [vmem:[#allocation6 + $0x3a0] ss:$16 sps:$4 sm:$0xff]  }
 0x14b   :  { %v1223_v31 = vpack.c.bf16 %v504_v0, %v500_v60  ;;  %6348 = vmatmul.mubr.msk.bf16.gmra.mrb[136].mxu1 %vm346_vm0, %v8017_v1  ;;  %3202 = vmatmul.mubr.bf16.gmra.mrb[88].mxu0 %v8407_v61  ;;  %v878_v48 = vadd.f32 %v877_v32, %v8283_v13  ;;  %v879_v9 = vpop.f32.mrb[26].mxu0 }
 0x14c   :  { %v1224_v16 = vpack.c.bf16 %v506_v63, %v502_v5  ;;  %1036 = vmatprep.mubr.bf16.mxu1 %v10190_v11  ;;  %3890 = vmatpush1.bf16.msra.mxu1 %v7408_v35  ;;  %v880_v60 = vadd.f32 %v879_v9, %v8277_v2  ;;  %v881_v57 = vpop.f32.mrb[27].mxu0  ;;  %v7428_v9 = vld [vmem:[#allocation6 + $0xec] ss:$16 sps:$4 sm:$0xff]  }
 0x14d   :  { %v1351_v53 = vmul.bf16 1045249613, %v1223_v31  ;;  %3891 = vmatprep.subr.bf16.mxu1 %v7416_v34  ;;  %3327 = vmatpush1.bf16.msra.mxu0 %v7447_v25  ;;  %v882_v0 = vadd.f32 %v881_v57, %v8283_v13  ;;  %v7420_v25 = vld [vmem:[#allocation6 + $0xc8] ss:$16 sps:$4 sm:$0xff]  }
 0x14e   :  { %v1352_v1 = vmul.bf16 1045249613, %v1224_v16  ;;  %v509_v46 = vpop.f32.mrb[32].mxu1  ;;  %3328 = vmatprep.subr.bf16.mxu0 %v7455_v15  ;;  %v8425_v34 = vpack.c.bf16 %v880_v60, %v876_v29 }
 0x14f   :  { %v511_v35 = vpop.f32.mrb[33].mxu1  ;;  %v510_v5 = vadd.f32 %v509_v46, %v8261_v36  ;;  %v8428_v15 = vmax.bf16 %v1351_v53, %v1223_v31  ;;  %v8430_v24 = vpack.c.bf16 %v882_v0, %v878_v48  ;;  %v885_v31 = vpop.f32.mrb[28].mxu0  ;;  %v7426_v53 = vld [vmem:[#allocation6 + $0xe8] ss:$16 sps:$4 sm:$0xff]   ;;  %v7479_v0 = vld [vmem:[#allocation6 + $0x404] ss:$16 sps:$4 sm:$0xff]  }
 0x150   :  { %v513_v63 = vpop.f32.mrb[34].mxu1  ;;  %v8423_v8 = vmax.bf16 %v1352_v1, %v1224_v16  ;;  %3892 = vmatpush1.bf16.msra.mxu1 %v7414_v23  ;;  %10193 = vst [vmem:[#allocation23_spill] sm:$0xff] %v8425_v34  ;;  %v512_v46 = vadd.f32 %v511_v35, %v8264_v38  ;;  %v7464_v23 = vld [vmem:[#allocation6 + $0x3e4] ss:$16 sps:$4 sm:$0xff]   ;;  %v886_v48 = vadd.f32 %v885_v31, %v8277_v2 }
 0x151   :  { %v514_v32 = vadd.f32 %v513_v63, %v8261_v36  ;;  %v515_v18 = vpop.f32.mrb[35].mxu1  ;;  %3893 = vmatprep.subr.bf16.mxu1 %v7422_v26  ;;  %3329 = vmatpush1.bf16.msra.mxu0 %v7453_v55  ;;  %10194 = vst [vmem:[#allocation24_spill] sm:$0xff] %v8430_v24  ;;  %v7434_v55 = vld [vmem:[#allocation6 + $0x10c] ss:$16 sps:$4 sm:$0xff]  }
 0x152   :  { %v516_v16 = vadd.f32 %v515_v18, %v8264_v38  ;;  %3211 = vmatprep.mubr.bf16.mxu0 %v8423_v8  ;;  %3330 = vmatprep.subr.bf16.mxu0 %v7458_v19  ;;  %v887_v18 = vpop.f32.mrb[29].mxu0  ;;  %v7462_v19 = vld [vmem:[#allocation6 + $0x3e0] ss:$16 sps:$4 sm:$0xff]  }
 0x153   :  { %v1231_v29 = vpack.c.bf16 %v514_v32, %v510_v5  ;;  %6349 = vmatmul.mubr.msk.bf16.gmra.mrb[140].mxu1 %vm346_vm0, %v8031_v7  ;;  %3212 = vmatmul.mubr.bf16.gmra.mrb[92].mxu0 %v8428_v15  ;;  %v888_v60 = vadd.f32 %v887_v18, %v8283_v13  ;;  %v889_v57 = vpop.f32.mrb[30].mxu0 }
 0x154   :  { %v1232_v26 = vpack.c.bf16 %v516_v16, %v512_v46  ;;  %1046 = vmatprep.mubr.bf16.mxu1 %v10190_v11  ;;  %3894 = vmatpush1.bf16.msra.mxu1 %v7420_v25  ;;  %v890_v5 = vadd.f32 %v889_v57, %v8277_v2  ;;  %v891_v63 = vpop.f32.mrb[31].mxu0  ;;  %v7443_v57 = vld [vmem:[#allocation6 + $0x12c] ss:$16 sps:$4 sm:$0xff]  }
 0x155   :  { %v1359_v1 = vmul.bf16 1045249613, %v1231_v29  ;;  %3895 = vmatprep.subr.bf16.mxu1 %v7428_v9  ;;  %3331 = vmatpush1.bf16.msra.mxu0 %v7456_v59  ;;  %v892_v32 = vadd.f32 %v891_v63, %v8283_v13  ;;  %v7432_v59 = vld [vmem:[#allocation6 + $0x108] ss:$16 sps:$4 sm:$0xff]  }
 0x156   :  { %v1360_v7 = vmul.bf16 1045249613, %v1232_v26  ;;  %v519_v35 = vpop.f32.mrb[36].mxu1  ;;  %3332 = vmatprep.subr.bf16.mxu0 %v7464_v23  ;;  %v8446_v9 = vpack.c.bf16 %v890_v5, %v886_v48 }
 0x157   :  { %v521_v25 = vpop.f32.mrb[37].mxu1  ;;  %v520_v46 = vadd.f32 %v519_v35, %v8261_v36  ;;  %v8449_v23 = vmax.bf16 %v1359_v1, %v1231_v29  ;;  %v8451_v24 = vpack.c.bf16 %v892_v32, %v888_v60  ;;  %v895_v29 = vpop.f32.mrb[32].mxu0 }
 0x158   :  { %v523_v16 = vpop.f32.mrb[38].mxu1  ;;  %v8444_v31 = vmax.bf16 %v1360_v7, %v1232_v26  ;;  %3896 = vmatpush1.bf16.msra.mxu1 %v7426_v53  ;;  %10195 = vst [vmem:[#allocation25_spill] sm:$0xff] %v8446_v9  ;;  %v522_v63 = vadd.f32 %v521_v25, %v8264_v38  ;;  %v896_v48 = vadd.f32 %v895_v29, %v8277_v2  ;;  %v897_v1 = vpop.f32.mrb[33].mxu0 }
 0x159   :  { %v524_v18 = vadd.f32 %v523_v16, %v8261_v36  ;;  %v525_v34 = vpop.f32.mrb[39].mxu1  ;;  %3897 = vmatprep.subr.bf16.mxu1 %v7434_v55  ;;  %3333 = vmatpush1.bf16.msra.mxu0 %v7462_v19  ;;  %10196 = vst [vmem:[#allocation26_spill] sm:$0xff] %v8451_v24  ;;  %v7441_v55 = vld [vmem:[#allocation6 + $0x128] ss:$16 sps:$4 sm:$0xff]   ;;  %v898_v60 = vadd.f32 %v897_v1, %v8283_v13  ;;  %v899_v7 = vpop.f32.mrb[34].mxu0 }
 0x15a   :  { %v526_v35 = vadd.f32 %v525_v34, %v8264_v38  ;;  %3221 = vmatprep.mubr.bf16.mxu0 %v8444_v31  ;;  %3495 = vmatprep.subr.bf16.mxu0 %v7479_v0  ;;  %v7452_v34 = vld [vmem:[#allocation6 + $0x14c] ss:$16 sps:$4 sm:$0xff]   ;;  %v901_v25 = vpop.f32.mrb[35].mxu0 }
 0x15b   :  { %v1239_v26 = vpack.c.bf16 %v524_v18, %v520_v46  ;;  %6350 = vmatmul.mubr.msk.bf16.gmra.mrb[144].mxu1 %vm346_vm0, %v8045_v12  ;;  %3222 = vmatmul.mubr.bf16.gmra.mrb[96].mxu0 %v8449_v23  ;;  %v900_v12 = vadd.f32 %v899_v7, %v8277_v2  ;;  %v902_v46 = vadd.f32 %v901_v25, %v8283_v13  ;;  %v7450_v18 = vld [vmem:[#allocation6 + $0x148] ss:$16 sps:$4 sm:$0xff]   ;;  %v7461_v7 = vld [vmem:[#allocation6 + $0x16c] ss:$16 sps:$4 sm:$0xff]  }
 0x15c   :  { %v1240_v53 = vpack.c.bf16 %v526_v35, %v522_v63  ;;  %1056 = vmatprep.mubr.bf16.mxu1 %v10190_v11  ;;  %3898 = vmatpush1.bf16.msra.mxu1 %v7432_v59 }
 0x15d   :  { %v1367_v19 = vmul.bf16 1045249613, %v1239_v26  ;;  %3899 = vmatprep.subr.bf16.mxu1 %v7443_v57  ;;  %v8466_v63 = vpack.c.bf16 %v900_v12, %v896_v48  ;;  %v8472_v9 = vpack.c.bf16 %v902_v46, %v898_v60  ;;  %v905_v48 = vpop.f32.mrb[36].mxu0 }
 0x15e   :  { %v1368_v0 = vmul.bf16 1045249613, %v1240_v53  ;;  %v529_v5 = vpop.f32.mrb[40].mxu1 }
 0x15f   :  { %v531_v32 = vpop.f32.mrb[41].mxu1  ;;  %10197 = vst [vmem:[#allocation27_spill] sm:$0xff] %v8466_v63  ;;  %v530_v57 = vadd.f32 %v529_v5, %v8261_v36  ;;  %v8470_v1 = vmax.bf16 %v1367_v19, %v1239_v26  ;;  %10198 = vst [vmem:[#allocation28_spill] sm:$0xff] %v8472_v9  ;;  %v7459_v26 = vld [vmem:[#allocation6 + $0x168] ss:$16 sps:$4 sm:$0xff]   ;;  %v906_v19 = vadd.f32 %v905_v48, %v8277_v2 }
 0x160   :  { %v533_v16 = vpop.f32.mrb[42].mxu1  ;;  %v8464_v59 = vmax.bf16 %v1368_v0, %v1240_v53  ;;  %3900 = vmatpush1.bf16.msra.mxu1 %v7441_v55  ;;  %v532_v25 = vadd.f32 %v531_v32, %v8264_v38  ;;  %v7467_v5 = vld [vmem:[#allocation6 + $0x18c] ss:$16 sps:$4 sm:$0xff]  }
 0x161   :  { %v534_v35 = vadd.f32 %v533_v16, %v8261_v36  ;;  %v535_v29 = vpop.f32.mrb[43].mxu1  ;;  %3901 = vmatprep.subr.bf16.mxu1 %v7452_v34  ;;  %v907_v34 = vpop.f32.mrb[37].mxu0 }
 0x162   :  { %v536_v53 = vadd.f32 %v535_v29, %v8264_v38  ;;  %3231 = vmatprep.mubr.bf16.mxu0 %v8464_v59  ;;  %v908_v12 = vadd.f32 %v907_v34, %v8283_v13  ;;  %v909_v32 = vpop.f32.mrb[38].mxu0 }
 0x163   :  { %v1247_v55 = vpack.c.bf16 %v534_v35, %v530_v57  ;;  %6351 = vmatmul.mubr.msk.bf16.gmra.mrb[148].mxu1 %vm346_vm0, %v8059_v17  ;;  %3232 = vmatmul.mubr.bf16.gmra.mrb[100].mxu0 %v8470_v1  ;;  %v910_v17 = vadd.f32 %v909_v32, %v8277_v2  ;;  %v911_v57 = vpop.f32.mrb[39].mxu0  ;;  %v7470_v32 = vld [vmem:[#allocation6 + $0x1ac] ss:$16 sps:$4 sm:$0xff]  }
 0x164   :  { %v1248_v0 = vpack.c.bf16 %v536_v53, %v532_v25  ;;  %1066 = vmatprep.mubr.bf16.mxu1 %v10190_v11  ;;  %3902 = vmatpush1.bf16.msra.mxu1 %v7450_v18  ;;  %v912_v29 = vadd.f32 %v911_v57, %v8283_v13  ;;  %v7465_v53 = vld [vmem:[#allocation6 + $0x188] ss:$16 sps:$4 sm:$0xff]  }
 0x165   :  { %v1375_v60 = vmul.bf16 1045249613, %v1247_v55  ;;  %3903 = vmatprep.subr.bf16.mxu1 %v7461_v7  ;;  %v8487_v48 = vpack.c.bf16 %v910_v17, %v906_v19  ;;  %v915_v19 = vpop.f32.mrb[40].mxu0 }
 0x166   :  { %v1376_v46 = vmul.bf16 1045249613, %v1248_v0  ;;  %v539_v16 = vpop.f32.mrb[44].mxu1  ;;  %v8493_v24 = vpack.c.bf16 %v912_v29, %v908_v12 }
 0x167   :  { %v541_v35 = vpop.f32.mrb[45].mxu1  ;;  %10199 = vst [vmem:[#allocation29_spill] sm:$0xff] %v8487_v48  ;;  %v540_v7 = vadd.f32 %v539_v16, %v8261_v36  ;;  %v8491_v9 = vmax.bf16 %v1375_v60, %v1247_v55  ;;  %v7468_v55 = vld [vmem:[#allocation6 + $0x1a8] ss:$16 sps:$4 sm:$0xff]   ;;  %v916_v60 = vadd.f32 %v915_v19, %v8277_v2 }
 0x168   :  { %v543_v25 = vpop.f32.mrb[46].mxu1  ;;  %v8485_v18 = vmax.bf16 %v1376_v46, %v1248_v0  ;;  %3904 = vmatpush1.bf16.msra.mxu1 %v7459_v26  ;;  %10200 = vst [vmem:[#allocation30_spill] sm:$0xff] %v8493_v24  ;;  %v542_v57 = vadd.f32 %v541_v35, %v8264_v38 }
 0x169   :  { %v544_v34 = vadd.f32 %v543_v25, %v8261_v36  ;;  %v545_v63 = vpop.f32.mrb[47].mxu1  ;;  %3905 = vmatprep.subr.bf16.mxu1 %v7467_v5  ;;  %v917_v5 = vpop.f32.mrb[41].mxu0 }
 0x16a   :  { %v546_v0 = vadd.f32 %v545_v63, %v8264_v38  ;;  %3241 = vmatprep.mubr.bf16.mxu0 %v8485_v18  ;;  %v7473_v63 = vld [vmem:[#allocation6 + $0x1cc] ss:$16 sps:$4 sm:$0xff]   ;;  %v918_v16 = vadd.f32 %v917_v5, %v8283_v13  ;;  %v919_v17 = vpop.f32.mrb[42].mxu0 }
 0x16b   :  { %v1255_v26 = vpack.c.bf16 %v544_v34, %v540_v7  ;;  %6352 = vmatmul.mubr.msk.bf16.gmra.mrb[152].mxu1 %vm346_vm0, %v8073_v22  ;;  %3242 = vmatmul.mubr.bf16.gmra.mrb[104].mxu0 %v8491_v9  ;;  %v920_v22 = vadd.f32 %v919_v17, %v8277_v2  ;;  %v921_v25 = vpop.f32.mrb[43].mxu0  ;;  %v7476_v17 = vld [vmem:[#allocation6 + $0x1ec] ss:$16 sps:$4 sm:$0xff]  }
 0x16c   :  { %v1256_v46 = vpack.c.bf16 %v546_v0, %v542_v57  ;;  %1076 = vmatprep.mubr.bf16.mxu1 %v10190_v11  ;;  %3906 = vmatpush1.bf16.msra.mxu1 %v7465_v53  ;;  %v922_v34 = vadd.f32 %v921_v25, %v8283_v13  ;;  %v7471_v0 = vld [vmem:[#allocation6 + $0x1c8] ss:$16 sps:$4 sm:$0xff]  }
 0x16d   :  { %v1383_v12 = vmul.bf16 1045249613, %v1255_v26  ;;  %3907 = vmatprep.subr.bf16.mxu1 %v7470_v32  ;;  %v8508_v19 = vpack.c.bf16 %v920_v22, %v916_v60  ;;  %v925_v60 = vpop.f32.mrb[44].mxu0 }
 0x16e   :  { %v1384_v35 = vmul.bf16 1045249613, %v1256_v46  ;;  %v549_v29 = vpop.f32.mrb[48].mxu1  ;;  %v8514_v37 = vpack.c.bf16 %v922_v34, %v918_v16 }
 0x16f   :  { %v551_v7 = vpop.f32.mrb[49].mxu1  ;;  %10201 = vst [vmem:[#allocation31_spill] sm:$0xff] %v8508_v19  ;;  %v550_v32 = vadd.f32 %v549_v29, %v8261_v36  ;;  %v8512_v24 = vmax.bf16 %v1383_v12, %v1255_v26  ;;  %v7474_v26 = vld [vmem:[#allocation6 + $0x1e8] ss:$16 sps:$4 sm:$0xff]   ;;  %v926_v12 = vadd.f32 %v925_v60, %v8277_v2 }
 0x170   :  { %v553_v57 = vpop.f32.mrb[50].mxu1  ;;  %v8506_v53 = vmax.bf16 %v1384_v35, %v1256_v46  ;;  %3908 = vmatpush1.bf16.msra.mxu1 %v7468_v55  ;;  %10202 = vst [vmem:[#allocation32_spill] sm:$0xff] %v8514_v37  ;;  %v552_v25 = vadd.f32 %v551_v7, %v8264_v38 }
 0x171   :  { %v554_v5 = vadd.f32 %v553_v57, %v8261_v36  ;;  %v555_v48 = vpop.f32.mrb[51].mxu1  ;;  %3909 = vmatprep.subr.bf16.mxu1 %v7473_v63  ;;  %v927_v63 = vpop.f32.mrb[45].mxu0 }
 0x172   :  { %v556_v46 = vadd.f32 %v555_v48, %v8264_v38  ;;  %3251 = vmatprep.mubr.bf16.mxu0 %v8506_v53  ;;  %v7482_v48 = vld [vmem:[#allocation6 + $0x20c] ss:$16 sps:$4 sm:$0xff]   ;;  %v928_v29 = vadd.f32 %v927_v63, %v8283_v13  ;;  %v929_v22 = vpop.f32.mrb[46].mxu0 }
 0x173   :  { %v1263_v55 = vpack.c.bf16 %v554_v5, %v550_v32  ;;  %6353 = vmatmul.mubr.msk.bf16.gmra.mrb[156].mxu1 %vm346_vm0, %v8087_v27  ;;  %3252 = vmatmul.mubr.bf16.gmra.mrb[108].mxu0 %v8512_v24  ;;  %v930_v27 = vadd.f32 %v929_v22, %v8277_v2  ;;  %v931_v57 = vpop.f32.mrb[47].mxu0 }
 0x174   :  { %v1264_v35 = vpack.c.bf16 %v556_v46, %v552_v25  ;;  %1086 = vmatprep.mubr.bf16.mxu1 %v10190_v11  ;;  %3910 = vmatpush1.bf16.msra.mxu1 %v7471_v0  ;;  %v932_v5 = vadd.f32 %v931_v57, %v8283_v13 }
 0x175   :  { %v1391_v16 = vmul.bf16 1045249613, %v1263_v55  ;;  %3911 = vmatprep.subr.bf16.mxu1 %v7476_v17  ;;  %v8529_v46 = vpack.c.bf16 %v930_v27, %v926_v12 }
 0x176   :  { %v1392_v7 = vmul.bf16 1045249613, %v1264_v35  ;;  %v559_v34 = vpop.f32.mrb[52].mxu1  ;;  %v8535_v37 = vpack.c.bf16 %v932_v5, %v928_v29 }
 0x177   :  { %v561_v32 = vpop.f32.mrb[53].mxu1  ;;  %10203 = vst [vmem:[#allocation33_spill] sm:$0xff] %v8529_v46  ;;  %v560_v17 = vadd.f32 %v559_v34, %v8261_v36  ;;  %v8533_v19 = vmax.bf16 %v1391_v16, %v1263_v55 }
 0x178   :  { %v563_v25 = vpop.f32.mrb[54].mxu1  ;;  %v8527_v0 = vmax.bf16 %v1392_v7, %v1264_v35  ;;  %3912 = vmatpush1.bf16.msra.mxu1 %v7474_v26  ;;  %10204 = vst [vmem:[#allocation34_spill] sm:$0xff] %v8535_v37  ;;  %v562_v22 = vadd.f32 %v561_v32, %v8264_v38  ;;  %v935_v26 = vpop.f32.mrb[48].mxu0 }
 0x179   :  { %v564_v60 = vadd.f32 %v563_v25, %v8261_v36  ;;  %v565_v63 = vpop.f32.mrb[55].mxu1  ;;  %4074 = vmatprep.subr.bf16.mxu1 %v7482_v48  ;;  %v936_v55 = vadd.f32 %v935_v26, %v8277_v2  ;;  %v937_v16 = vpop.f32.mrb[49].mxu0 }
 0x17a   :  { %v566_v57 = vadd.f32 %v565_v63, %v8264_v38  ;;  %3261 = vmatprep.mubr.bf16.mxu0 %v8527_v0  ;;  %v938_v29 = vadd.f32 %v937_v16, %v8283_v13  ;;  %v939_v7 = vpop.f32.mrb[50].mxu0 }
 0x17b   :  { %v1271_v35 = vpack.c.bf16 %v564_v60, %v560_v17  ;;  %6354 = vmatmul.mubr.msk.bf16.gmra.mrb[160].mxu1 %vm346_vm0, %v8101_v33  ;;  %3262 = vmatmul.mubr.bf16.gmra.mrb[112].mxu0 %v8533_v19  ;;  %v940_v32 = vadd.f32 %v939_v7, %v8277_v2  ;;  %v941_v5 = vpop.f32.mrb[51].mxu0 }
 0x17c   :  { %v1272_v12 = vpack.c.bf16 %v566_v57, %v562_v22  ;;  %1096 = vmatprep.mubr.bf16.mxu1 %v10190_v11  ;;  %v942_v33 = vadd.f32 %v941_v5, %v8283_v13 }
 0x17d   :  { %v1399_v48 = vmul.bf16 1045249613, %v1271_v35  ;;  %v8550_v63 = vpack.c.bf16 %v940_v32, %v936_v55 }
 0x17e   :  { %v1400_v34 = vmul.bf16 1045249613, %v1272_v12  ;;  %v569_v27 = vpop.f32.mrb[56].mxu1  ;;  %v8556_v46 = vpack.c.bf16 %v942_v33, %v938_v29 }
 0x17f   :  { %v571_v25 = vpop.f32.mrb[57].mxu1  ;;  %10205 = vst [vmem:[#allocation35_spill] sm:$0xff] %v8550_v63  ;;  %v570_v22 = vadd.f32 %v569_v27, %v8261_v36  ;;  %v8554_v16 = vmax.bf16 %v1399_v48, %v1271_v35 }
 0x180   :  { %v573_v17 = vpop.f32.mrb[58].mxu1  ;;  %v8548_v60 = vmax.bf16 %v1400_v34, %v1272_v12  ;;  %10207 = vst [vmem:[#allocation37_spill] sm:$0xff] %v8556_v46  ;;  %v572_v7 = vadd.f32 %v571_v25, %v8264_v38  ;;  %v945_v12 = vpop.f32.mrb[52].mxu0 }
 0x181   :  { %v574_v57 = vadd.f32 %v573_v17, %v8261_v36  ;;  %v575_v26 = vpop.f32.mrb[59].mxu1  ;;  %10206 = vst [vmem:[#allocation36_spill] sm:$0xff] %v8554_v16  ;;  %v946_v35 = vadd.f32 %v945_v12, %v8277_v2  ;;  %v947_v48 = vpop.f32.mrb[53].mxu0 }
 0x182   :  { %v576_v37 = vadd.f32 %v575_v26, %v8264_v38  ;;  %3271 = vmatprep.mubr.bf16.mxu0 %v8548_v60  ;;  %v948_v34 = vadd.f32 %v947_v48, %v8283_v13  ;;  %v949_v27 = vpop.f32.mrb[54].mxu0 }
 0x183   :  { %v1279_v5 = vpack.c.bf16 %v574_v57, %v570_v22  ;;  %6355 = vmatmul.mubr.msk.bf16.gmra.mrb[164].mxu1 %vm346_vm0, %v8115_v40  ;;  %3272 = vmatmul.mubr.bf16.gmra.mrb[116].mxu0 %v8554_v16  ;;  %v950_v33 = vadd.f32 %v949_v27, %v8277_v2  ;;  %v951_v17 = vpop.f32.mrb[55].mxu0 }
 0x184   :  { %v1280_v55 = vpack.c.bf16 %v576_v37, %v572_v7  ;;  %1106 = vmatprep.mubr.bf16.mxu1 %v10190_v11  ;;  %v952_v40 = vadd.f32 %v951_v17, %v8283_v13  ;;  %v10145_v37 = vsub.s32 2, %v8246_v30 }
 0x185   :  { %v1407_v29 = vmul.bf16 1045249613, %v1279_v5  ;;  %v8572_v7 = vpack.c.bf16 %v950_v33, %v946_v35 }
 0x186   :  { %v1408_v32 = vmul.bf16 1045249613, %v1280_v55  ;;  %v579_v25 = vpop.f32.mrb[60].mxu1  ;;  %v8578_v16 = vpack.c.bf16 %v952_v40, %v948_v34 }
 0x187   :  { %v581_v22 = vpop.f32.mrb[61].mxu1  ;;  %10209 = vst [vmem:[#allocation39_spill] sm:$0xff] %v8572_v7  ;;  %v580_v12 = vadd.f32 %v579_v25, %v8261_v36  ;;  %v8576_v46 = vmax.bf16 %v1407_v29, %v1279_v5 }
 0x188   :  { %v583_v57 = vpop.f32.mrb[62].mxu1  ;;  %v8569_v26 = vmax.bf16 %v1408_v32, %v1280_v55  ;;  %10211 = vst [vmem:[#allocation41_spill] sm:$0xff] %v8578_v16  ;;  %v582_v27 = vadd.f32 %v581_v22, %v8264_v38  ;;  %v10149_v55 = vsub.s32 3, %v8246_v30 }
 0x189   :  { %v584_v48 = vadd.f32 %v583_v57, %v8261_v36  ;;  %v585_v63 = vpop.f32.mrb[63].mxu1  ;;  %10210 = vst [vmem:[#allocation40_spill] sm:$0xff] %v8576_v46  ;;  %v955_v36 = vpop.f32.mrb[56].mxu0 }
 0x18a   :  { %10208 = vst [vmem:[#allocation38_spill] sm:$0xff] %v8569_v26  ;;  %v586_v17 = vadd.f32 %v585_v63, %v8264_v38  ;;  %3281 = vmatprep.mubr.bf16.mxu0 %v8569_v26  ;;  %v956_v5 = vadd.f32 %v955_v36, %v8277_v2  ;;  %v957_v29 = vpop.f32.mrb[57].mxu0  ;;  %v8592_v38 = vld [vmem:[%s10107_s2] sm:$0xff] }
 0x18b   :  { %v1287_v32 = vpack.c.bf16 %v584_v48, %v580_v12  ;;  %6356 = vmatmul.mubr.msk.bf16.gmra.mrb[168].mxu1 %vm346_vm0, %v8129_v50  ;;  %3282 = vmatmul.mubr.bf16.gmra.mrb[120].mxu0 %v8576_v46  ;;  %v8597_v63 = vrot.slane %v8592_v38, %v10145_v37  ;;  %v958_v50 = vadd.f32 %v957_v29, %v8283_v13  ;;  %v959_v25 = vpop.f32.mrb[58].mxu0 }
 0x18c   :  { %v1288_v35 = vpack.c.bf16 %v586_v17, %v582_v27  ;;  %1116 = vmatprep.mubr.bf16.mxu1 %v10190_v11  ;;  %v8603_v40 = vrot.slane %v8592_v38, %v10149_v55  ;;  %v960_v57 = vadd.f32 %v959_v25, %v8277_v2  ;;  %v961_v12 = vpop.f32.mrb[59].mxu0 }
 0x18d   :  { %v1415_v34 = vmul.bf16 1045249613, %v1287_v32  ;;  %v962_v27 = vadd.f32 %v961_v12, %v8283_v13 }
 0x18e   :  { %v1416_v33 = vmul.bf16 1045249613, %v1288_v35  ;;  %v622_v22 = vpop.f32.mrb[64].mxu1  ;;  %v8609_v37 = vpack.c.bf16 %v960_v57, %v956_v5 }
 0x18f   :  { %v624_v48 = vpop.f32.mrb[65].mxu1  ;;  %v623_v29 = vadd.f32 %v622_v22, %v8597_v63  ;;  %v8613_v46 = vmax.bf16 %v1415_v34, %v1287_v32  ;;  %v8615_v55 = vpack.c.bf16 %v962_v27, %v958_v50 }
 0x190   :  { %v626_v17 = vpop.f32.mrb[66].mxu1  ;;  %v8607_v36 = vmax.bf16 %v1416_v33, %v1288_v35  ;;  %10213 = vst [vmem:[#allocation43_spill] sm:$0xff] %v8609_v37  ;;  %v625_v25 = vadd.f32 %v624_v48, %v8603_v40  ;;  %v965_v35 = vpop.f32.mrb[60].mxu0 }
 0x191   :  { %v627_v7 = vadd.f32 %v626_v17, %v8597_v63  ;;  %v628_v16 = vpop.f32.mrb[67].mxu1  ;;  %10214 = vst [vmem:[#allocation44_spill] sm:$0xff] %v8613_v46  ;;  %10215 = vst [vmem:[#allocation45_spill] sm:$0xff] %v8615_v55  ;;  %v966_v32 = vadd.f32 %v965_v35, %v8277_v2  ;;  %v967_v34 = vpop.f32.mrb[61].mxu0 }
 0x192   :  { %10212 = vst [vmem:[#allocation42_spill] sm:$0xff] %v8607_v36  ;;  %v629_v26 = vadd.f32 %v628_v16, %v8603_v40  ;;  %3291 = vmatprep.mubr.bf16.mxu0 %v8607_v36  ;;  %v968_v33 = vadd.f32 %v967_v34, %v8283_v13  ;;  %v969_v22 = vpop.f32.mrb[62].mxu0 }
 0x193   :  { %v1169_v12 = vpack.c.bf16 %v627_v7, %v623_v29  ;;  %6357 = vmatmul.mubr.msk.bf16.gmra.mrb[172].mxu1 %vm346_vm0, %v8143_v58  ;;  %3292 = vmatmul.mubr.bf16.gmra.mrb[124].mxu0 %v8613_v46  ;;  %v970_v7 = vadd.f32 %v969_v22, %v8277_v2  ;;  %v971_v48 = vpop.f32.mrb[63].mxu0  ;;  %v7485_v46 = vld [vmem:[#allocation6 + $0x424] ss:$16 sps:$4 sm:$0xff]  }
 0x194   :  { %v1170_v5 = vpack.c.bf16 %v629_v26, %v625_v25  ;;  %1126 = vmatprep.mubr.bf16.mxu1 %v10190_v11  ;;  %v972_v58 = vadd.f32 %v971_v48, %v8283_v13  ;;  %v7477_v26 = vld [vmem:[#allocation6 + $0x400] ss:$16 sps:$4 sm:$0xff]  }
 0x195   :  { %v1297_v50 = vmul.bf16 1045249613, %v1169_v12  ;;  %v8630_v25 = vpack.c.bf16 %v970_v7, %v966_v32  ;;  %v7483_v32 = vld [vmem:[#allocation6 + $0x420] ss:$16 sps:$4 sm:$0xff]  }
 0x196   :  { %v1298_v16 = vmul.bf16 1045249613, %v1170_v5  ;;  %v632_v57 = vpop.f32.mrb[68].mxu1  ;;  %v8636_v36 = vpack.c.bf16 %v972_v58, %v968_v33  ;;  %v7491_v33 = vld [vmem:[#allocation6 + $0x444] ss:$16 sps:$4 sm:$0xff]  }
 0x197   :  { %v634_v27 = vpop.f32.mrb[69].mxu1  ;;  %10216 = vst [vmem:[#allocation46_spill] sm:$0xff] %v8630_v25  ;;  %v8632_v35 = vmax.bf16 %v1297_v50, %v1169_v12  ;;  %v633_v37 = vadd.f32 %v632_v57, %v8597_v63 }
 0x198   :  { %v636_v17 = vpop.f32.mrb[70].mxu1  ;;  %v8628_v29 = vmax.bf16 %v1298_v16, %v1170_v5  ;;  %v635_v2 = vadd.f32 %v634_v27, %v8603_v40 }
 0x199   :  { %v637_v34 = vadd.f32 %v636_v17, %v8597_v63  ;;  %v638_v55 = vpop.f32.mrb[71].mxu1  ;;  %v7497_v17 = vld [vmem:[#allocation6 + $0x464] ss:$16 sps:$4 sm:$0xff]  }
 0x19a   :  { %v639_v13 = vadd.f32 %v638_v55, %v8603_v40  ;;  %3334 = vmatprep.mubr.bf16.mxu0 %v8628_v29 }
 0x19b   :  { %v1177_v5 = vpack.c.bf16 %v637_v34, %v633_v37  ;;  %6358 = vmatmul.mubr.msk.bf16.gmra.mrb[176].mxu1 %vm346_vm0, %v8157_v3  ;;  %3335 = vmatmul.mubr.bf16.vlgmr.msra.gmra.mrb[64].mxu0 %v8632_v35  ;;  %v7489_v37 = vld [vmem:[#allocation6 + $0x440] ss:$16 sps:$4 sm:$0xff]  }
 0x19c   :  { %v1178_v12 = vpack.c.bf16 %v639_v13, %v635_v2  ;;  %1136 = vmatprep.mubr.bf16.mxu1 %v10190_v11  ;;  %3496 = vmatpush1.bf16.msra.mxu0 %v7477_v26  ;;  %v7495_v13 = vld [vmem:[#allocation6 + $0x460] ss:$16 sps:$4 sm:$0xff]  }
 0x19d   :  { %v1305_v50 = vmul.bf16 1045249613, %v1177_v5  ;;  %3497 = vmatprep.subr.bf16.mxu0 %v7485_v46 }
 0x19e   :  { %v1306_v22 = vmul.bf16 1045249613, %v1178_v12  ;;  %v642_v16 = vpop.f32.mrb[72].mxu1 }
 0x19f   :  { %v644_v57 = vpop.f32.mrb[73].mxu1  ;;  %v643_v3 = vadd.f32 %v642_v16, %v8597_v63  ;;  %v8649_v58 = vmax.bf16 %v1305_v50, %v1177_v5 }
 0x1a0   :  { %v646_v55 = vpop.f32.mrb[74].mxu1  ;;  %v8645_v7 = vmax.bf16 %v1306_v22, %v1178_v12  ;;  %3498 = vmatpush1.bf16.msra.mxu0 %v7483_v32  ;;  %v645_v46 = vadd.f32 %v644_v57, %v8603_v40  ;;  %v7503_v12 = vld [vmem:[#allocation6 + $0x484] ss:$16 sps:$4 sm:$0xff]   ;;  %v7501_v57 = vld [vmem:[#allocation6 + $0x480] ss:$16 sps:$4 sm:$0xff]  }
 0x1a1   :  { %v647_v48 = vadd.f32 %v646_v55, %v8597_v63  ;;  %v648_v27 = vpop.f32.mrb[75].mxu1  ;;  %3499 = vmatprep.subr.bf16.mxu0 %v7491_v33 }
 0x1a2   :  { %v649_v26 = vadd.f32 %v648_v27, %v8603_v40  ;;  %3344 = vmatprep.mubr.bf16.mxu0 %v8645_v7 }
 0x1a3   :  { %v1185_v34 = vpack.c.bf16 %v647_v48, %v643_v3  ;;  %6359 = vmatmul.mubr.msk.bf16.gmra.mrb[180].mxu1 %vm346_vm0, %v8171_v6  ;;  %3345 = vmatmul.mubr.bf16.gmra.mrb[68].mxu0 %v8649_v58 }
 0x1a4   :  { %v1186_v2 = vpack.c.bf16 %v649_v26, %v645_v46  ;;  %1146 = vmatprep.mubr.bf16.mxu1 %v10190_v11  ;;  %3500 = vmatpush1.bf16.msra.mxu0 %v7489_v37  ;;  %v7509_v37 = vld [vmem:[#allocation6 + $0x4a4] ss:$16 sps:$4 sm:$0xff]  }
 0x1a5   :  { %v1313_v5 = vmul.bf16 1045249613, %v1185_v34  ;;  %3501 = vmatprep.subr.bf16.mxu0 %v7497_v17 }
 0x1a6   :  { %v1314_v32 = vmul.bf16 1045249613, %v1186_v2  ;;  %v652_v50 = vpop.f32.mrb[76].mxu1 }
 0x1a7   :  { %v654_v33 = vpop.f32.mrb[77].mxu1  ;;  %v653_v6 = vadd.f32 %v652_v50, %v8597_v63  ;;  %v8662_v48 = vmax.bf16 %v1313_v5, %v1185_v34  ;;  %v7507_v34 = vld [vmem:[#allocation6 + $0x4a0] ss:$16 sps:$4 sm:$0xff]  }
 0x1a8   :  { %v656_v22 = vpop.f32.mrb[78].mxu1  ;;  %v8658_v16 = vmax.bf16 %v1314_v32, %v1186_v2  ;;  %3502 = vmatpush1.bf16.msra.mxu0 %v7495_v13  ;;  %v655_v27 = vadd.f32 %v654_v33, %v8603_v40  ;;  %v7515_v13 = vld [vmem:[#allocation6 + $0x4c4] ss:$16 sps:$4 sm:$0xff]  }
 0x1a9   :  { %v657_v55 = vadd.f32 %v656_v22, %v8597_v63  ;;  %v658_v3 = vpop.f32.mrb[79].mxu1  ;;  %3503 = vmatprep.subr.bf16.mxu0 %v7503_v12  ;;  %v7513_v22 = vld [vmem:[#allocation6 + $0x4c0] ss:$16 sps:$4 sm:$0xff]  }
 0x1aa   :  { %v659_v17 = vadd.f32 %v658_v3, %v8603_v40  ;;  %3354 = vmatprep.mubr.bf16.mxu0 %v8658_v16 }
 0x1ab   :  { %v1193_v46 = vpack.c.bf16 %v657_v55, %v653_v6  ;;  %6360 = vmatmul.mubr.msk.bf16.gmra.mrb[184].mxu1 %vm346_vm0, %v8185_v10  ;;  %3355 = vmatmul.mubr.bf16.gmra.mrb[72].mxu0 %v8662_v48 }
 0x1ac   :  { %v1194_v26 = vpack.c.bf16 %v659_v17, %v655_v27  ;;  %1156 = vmatprep.mubr.bf16.mxu1 %v10190_v11  ;;  %3504 = vmatpush1.bf16.msra.mxu0 %v7501_v57  ;;  %v7521_v11 = vld [vmem:[#allocation6 + $0x4e4] ss:$16 sps:$4 sm:$0xff]  }
 0x1ad   :  { %v1321_v2 = vmul.bf16 1045249613, %v1193_v46  ;;  %3505 = vmatprep.subr.bf16.mxu0 %v7509_v37 }
 0x1ae   :  { %v1322_v5 = vmul.bf16 1045249613, %v1194_v26  ;;  %v662_v12 = vpop.f32.mrb[80].mxu1 }
 0x1af   :  { %v664_v32 = vpop.f32.mrb[81].mxu1  ;;  %v663_v10 = vadd.f32 %v662_v12, %v8597_v63  ;;  %v8675_v3 = vmax.bf16 %v1321_v2, %v1193_v46  ;;  %v7519_v46 = vld [vmem:[#allocation6 + $0x4e0] ss:$16 sps:$4 sm:$0xff]  }
 0x1b0   :  { %v666_v50 = vpop.f32.mrb[82].mxu1  ;;  %v8671_v33 = vmax.bf16 %v1322_v5, %v1194_v26  ;;  %3506 = vmatpush1.bf16.msra.mxu0 %v7507_v34  ;;  %v665_v57 = vadd.f32 %v664_v32, %v8603_v40  ;;  %v7527_v34 = vld [vmem:[#allocation6 + $0x504] ss:$16 sps:$4 sm:$0xff]  }
 0x1b1   :  { %v667_v6 = vadd.f32 %v666_v50, %v8597_v63  ;;  %v668_v55 = vpop.f32.mrb[83].mxu1  ;;  %3507 = vmatprep.subr.bf16.mxu0 %v7515_v13  ;;  %v7480_v50 = vld [vmem:[#allocation6 + $0x208] ss:$16 sps:$4 sm:$0xff]  }
 0x1b2   :  { %v669_v37 = vadd.f32 %v668_v55, %v8603_v40  ;;  %3364 = vmatprep.mubr.bf16.mxu0 %v8671_v33 }
 0x1b3   :  { %v1201_v27 = vpack.c.bf16 %v667_v6, %v663_v10  ;;  %6361 = vmatmul.mubr.msk.bf16.gmra.mrb[188].mxu1 %vm346_vm0, %v8199_v14  ;;  %3365 = vmatmul.mubr.bf16.gmra.mrb[76].mxu0 %v8675_v3 }
 0x1b4   :  { %v1202_v17 = vpack.c.bf16 %v669_v37, %v665_v57  ;;  %3913 = vmatprep.mubr.bf16.mxu1 %v8275_v62  ;;  %3508 = vmatpush1.bf16.msra.mxu0 %v7513_v22  ;;  %v7488_v62 = vld [vmem:[#allocation6 + $0x22c] ss:$16 sps:$4 sm:$0xff]   ;;  %v7525_v22 = vld [vmem:[#allocation6 + $0x500] ss:$16 sps:$4 sm:$0xff]   ;;  %v7533_v37 = vld [vmem:[#allocation6 + $0x524] ss:$16 sps:$4 sm:$0xff]  }
 0x1b5   :  { %v1329_v26 = vmul.bf16 1045249613, %v1201_v27  ;;  %3509 = vmatprep.subr.bf16.mxu0 %v7521_v11 }
 0x1b6   :  { %v1330_v2 = vmul.bf16 1045249613, %v1202_v17  ;;  %v672_v13 = vpop.f32.mrb[84].mxu1 }
 0x1b7   :  { %v674_v5 = vpop.f32.mrb[85].mxu1  ;;  %v673_v14 = vadd.f32 %v672_v13, %v8597_v63  ;;  %v8688_v55 = vmax.bf16 %v1329_v26, %v1201_v27  ;;  %v7486_v27 = vld [vmem:[#allocation6 + $0x228] ss:$16 sps:$4 sm:$0xff]  }
 0x1b8   :  { %v676_v12 = vpop.f32.mrb[86].mxu1  ;;  %v8684_v32 = vmax.bf16 %v1330_v2, %v1202_v17  ;;  %3510 = vmatpush1.bf16.msra.mxu0 %v7519_v46  ;;  %v675_v11 = vadd.f32 %v674_v5, %v8603_v40  ;;  %v7531_v2 = vld [vmem:[#allocation6 + $0x520] ss:$16 sps:$4 sm:$0xff]  }
 0x1b9   :  { %v677_v10 = vadd.f32 %v676_v12, %v8597_v63  ;;  %v678_v6 = vpop.f32.mrb[87].mxu1  ;;  %3511 = vmatprep.subr.bf16.mxu0 %v7527_v34  ;;  %v7494_v34 = vld [vmem:[#allocation6 + $0x24c] ss:$16 sps:$4 sm:$0xff]   ;;  %v7536_v12 = vld [vmem:[#allocation6 + $0x544] ss:$16 sps:$4 sm:$0xff]  }
 0x1ba   :  { %v679_v57 = vadd.f32 %v678_v6, %v8603_v40  ;;  %3374 = vmatprep.mubr.bf16.mxu0 %v8684_v32 }
 0x1bb   :  { %v1209_v17 = vpack.c.bf16 %v677_v10, %v673_v14  ;;  %3375 = vmatmul.mubr.bf16.gmra.mrb[80].mxu0 %v8688_v55  ;;  %3914 = vmatmul.mubr.bf16.vlgmr.msra.gmra.mrb[192].mxu1 %v8279_v4  ;;  %v7492_v4 = vld [vmem:[#allocation6 + $0x248] ss:$16 sps:$4 sm:$0xff]  }
 0x1bc   :  { %v1210_v46 = vpack.c.bf16 %v679_v57, %v675_v11  ;;  %3923 = vmatprep.mubr.bf16.mxu1 %v8296_v43  ;;  %4075 = vmatpush1.bf16.msra.mxu1 %v7480_v50 }
 0x1bd   :  { %v1337_v26 = vmul.bf16 1045249613, %v1209_v17  ;;  %4076 = vmatprep.subr.bf16.mxu1 %v7488_v62  ;;  %3512 = vmatpush1.bf16.msra.mxu0 %v7525_v22  ;;  %v7500_v62 = vld [vmem:[#allocation6 + $0x26c] ss:$16 sps:$4 sm:$0xff]   ;;  %v7534_v22 = vld [vmem:[#allocation6 + $0x540] ss:$16 sps:$4 sm:$0xff]  }
 0x1be   :  { %v1338_v13 = vmul.bf16 1045249613, %v1210_v46  ;;  %v682_v5 = vpop.f32.mrb[88].mxu1  ;;  %3513 = vmatprep.subr.bf16.mxu0 %v7533_v37 }
 0x1bf   :  { %v684_v6 = vpop.f32.mrb[89].mxu1  ;;  %v683_v11 = vadd.f32 %v682_v5, %v8597_v63  ;;  %v8700_v57 = vmax.bf16 %v1337_v26, %v1209_v17  ;;  %v7498_v17 = vld [vmem:[#allocation6 + $0x268] ss:$16 sps:$4 sm:$0xff]  }
 0x1c0   :  { %v686_v14 = vpop.f32.mrb[90].mxu1  ;;  %v8696_v10 = vmax.bf16 %v1338_v13, %v1210_v46  ;;  %4077 = vmatpush1.bf16.msra.mxu1 %v7486_v27  ;;  %v685_v37 = vadd.f32 %v684_v6, %v8603_v40  ;;  %v7542_v46 = vld [vmem:[#allocation6 + $0x564] ss:$16 sps:$4 sm:$0xff]  }
 0x1c1   :  { %v687_v43 = vadd.f32 %v686_v14, %v8597_v63  ;;  %v688_v50 = vpop.f32.mrb[91].mxu1  ;;  %4078 = vmatprep.subr.bf16.mxu1 %v7494_v34  ;;  %3514 = vmatpush1.bf16.msra.mxu0 %v7531_v2  ;;  %v7506_v34 = vld [vmem:[#allocation6 + $0x28c] ss:$16 sps:$4 sm:$0xff]   ;;  %v7540_v2 = vld [vmem:[#allocation6 + $0x560] ss:$16 sps:$4 sm:$0xff]  }
 0x1c2   :  { %v689_v25 = vadd.f32 %v688_v50, %v8603_v40  ;;  %3384 = vmatprep.mubr.bf16.mxu0 %v8696_v10  ;;  %3515 = vmatprep.subr.bf16.mxu0 %v7536_v12  ;;  %v7545_v12 = vld [vmem:[#allocation6 + $0x584] ss:$16 sps:$4 sm:$0xff]  }
 0x1c3   :  { %v1217_v27 = vpack.c.bf16 %v687_v43, %v683_v11  ;;  %3385 = vmatmul.mubr.bf16.gmra.mrb[84].mxu0 %v8700_v57  ;;  %3924 = vmatmul.mubr.bf16.gmra.mrb[196].mxu1 %v8302_v54  ;;  %v7504_v54 = vld [vmem:[#allocation6 + $0x288] ss:$16 sps:$4 sm:$0xff]  }
 0x1c4   :  { %v1218_v13 = vpack.c.bf16 %v689_v25, %v685_v37  ;;  %3933 = vmatprep.mubr.bf16.mxu1 %v8317_v28  ;;  %4079 = vmatpush1.bf16.msra.mxu1 %v7492_v4 }
 0x1c5   :  { %v1345_v26 = vmul.bf16 1045249613, %v1217_v27  ;;  %4080 = vmatprep.subr.bf16.mxu1 %v7500_v62  ;;  %3516 = vmatpush1.bf16.msra.mxu0 %v7534_v22  ;;  %v7512_v62 = vld [vmem:[#allocation6 + $0x2ac] ss:$16 sps:$4 sm:$0xff]   ;;  %v7543_v22 = vld [vmem:[#allocation6 + $0x580] ss:$16 sps:$4 sm:$0xff]  }
 0x1c6   :  { %v1346_v5 = vmul.bf16 1045249613, %v1218_v13  ;;  %v692_v6 = vpop.f32.mrb[92].mxu1  ;;  %3517 = vmatprep.subr.bf16.mxu0 %v7542_v46 }
 0x1c7   :  { %v694_v14 = vpop.f32.mrb[93].mxu1  ;;  %v693_v25 = vadd.f32 %v692_v6, %v8597_v63  ;;  %v8712_v50 = vmax.bf16 %v1345_v26, %v1217_v27  ;;  %v7510_v27 = vld [vmem:[#allocation6 + $0x2a8] ss:$16 sps:$4 sm:$0xff]  }
 0x1c8   :  { %v696_v11 = vpop.f32.mrb[94].mxu1  ;;  %v8708_v43 = vmax.bf16 %v1346_v5, %v1218_v13  ;;  %4081 = vmatpush1.bf16.msra.mxu1 %v7498_v17  ;;  %v695_v37 = vadd.f32 %v694_v14, %v8603_v40  ;;  %v7551_v13 = vld [vmem:[#allocation6 + $0x5a4] ss:$16 sps:$4 sm:$0xff]  }
 0x1c9   :  { %v697_v28 = vadd.f32 %v696_v11, %v8597_v63  ;;  %v698_v4 = vpop.f32.mrb[95].mxu1  ;;  %4082 = vmatprep.subr.bf16.mxu1 %v7506_v34  ;;  %3518 = vmatpush1.bf16.msra.mxu0 %v7540_v2  ;;  %v7518_v34 = vld [vmem:[#allocation6 + $0x2cc] ss:$16 sps:$4 sm:$0xff]   ;;  %v7549_v2 = vld [vmem:[#allocation6 + $0x5a0] ss:$16 sps:$4 sm:$0xff]  }
 0x1ca   :  { %v699_v46 = vadd.f32 %v698_v4, %v8603_v40  ;;  %3394 = vmatprep.mubr.bf16.mxu0 %v8708_v43  ;;  %3519 = vmatprep.subr.bf16.mxu0 %v7545_v12  ;;  %v7554_v12 = vld [vmem:[#allocation6 + $0x5c4] ss:$16 sps:$4 sm:$0xff]  }
 0x1cb   :  { %v1225_v17 = vpack.c.bf16 %v697_v28, %v693_v25  ;;  %3395 = vmatmul.mubr.bf16.gmra.mrb[88].mxu0 %v8712_v50  ;;  %3934 = vmatmul.mubr.bf16.gmra.mrb[200].mxu1 %v8323_v39  ;;  %v7516_v39 = vld [vmem:[#allocation6 + $0x2c8] ss:$16 sps:$4 sm:$0xff]  }
 0x1cc   :  { %v1226_v5 = vpack.c.bf16 %v699_v46, %v695_v37  ;;  %3943 = vmatprep.mubr.bf16.mxu1 %v8338_v21  ;;  %4083 = vmatpush1.bf16.msra.mxu1 %v7504_v54 }
 0x1cd   :  { %v1353_v26 = vmul.bf16 1045249613, %v1225_v17  ;;  %4084 = vmatprep.subr.bf16.mxu1 %v7512_v62  ;;  %3520 = vmatpush1.bf16.msra.mxu0 %v7543_v22  ;;  %v7524_v62 = vld [vmem:[#allocation6 + $0x2ec] ss:$16 sps:$4 sm:$0xff]   ;;  %v7552_v22 = vld [vmem:[#allocation6 + $0x5c0] ss:$16 sps:$4 sm:$0xff]  }
 0x1ce   :  { %v1354_v6 = vmul.bf16 1045249613, %v1226_v5  ;;  %v702_v14 = vpop.f32.mrb[96].mxu1  ;;  %3521 = vmatprep.subr.bf16.mxu0 %v7551_v13 }
 0x1cf   :  { %v704_v11 = vpop.f32.mrb[97].mxu1  ;;  %v703_v4 = vadd.f32 %v702_v14, %v8597_v63  ;;  %v8724_v37 = vmax.bf16 %v1353_v26, %v1225_v17  ;;  %v7522_v17 = vld [vmem:[#allocation6 + $0x2e8] ss:$16 sps:$4 sm:$0xff]  }
 0x1d0   :  { %v706_v25 = vpop.f32.mrb[98].mxu1  ;;  %v8720_v28 = vmax.bf16 %v1354_v6, %v1226_v5  ;;  %4085 = vmatpush1.bf16.msra.mxu1 %v7510_v27  ;;  %v705_v46 = vadd.f32 %v704_v11, %v8603_v40  ;;  %v7560_v5 = vld [vmem:[#allocation6 + $0x5e4] ss:$16 sps:$4 sm:$0xff]  }
 0x1d1   :  { %v707_v21 = vadd.f32 %v706_v25, %v8597_v63  ;;  %v708_v54 = vpop.f32.mrb[99].mxu1  ;;  %4086 = vmatprep.subr.bf16.mxu1 %v7518_v34  ;;  %3522 = vmatpush1.bf16.msra.mxu0 %v7549_v2  ;;  %v7530_v34 = vld [vmem:[#allocation6 + $0x30c] ss:$16 sps:$4 sm:$0xff]   ;;  %v7558_v2 = vld [vmem:[#allocation6 + $0x5e0] ss:$16 sps:$4 sm:$0xff]  }
 0x1d2   :  { %v709_v13 = vadd.f32 %v708_v54, %v8603_v40  ;;  %3404 = vmatprep.mubr.bf16.mxu0 %v8720_v28  ;;  %3523 = vmatprep.subr.bf16.mxu0 %v7554_v12  ;;  %v7575_v12 = vld [vmem:[#allocation6 + $0x604] ss:$16 sps:$4 sm:$0xff]  }
 0x1d3   :  { %v1233_v27 = vpack.c.bf16 %v707_v21, %v703_v4  ;;  %3405 = vmatmul.mubr.bf16.gmra.mrb[92].mxu0 %v8724_v37  ;;  %3944 = vmatmul.mubr.bf16.gmra.mrb[204].mxu1 %v8344_v45  ;;  %v7528_v45 = vld [vmem:[#allocation6 + $0x308] ss:$16 sps:$4 sm:$0xff]  }
 0x1d4   :  { %v1234_v6 = vpack.c.bf16 %v709_v13, %v705_v46  ;;  %3953 = vmatprep.mubr.bf16.mxu1 %v8359_v20  ;;  %4087 = vmatpush1.bf16.msra.mxu1 %v7516_v39 }
 0x1d5   :  { %v1361_v26 = vmul.bf16 1045249613, %v1233_v27  ;;  %4088 = vmatprep.subr.bf16.mxu1 %v7524_v62  ;;  %3524 = vmatpush1.bf16.msra.mxu0 %v7552_v22  ;;  %v7539_v62 = vld [vmem:[#allocation6 + $0x32c] ss:$16 sps:$4 sm:$0xff]  }
 0x1d6   :  { %v1362_v14 = vmul.bf16 1045249613, %v1234_v6  ;;  %v712_v11 = vpop.f32.mrb[100].mxu1  ;;  %3525 = vmatprep.subr.bf16.mxu0 %v7560_v5 }
 0x1d7   :  { %v714_v25 = vpop.f32.mrb[101].mxu1  ;;  %v713_v54 = vadd.f32 %v712_v11, %v8597_v63  ;;  %v8736_v46 = vmax.bf16 %v1361_v26, %v1233_v27  ;;  %v7537_v27 = vld [vmem:[#allocation6 + $0x328] ss:$16 sps:$4 sm:$0xff]   ;;  %v7548_v26 = vld [vmem:[#allocation6 + $0x34c] ss:$16 sps:$4 sm:$0xff]  }
 0x1d8   :  { %v716_v4 = vpop.f32.mrb[102].mxu1  ;;  %v8732_v21 = vmax.bf16 %v1362_v14, %v1234_v6  ;;  %4089 = vmatpush1.bf16.msra.mxu1 %v7522_v17  ;;  %v715_v22 = vadd.f32 %v714_v25, %v8603_v40 }
 0x1d9   :  { %v717_v20 = vadd.f32 %v716_v4, %v8597_v63  ;;  %v718_v39 = vpop.f32.mrb[103].mxu1  ;;  %4090 = vmatprep.subr.bf16.mxu1 %v7530_v34  ;;  %3526 = vmatpush1.bf16.msra.mxu0 %v7558_v2 }
 0x1da   :  { %v719_v13 = vadd.f32 %v718_v39, %v8603_v40  ;;  %3414 = vmatprep.mubr.bf16.mxu0 %v8732_v21  ;;  %3688 = vmatprep.subr.bf16.mxu0 %v7575_v12  ;;  %v7546_v12 = vld [vmem:[#allocation6 + $0x348] ss:$16 sps:$4 sm:$0xff]  }
 0x1db   :  { %v1241_v5 = vpack.c.bf16 %v717_v20, %v713_v54  ;;  %3415 = vmatmul.mubr.bf16.gmra.mrb[96].mxu0 %v8736_v46  ;;  %3954 = vmatmul.mubr.bf16.gmra.mrb[208].mxu1 %v8365_v41 }
 0x1dc   :  { %v1242_v6 = vpack.c.bf16 %v719_v13, %v715_v22  ;;  %3963 = vmatprep.mubr.bf16.mxu1 %v8381_v49  ;;  %4091 = vmatpush1.bf16.msra.mxu1 %v7528_v45  ;;  %v7557_v49 = vld [vmem:[#allocation6 + $0x36c] ss:$16 sps:$4 sm:$0xff]   ;;  %v7555_v13 = vld [vmem:[#allocation6 + $0x368] ss:$16 sps:$4 sm:$0xff]  }
 0x1dd   :  { %v1369_v17 = vmul.bf16 1045249613, %v1241_v5  ;;  %4092 = vmatprep.subr.bf16.mxu1 %v7539_v62 }
 0x1de   :  { %v1370_v34 = vmul.bf16 1045249613, %v1242_v6  ;;  %v722_v2 = vpop.f32.mrb[104].mxu1 }
 0x1df   :  { %v724_v14 = vpop.f32.mrb[105].mxu1  ;;  %v723_v4 = vadd.f32 %v722_v2, %v8597_v63  ;;  %v8748_v20 = vmax.bf16 %v1369_v17, %v1241_v5 }
 0x1e0   :  { %v726_v11 = vpop.f32.mrb[106].mxu1  ;;  %v8744_v25 = vmax.bf16 %v1370_v34, %v1242_v6  ;;  %4093 = vmatpush1.bf16.msra.mxu1 %v7537_v27  ;;  %v725_v45 = vadd.f32 %v724_v14, %v8603_v40  ;;  %v7563_v6 = vld [vmem:[#allocation6 + $0x38c] ss:$16 sps:$4 sm:$0xff]   ;;  %v7561_v14 = vld [vmem:[#allocation6 + $0x388] ss:$16 sps:$4 sm:$0xff]  }
 0x1e1   :  { %v727_v41 = vadd.f32 %v726_v11, %v8597_v63  ;;  %v728_v54 = vpop.f32.mrb[107].mxu1  ;;  %4094 = vmatprep.subr.bf16.mxu1 %v7548_v26 }
 0x1e2   :  { %v729_v39 = vadd.f32 %v728_v54, %v8603_v40  ;;  %3424 = vmatprep.mubr.bf16.mxu0 %v8744_v25 }
 0x1e3   :  { %v1249_v62 = vpack.c.bf16 %v727_v41, %v723_v4  ;;  %3425 = vmatmul.mubr.bf16.gmra.mrb[100].mxu0 %v8748_v20  ;;  %3964 = vmatmul.mubr.bf16.gmra.mrb[212].mxu1 %v8386_v51 }
 0x1e4   :  { %v1250_v22 = vpack.c.bf16 %v729_v39, %v725_v45  ;;  %3973 = vmatprep.mubr.bf16.mxu1 %v8402_v52  ;;  %4095 = vmatpush1.bf16.msra.mxu1 %v7546_v12  ;;  %v7566_v52 = vld [vmem:[#allocation6 + $0x3ac] ss:$16 sps:$4 sm:$0xff]   ;;  %v7564_v39 = vld [vmem:[#allocation6 + $0x3a8] ss:$16 sps:$4 sm:$0xff]  }
 0x1e5   :  { %v1377_v5 = vmul.bf16 1045249613, %v1249_v62  ;;  %4096 = vmatprep.subr.bf16.mxu1 %v7557_v49 }
 0x1e6   :  { %v1378_v27 = vmul.bf16 1045249613, %v1250_v22  ;;  %v732_v17 = vpop.f32.mrb[108].mxu1 }
 0x1e7   :  { %v734_v26 = vpop.f32.mrb[109].mxu1  ;;  %v733_v11 = vadd.f32 %v732_v17, %v8597_v63  ;;  %v8760_v41 = vmax.bf16 %v1377_v5, %v1249_v62 }
 0x1e8   :  { %v736_v34 = vpop.f32.mrb[110].mxu1  ;;  %v8756_v2 = vmax.bf16 %v1378_v27, %v1250_v22  ;;  %4097 = vmatpush1.bf16.msra.mxu1 %v7555_v13  ;;  %v735_v12 = vadd.f32 %v734_v26, %v8603_v40  ;;  %v7569_v22 = vld [vmem:[#allocation6 + $0x3cc] ss:$16 sps:$4 sm:$0xff]   ;;  %v7567_v26 = vld [vmem:[#allocation6 + $0x3c8] ss:$16 sps:$4 sm:$0xff]  }
 0x1e9   :  { %v737_v51 = vadd.f32 %v736_v34, %v8597_v63  ;;  %v738_v4 = vpop.f32.mrb[111].mxu1  ;;  %4098 = vmatprep.subr.bf16.mxu1 %v7563_v6 }
 0x1ea   :  { %v739_v54 = vadd.f32 %v738_v4, %v8603_v40  ;;  %3434 = vmatprep.mubr.bf16.mxu0 %v8756_v2 }
 0x1eb   :  { %v1257_v49 = vpack.c.bf16 %v737_v51, %v733_v11  ;;  %3435 = vmatmul.mubr.bf16.gmra.mrb[104].mxu0 %v8760_v41  ;;  %3974 = vmatmul.mubr.bf16.gmra.mrb[216].mxu1 %v8407_v61 }
 0x1ec   :  { %v1258_v45 = vpack.c.bf16 %v739_v54, %v735_v12  ;;  %3983 = vmatprep.mubr.bf16.mxu1 %v8423_v8  ;;  %4099 = vmatpush1.bf16.msra.mxu1 %v7561_v14  ;;  %v7572_v8 = vld [vmem:[#allocation6 + $0x3ec] ss:$16 sps:$4 sm:$0xff]   ;;  %v7570_v54 = vld [vmem:[#allocation6 + $0x3e8] ss:$16 sps:$4 sm:$0xff]  }
 0x1ed   :  { %v1385_v62 = vmul.bf16 1045249613, %v1257_v49  ;;  %4100 = vmatprep.subr.bf16.mxu1 %v7566_v52 }
 0x1ee   :  { %v1386_v13 = vmul.bf16 1045249613, %v1258_v45  ;;  %v742_v5 = vpop.f32.mrb[112].mxu1 }
 0x1ef   :  { %v744_v6 = vpop.f32.mrb[113].mxu1  ;;  %v743_v34 = vadd.f32 %v742_v5, %v8597_v63  ;;  %v8772_v51 = vmax.bf16 %v1385_v62, %v1257_v49 }
 0x1f0   :  { %v746_v27 = vpop.f32.mrb[114].mxu1  ;;  %v8768_v17 = vmax.bf16 %v1386_v13, %v1258_v45  ;;  %4101 = vmatpush1.bf16.msra.mxu1 %v7564_v39  ;;  %v745_v14 = vadd.f32 %v744_v6, %v8603_v40  ;;  %v7578_v45 = vld [vmem:[#allocation6 + $0x40c] ss:$16 sps:$4 sm:$0xff]  }
 0x1f1   :  { %v747_v61 = vadd.f32 %v746_v27, %v8597_v63  ;;  %v748_v11 = vpop.f32.mrb[115].mxu1  ;;  %4102 = vmatprep.subr.bf16.mxu1 %v7569_v22 }
 0x1f2   :  { %v749_v4 = vadd.f32 %v748_v11, %v8603_v40  ;;  %3444 = vmatprep.mubr.bf16.mxu0 %v8768_v17 }
 0x1f3   :  { %v1265_v52 = vpack.c.bf16 %v747_v61, %v743_v34  ;;  %3445 = vmatmul.mubr.bf16.gmra.mrb[108].mxu0 %v8772_v51  ;;  %3984 = vmatmul.mubr.bf16.gmra.mrb[220].mxu1 %v8428_v15 }
 0x1f4   :  { %v1266_v12 = vpack.c.bf16 %v749_v4, %v745_v14  ;;  %3993 = vmatprep.mubr.bf16.mxu1 %v8444_v31  ;;  %4103 = vmatpush1.bf16.msra.mxu1 %v7567_v26 }
 0x1f5   :  { %v1393_v49 = vmul.bf16 1045249613, %v1265_v52  ;;  %4104 = vmatprep.subr.bf16.mxu1 %v7572_v8 }
 0x1f6   :  { %v1394_v39 = vmul.bf16 1045249613, %v1266_v12  ;;  %v752_v62 = vpop.f32.mrb[116].mxu1 }
 0x1f7   :  { %v754_v22 = vpop.f32.mrb[117].mxu1  ;;  %v753_v6 = vadd.f32 %v752_v62, %v8597_v63  ;;  %v8784_v34 = vmax.bf16 %v1393_v49, %v1265_v52 }
 0x1f8   :  { %v756_v13 = vpop.f32.mrb[118].mxu1  ;;  %v8780_v5 = vmax.bf16 %v1394_v39, %v1266_v12  ;;  %4105 = vmatpush1.bf16.msra.mxu1 %v7570_v54  ;;  %v755_v31 = vadd.f32 %v754_v22, %v8603_v40 }
 0x1f9   :  { %v757_v27 = vadd.f32 %v756_v13, %v8597_v63  ;;  %v758_v15 = vpop.f32.mrb[119].mxu1  ;;  %4267 = vmatprep.subr.bf16.mxu1 %v7578_v45 }
 0x1fa   :  { %v759_v26 = vadd.f32 %v758_v15, %v8603_v40  ;;  %3454 = vmatprep.mubr.bf16.mxu0 %v8780_v5 }
 0x1fb   :  { %v1273_v61 = vpack.c.bf16 %v757_v27, %v753_v6  ;;  %3455 = vmatmul.mubr.bf16.gmra.mrb[112].mxu0 %v8784_v34  ;;  %3994 = vmatmul.mubr.bf16.gmra.mrb[224].mxu1 %v8449_v23 }
 0x1fc   :  { %v1274_v11 = vpack.c.bf16 %v759_v26, %v755_v31  ;;  %4003 = vmatprep.mubr.bf16.mxu1 %v8464_v59 }
 0x1fd   :  { %v1401_v8 = vmul.bf16 1045249613, %v1273_v61 }
 0x1fe   :  { %v1402_v14 = vmul.bf16 1045249613, %v1274_v11  ;;  %v762_v4 = vpop.f32.mrb[120].mxu1 }
 0x1ff   :  { %v764_v52 = vpop.f32.mrb[121].mxu1  ;;  %v763_v49 = vadd.f32 %v762_v4, %v8597_v63  ;;  %v8796_v62 = vmax.bf16 %v1401_v8, %v1273_v61 }
 0x200   :  { %v766_v12 = vpop.f32.mrb[122].mxu1  ;;  %v8792_v54 = vmax.bf16 %v1402_v14, %v1274_v11  ;;  %v765_v22 = vadd.f32 %v764_v52, %v8603_v40  ;;  %v172_v52 = vsub.s32 6, %v8246_v30 }
 0x201   :  { %v767_v45 = vadd.f32 %v766_v12, %v8597_v63  ;;  %v768_v39 = vpop.f32.mrb[123].mxu1  ;;  %v176_v12 = vsub.s32 7, %v8246_v30 }
 0x202   :  { %v769_v23 = vadd.f32 %v768_v39, %v8603_v40  ;;  %3464 = vmatprep.mubr.bf16.mxu0 %v8792_v54  ;;  %v8819_v39 = vrot.slane %v8592_v38, %v172_v52  ;;  %v1299_v52 = vmul.bf16 1045249613, %v8298_v47 }
 0x203   :  { %v1281_v59 = vpack.c.bf16 %v767_v45, %v763_v49  ;;  %3465 = vmatmul.mubr.bf16.gmra.mrb[116].mxu0 %v8796_v62  ;;  %4004 = vmatmul.mubr.bf16.gmra.mrb[228].mxu1 %v8470_v1 }
 0x204   :  { %v1282_v13 = vpack.c.bf16 %v769_v23, %v765_v22  ;;  %4013 = vmatprep.mubr.bf16.mxu1 %v8485_v18  ;;  %v1300_v22 = vmul.bf16 1045249613, %v8304_v56 }
 0x205   :  { %v1409_v6 = vmul.bf16 1045249613, %v1281_v59 }
 0x206   :  { %v1410_v27 = vmul.bf16 1045249613, %v1282_v13  ;;  %v772_v15 = vpop.f32.mrb[124].mxu1 }
 0x207   :  { %v774_v31 = vpop.f32.mrb[125].mxu1  ;;  %v773_v11 = vadd.f32 %v772_v15, %v8597_v63  ;;  %v8808_v4 = vmax.bf16 %v1409_v6, %v1281_v59  ;;  %v8823_v59 = vrot.slane %v8592_v38, %v176_v12  ;;  %v8835_v38 = vmax.bf16 %v1300_v22, %v8304_v56  ;;  %v7573_v22 = vld [vmem:[#allocation6 + $0x600] ss:$16 sps:$4 sm:$0xff]  }
 0x208   :  { %v776_v26 = vpop.f32.mrb[126].mxu1  ;;  %v8804_v61 = vmax.bf16 %v1410_v27, %v1282_v13  ;;  %v775_v1 = vadd.f32 %v774_v31, %v8603_v40 }
 0x209   :  { %v777_v8 = vadd.f32 %v776_v26, %v8597_v63  ;;  %v778_v14 = vpop.f32.mrb[127].mxu1 }
 0x20a   :  { %v779_v18 = vadd.f32 %v778_v14, %v8603_v40  ;;  %3474 = vmatprep.mubr.bf16.mxu0 %v8804_v61 }
 0x20b   :  { %v1289_v49 = vpack.c.bf16 %v777_v8, %v773_v11  ;;  %3475 = vmatmul.mubr.bf16.gmra.mrb[120].mxu0 %v8808_v4  ;;  %4014 = vmatmul.mubr.bf16.gmra.mrb[232].mxu1 %v8491_v9 }
 0x20c   :  { %v1290_v45 = vpack.c.bf16 %v779_v18, %v775_v1  ;;  %4023 = vmatprep.mubr.bf16.mxu1 %v8506_v53  ;;  %v1308_v1 = vmul.bf16 1045249613, %v8325_v42 }
 0x20d   :  { %v1417_v63 = vmul.bf16 1045249613, %v1289_v49 }
 0x20e   :  { %v1418_v23 = vmul.bf16 1045249613, %v1290_v45  ;;  %v1008_v40 = vpop.f32.mrb[128].mxu1 }
 0x20f   :  { %v1010_v13 = vpop.f32.mrb[129].mxu1  ;;  %v1009_v9 = vadd.f32 %v1008_v40, %v8819_v39  ;;  %v8829_v31 = vmax.bf16 %v1417_v63, %v1289_v49  ;;  %v8848_v49 = vmax.bf16 %v1299_v52, %v8298_v47  ;;  %v8855_v40 = vmax.bf16 %v1308_v1, %v8325_v42 }
 0x210   :  { %v1012_v6 = vpop.f32.mrb[130].mxu1  ;;  %v8825_v27 = vmax.bf16 %v1418_v23, %v1290_v45  ;;  %v1011_v26 = vadd.f32 %v1010_v13, %v8823_v59  ;;  %v7581_v13 = vld [vmem:[#allocation6 + $0x624] ss:$16 sps:$4 sm:$0xff]  }
 0x211   :  { %v1013_v15 = vadd.f32 %v1012_v6, %v8819_v39  ;;  %v1014_v53 = vpop.f32.mrb[131].mxu1  ;;  %10217 = vst [vmem:[#allocation47_spill] sm:$0xff] %v8848_v49  ;;  %10218 = vst [vmem:[#allocation48_spill] sm:$0xff] %v8855_v40 }
 0x212   :  { %v1015_v11 = vadd.f32 %v1014_v53, %v8823_v59  ;;  %3484 = vmatprep.mubr.bf16.mxu0 %v8825_v27  ;;  %v10219_v53 = vld [vmem:[#allocation16_spill] sm:$0xff] }
 0x213   :  { %v8837_v8 = vpack.c.bf16 %v1013_v15, %v1009_v9  ;;  %3485 = vmatmul.mubr.bf16.gmra.mrb[124].mxu0 %v8829_v31  ;;  %4024 = vmatmul.mubr.bf16.gmra.mrb[236].mxu1 %v8512_v24  ;;  %v1307_v9 = vmul.bf16 1045249613, %v8319_v44  ;;  %v7579_v15 = vld [vmem:[#allocation6 + $0x620] ss:$16 sps:$4 sm:$0xff]   ;;  %v1316_v42 = vmul.bf16 1045249613, %v10219_v53 }
 0x214   :  { %v8841_v14 = vpack.c.bf16 %v1015_v11, %v1011_v26  ;;  %3527 = vmatprep.mubr.bf16.mxu0 %v8835_v38  ;;  %4033 = vmatprep.mubr.bf16.mxu1 %v8527_v0  ;;  %v7587_v11 = vld [vmem:[#allocation6 + $0x644] ss:$16 sps:$4 sm:$0xff]  }
 0x216   :  { %v1018_v18 = vpop.f32.mrb[132].mxu1 }
 0x217   :  { %v1020_v12 = vpop.f32.mrb[133].mxu1  ;;  %v1019_v45 = vadd.f32 %v1018_v18, %v8819_v39 }
 0x218   :  { %v1022_v56 = vpop.f32.mrb[134].mxu1  ;;  %v1021_v23 = vadd.f32 %v1020_v12, %v8823_v59 }
 0x219   :  { %v1023_v24 = vadd.f32 %v1022_v56, %v8819_v39  ;;  %v1024_v63 = vpop.f32.mrb[135].mxu1  ;;  %v8870_v56 = vmax.bf16 %v1307_v9, %v8319_v44  ;;  %v10223_v44 = vld [vmem:[#allocation38_spill] sm:$0xff]  ;;  %v10224_v9 = vld [vmem:[#allocation15_spill] sm:$0xff] }
 0x21a   :  { %v1025_v0 = vadd.f32 %v1024_v63, %v8823_v59  ;;  %v8875_v63 = vmax.bf16 %v1316_v42, %v10219_v53  ;;  %v10225_v53 = vld [vmem:[#allocation18_spill] sm:$0xff] }
 0x21b   :  { %v8857_v6 = vpack.c.bf16 %v1023_v24, %v1019_v45  ;;  %3528 = vmatmul.mubr.bf16.vlgmr.msra.gmra.mrb[64].mxu0 %v8848_v49  ;;  %4034 = vmatmul.mubr.bf16.gmra.mrb[240].mxu1 %v8533_v19  ;;  %10220 = vst [vmem:[#allocation16_spill] sm:$0xff] %v8870_v56  ;;  %v1324_v42 = vmul.bf16 1045249613, %v10225_v53  ;;  %v7584_v49 = vld [vmem:[#allocation6 + $0x42c] ss:$16 sps:$4 sm:$0xff]  }
 0x21c   :  { %v8861_v47 = vpack.c.bf16 %v1025_v0, %v1021_v23  ;;  %3537 = vmatprep.mubr.bf16.mxu0 %v8855_v40  ;;  %4043 = vmatprep.mubr.bf16.mxu1 %v8548_v60  ;;  %v7585_v60 = vld [vmem:[#allocation6 + $0x640] ss:$16 sps:$4 sm:$0xff]   ;;  %10221 = vst [vmem:[#allocation49_spill] sm:$0xff] %v8875_v63 }
 0x21d   :  { %3689 = vmatpush1.bf16.msra.mxu0 %v7573_v22  ;;  %v7593_v22 = vld [vmem:[#allocation6 + $0x664] ss:$16 sps:$4 sm:$0xff]   ;;  %v8895_v30 = vmax.bf16 %v1324_v42, %v10225_v53 }
 0x21e   :  { %v1028_v26 = vpop.f32.mrb[136].mxu1  ;;  %3690 = vmatprep.subr.bf16.mxu0 %v7581_v13  ;;  %v10222_v0 = vld [vmem:[#allocation36_spill] sm:$0xff] }
 0x21f   :  { %v1030_v52 = vpop.f32.mrb[137].mxu1  ;;  %v1029_v18 = vadd.f32 %v1028_v26, %v8819_v39  ;;  %v7591_v26 = vld [vmem:[#allocation6 + $0x660] ss:$16 sps:$4 sm:$0xff]   ;;  %10227 = vst [vmem:[#allocation38_spill] sm:$0xff] %v8895_v30 }
 0x220   :  { %v1032_v1 = vpop.f32.mrb[138].mxu1  ;;  %v1031_v45 = vadd.f32 %v1030_v52, %v8823_v59  ;;  %v7599_v52 = vld [vmem:[#allocation6 + $0x684] ss:$16 sps:$4 sm:$0xff]  }
 0x221   :  { %v1033_v19 = vadd.f32 %v1032_v1, %v8819_v39  ;;  %v1034_v12 = vpop.f32.mrb[139].mxu1  ;;  %3691 = vmatpush1.bf16.msra.mxu0 %v7579_v15  ;;  %v1315_v15 = vmul.bf16 1045249613, %v10224_v9  ;;  %v10231_v53 = vld [vmem:[#allocation20_spill] sm:$0xff] }
 0x222   :  { %v1035_v24 = vadd.f32 %v1034_v12, %v8823_v59  ;;  %3692 = vmatprep.subr.bf16.mxu0 %v7587_v11  ;;  %v1332_v42 = vmul.bf16 1045249613, %v10231_v53 }
 0x223   :  { %v8877_v23 = vpack.c.bf16 %v1033_v19, %v1029_v18  ;;  %3538 = vmatmul.mubr.bf16.gmra.mrb[68].mxu0 %v8870_v56  ;;  %4044 = vmatmul.mubr.bf16.gmra.mrb[244].mxu1 %v10222_v0  ;;  %v7597_v0 = vld [vmem:[#allocation6 + $0x680] ss:$16 sps:$4 sm:$0xff]  }
 0x224   :  { %v8881_v13 = vpack.c.bf16 %v1035_v24, %v1031_v45  ;;  %3547 = vmatprep.mubr.bf16.mxu0 %v8875_v63  ;;  %4053 = vmatprep.mubr.bf16.mxu1 %v10223_v44  ;;  %v8890_v24 = vmax.bf16 %v1315_v15, %v10224_v9  ;;  %v10229_v9 = vld [vmem:[#allocation42_spill] sm:$0xff]  ;;  %v10230_v15 = vld [vmem:[#allocation17_spill] sm:$0xff]  ;;  %v8915_v56 = vmax.bf16 %v1332_v42, %v10231_v53 }
 0x225   :  { %3693 = vmatpush1.bf16.msra.mxu0 %v7585_v60  ;;  %v10237_v53 = vld [vmem:[#allocation22_spill] sm:$0xff] }
 0x226   :  { %v1038_v11 = vpop.f32.mrb[140].mxu1  ;;  %3694 = vmatprep.subr.bf16.mxu0 %v7593_v22  ;;  %10226 = vst [vmem:[#allocation36_spill] sm:$0xff] %v8890_v24  ;;  %v7605_v22 = vld [vmem:[#allocation6 + $0x6a4] ss:$16 sps:$4 sm:$0xff]   ;;  %10233 = vst [vmem:[#allocation18_spill] sm:$0xff] %v8915_v56 }
 0x227   :  { %v1040_v1 = vpop.f32.mrb[141].mxu1  ;;  %v1039_v19 = vadd.f32 %v1038_v11, %v8819_v39  ;;  %v10228_v11 = vld [vmem:[#allocation40_spill] sm:$0xff]  ;;  %v1340_v42 = vmul.bf16 1045249613, %v10237_v53 }
 0x228   :  { %v1042_v18 = vpop.f32.mrb[142].mxu1  ;;  %v1041_v60 = vadd.f32 %v1040_v1, %v8823_v59  ;;  %v7603_v1 = vld [vmem:[#allocation6 + $0x6a0] ss:$16 sps:$4 sm:$0xff]  }
 0x229   :  { %v1043_v12 = vadd.f32 %v1042_v18, %v8819_v39  ;;  %v1044_v45 = vpop.f32.mrb[143].mxu1  ;;  %3695 = vmatpush1.bf16.msra.mxu0 %v7591_v26  ;;  %v1323_v26 = vmul.bf16 1045249613, %v10230_v15 }
 0x22a   :  { %v1045_v44 = vadd.f32 %v1044_v45, %v8823_v59  ;;  %3696 = vmatprep.subr.bf16.mxu0 %v7599_v52 }
 0x22b   :  { %v8897_v63 = vpack.c.bf16 %v1043_v12, %v1039_v19  ;;  %3548 = vmatmul.mubr.bf16.gmra.mrb[72].mxu0 %v8890_v24  ;;  %4054 = vmatmul.mubr.bf16.gmra.mrb[248].mxu1 %v10228_v11  ;;  %v7611_v19 = vld [vmem:[#allocation6 + $0x6c4] ss:$16 sps:$4 sm:$0xff]   ;;  %v8910_v11 = vmax.bf16 %v1323_v26, %v10230_v15  ;;  %v10236_v15 = vld [vmem:[#allocation19_spill] sm:$0xff] }
 0x22c   :  { %v8901_v18 = vpack.c.bf16 %v1045_v44, %v1041_v60  ;;  %3557 = vmatprep.mubr.bf16.mxu0 %v8895_v30  ;;  %4063 = vmatprep.mubr.bf16.mxu1 %v10229_v9  ;;  %v7609_v9 = vld [vmem:[#allocation6 + $0x6c0] ss:$16 sps:$4 sm:$0xff]   ;;  %v1331_v26 = vmul.bf16 1045249613, %v10236_v15 }
 0x22d   :  { %3697 = vmatpush1.bf16.msra.mxu0 %v7597_v0  ;;  %10232 = vst [vmem:[#allocation15_spill] sm:$0xff] %v8910_v11 }
 0x22e   :  { %v1048_v52 = vpop.f32.mrb[144].mxu1  ;;  %3698 = vmatprep.subr.bf16.mxu0 %v7605_v22  ;;  %v7617_v22 = vld [vmem:[#allocation6 + $0x6e4] ss:$16 sps:$4 sm:$0xff]  }
 0x22f   :  { %v1050_v12 = vpop.f32.mrb[145].mxu1  ;;  %v1049_v24 = vadd.f32 %v1048_v52, %v8819_v39  ;;  %v10235_v52 = vld [vmem:[#allocation44_spill] sm:$0xff] }
 0x230   :  { %v1052_v45 = vpop.f32.mrb[146].mxu1  ;;  %v1051_v0 = vadd.f32 %v1050_v12, %v8823_v59 }
 0x231   :  { %v1053_v60 = vadd.f32 %v1052_v45, %v8819_v39  ;;  %v1054_v44 = vpop.f32.mrb[147].mxu1  ;;  %3699 = vmatpush1.bf16.msra.mxu0 %v7603_v1  ;;  %v7615_v1 = vld [vmem:[#allocation6 + $0x6e0] ss:$16 sps:$4 sm:$0xff]  }
 0x232   :  { %v1055_v30 = vadd.f32 %v1054_v44, %v8823_v59  ;;  %3700 = vmatprep.subr.bf16.mxu0 %v7611_v19 }
 0x233   :  { %v8917_v40 = vpack.c.bf16 %v1053_v60, %v1049_v24  ;;  %3558 = vmatmul.mubr.bf16.gmra.mrb[76].mxu0 %v8910_v11  ;;  %4064 = vmatmul.mubr.bf16.gmra.mrb[252].mxu1 %v10235_v52  ;;  %v7623_v24 = vld [vmem:[#allocation6 + $0x704] ss:$16 sps:$4 sm:$0xff]   ;;  %v8930_v52 = vmax.bf16 %v1331_v26, %v10236_v15  ;;  %v10241_v15 = vld [vmem:[#allocation21_spill] sm:$0xff] }
 0x234   :  { %v8921_v45 = vpack.c.bf16 %v1055_v30, %v1051_v0  ;;  %3567 = vmatprep.mubr.bf16.mxu0 %v8915_v56  ;;  %4106 = vmatprep.mubr.bf16.mxu1 %v8628_v29  ;;  %v7576_v29 = vld [vmem:[#allocation6 + $0x408] ss:$16 sps:$4 sm:$0xff]   ;;  %v7621_v56 = vld [vmem:[#allocation6 + $0x700] ss:$16 sps:$4 sm:$0xff]   ;;  %v1339_v26 = vmul.bf16 1045249613, %v10241_v15 }
 0x235   :  { %10234 = vst [vmem:[#allocation40_spill] sm:$0xff] %v8917_v40  ;;  %3701 = vmatpush1.bf16.msra.mxu0 %v7609_v9  ;;  %10238 = vst [vmem:[#allocation42_spill] sm:$0xff] %v8930_v52  ;;  %v7629_v40 = vld [vmem:[#allocation6 + $0x724] ss:$16 sps:$4 sm:$0xff]  }
 0x236   :  { %v1058_v19 = vpop.f32.mrb[148].mxu1  ;;  %3702 = vmatprep.subr.bf16.mxu0 %v7617_v22  ;;  %v8935_v22 = vmax.bf16 %v1340_v42, %v10237_v53  ;;  %v7582_v42 = vld [vmem:[#allocation6 + $0x428] ss:$16 sps:$4 sm:$0xff]  }
 0x237   :  { %v1060_v12 = vpop.f32.mrb[149].mxu1  ;;  %v1059_v44 = vadd.f32 %v1058_v19, %v8819_v39 }
 0x238   :  { %v1062_v60 = vpop.f32.mrb[150].mxu1  ;;  %v1061_v9 = vadd.f32 %v1060_v12, %v8823_v59  ;;  %10239 = vst [vmem:[#allocation17_spill] sm:$0xff] %v8935_v22  ;;  %v10242_v12 = vld [vmem:[#allocation24_spill] sm:$0xff] }
 0x239   :  { %v1063_v30 = vadd.f32 %v1062_v60, %v8819_v39  ;;  %v1064_v0 = vpop.f32.mrb[151].mxu1  ;;  %3703 = vmatpush1.bf16.msra.mxu0 %v7615_v1  ;;  %v1348_v53 = vmul.bf16 1045249613, %v10242_v12 }
 0x23a   :  { %v1065_v11 = vadd.f32 %v1064_v0, %v8823_v59  ;;  %3704 = vmatprep.subr.bf16.mxu0 %v7623_v24  ;;  %v7627_v24 = vld [vmem:[#allocation6 + $0x720] ss:$16 sps:$4 sm:$0xff]  }
 0x23b   :  { %v8937_v19 = vpack.c.bf16 %v1063_v30, %v1059_v44  ;;  %3568 = vmatmul.mubr.bf16.gmra.mrb[80].mxu0 %v8930_v52  ;;  %4107 = vmatmul.mubr.bf16.vlgmr.msra.gmra.mrb[192].mxu1 %v8632_v35  ;;  %v7590_v44 = vld [vmem:[#allocation6 + $0x44c] ss:$16 sps:$4 sm:$0xff]   ;;  %v7632_v30 = vld [vmem:[#allocation6 + $0x744] ss:$16 sps:$4 sm:$0xff]  }
 0x23c   :  { %v8942_v1 = vpack.c.bf16 %v1065_v11, %v1061_v9  ;;  %3577 = vmatprep.mubr.bf16.mxu0 %v8935_v22  ;;  %4116 = vmatprep.mubr.bf16.mxu1 %v8645_v7  ;;  %v8950_v7 = vmax.bf16 %v1339_v26, %v10241_v15  ;;  %v10245_v15 = vld [vmem:[#allocation23_spill] sm:$0xff] }
 0x23d   :  { %10240 = vst [vmem:[#allocation20_spill] sm:$0xff] %v8937_v19  ;;  %4268 = vmatpush1.bf16.msra.mxu1 %v7576_v29  ;;  %3705 = vmatpush1.bf16.msra.mxu0 %v7621_v56  ;;  %v7588_v29 = vld [vmem:[#allocation6 + $0x448] ss:$16 sps:$4 sm:$0xff]   ;;  %v7630_v56 = vld [vmem:[#allocation6 + $0x740] ss:$16 sps:$4 sm:$0xff]  }
 0x23e   :  { %v1068_v60 = vpop.f32.mrb[152].mxu1  ;;  %4269 = vmatprep.subr.bf16.mxu1 %v7584_v49  ;;  %3706 = vmatprep.subr.bf16.mxu0 %v7629_v40  ;;  %10243 = vst [vmem:[#allocation44_spill] sm:$0xff] %v8950_v7  ;;  %v8955_v40 = vmax.bf16 %v1348_v53, %v10242_v12  ;;  %v7596_v19 = vld [vmem:[#allocation6 + $0x46c] ss:$16 sps:$4 sm:$0xff]   ;;  %v1347_v26 = vmul.bf16 1045249613, %v10245_v15 }
 0x23f   :  { %v1070_v35 = vpop.f32.mrb[153].mxu1  ;;  %v1069_v11 = vadd.f32 %v1068_v60, %v8819_v39  ;;  %v7638_v60 = vld [vmem:[#allocation6 + $0x764] ss:$16 sps:$4 sm:$0xff]   ;;  %v7594_v53 = vld [vmem:[#allocation6 + $0x468] ss:$16 sps:$4 sm:$0xff]  }
 0x240   :  { %v1072_v0 = vpop.f32.mrb[154].mxu1  ;;  %v1071_v52 = vadd.f32 %v1070_v35, %v8823_v59  ;;  %10244 = vst [vmem:[#allocation19_spill] sm:$0xff] %v8955_v40  ;;  %v7641_v35 = vld [vmem:[#allocation6 + $0x784] ss:$16 sps:$4 sm:$0xff]  }
 0x241   :  { %v1073_v9 = vadd.f32 %v1072_v0, %v8819_v39  ;;  %v1074_v22 = vpop.f32.mrb[155].mxu1  ;;  %4270 = vmatpush1.bf16.msra.mxu1 %v7582_v42  ;;  %3707 = vmatpush1.bf16.msra.mxu0 %v7627_v24  ;;  %v7636_v24 = vld [vmem:[#allocation6 + $0x760] ss:$16 sps:$4 sm:$0xff]  }
 0x242   :  { %v1075_v49 = vadd.f32 %v1074_v22, %v8823_v59  ;;  %4271 = vmatprep.subr.bf16.mxu1 %v7590_v44  ;;  %3708 = vmatprep.subr.bf16.mxu0 %v7632_v30  ;;  %v10246_v22 = vld [vmem:[#allocation26_spill] sm:$0xff]  ;;  %v7602_v30 = vld [vmem:[#allocation6 + $0x48c] ss:$16 sps:$4 sm:$0xff]  }
 0x243   :  { %v8957_v0 = vpack.c.bf16 %v1073_v9, %v1069_v11  ;;  %3578 = vmatmul.mubr.bf16.gmra.mrb[84].mxu0 %v8950_v7  ;;  %4117 = vmatmul.mubr.bf16.gmra.mrb[196].mxu1 %v8649_v58  ;;  %v1356_v12 = vmul.bf16 1045249613, %v10246_v22  ;;  %v7608_v7 = vld [vmem:[#allocation6 + $0x4ac] ss:$16 sps:$4 sm:$0xff]  }
 0x244   :  { %v8962_v42 = vpack.c.bf16 %v1075_v49, %v1071_v52  ;;  %3587 = vmatprep.mubr.bf16.mxu0 %v8955_v40  ;;  %4126 = vmatprep.mubr.bf16.mxu1 %v8658_v16  ;;  %v8970_v16 = vmax.bf16 %v1347_v26, %v10245_v15  ;;  %v10249_v15 = vld [vmem:[#allocation25_spill] sm:$0xff] }
 0x245   :  { %4272 = vmatpush1.bf16.msra.mxu1 %v7588_v29  ;;  %3709 = vmatpush1.bf16.msra.mxu0 %v7630_v56  ;;  %v7600_v29 = vld [vmem:[#allocation6 + $0x488] ss:$16 sps:$4 sm:$0xff]   ;;  %v7639_v56 = vld [vmem:[#allocation6 + $0x780] ss:$16 sps:$4 sm:$0xff]   ;;  %v1355_v26 = vmul.bf16 1045249613, %v10249_v15 }
 0x246   :  { %v1078_v44 = vpop.f32.mrb[156].mxu1  ;;  %4273 = vmatprep.subr.bf16.mxu1 %v7596_v19  ;;  %3710 = vmatprep.subr.bf16.mxu0 %v7638_v60  ;;  %10247 = vst [vmem:[#allocation22_spill] sm:$0xff] %v8970_v16  ;;  %v8975_v60 = vmax.bf16 %v1356_v12, %v10246_v22  ;;  %v10250_v22 = vld [vmem:[#allocation28_spill] sm:$0xff] }
 0x247   :  { %v1080_v58 = vpop.f32.mrb[157].mxu1  ;;  %v1079_v52 = vadd.f32 %v1078_v44, %v8819_v39  ;;  %v7647_v44 = vld [vmem:[#allocation6 + $0x7a4] ss:$16 sps:$4 sm:$0xff]   ;;  %v1364_v12 = vmul.bf16 1045249613, %v10250_v22 }
 0x248   :  { %v1082_v11 = vpop.f32.mrb[158].mxu1  ;;  %v1081_v40 = vadd.f32 %v1080_v58, %v8823_v59  ;;  %10248 = vst [vmem:[#allocation21_spill] sm:$0xff] %v8975_v60  ;;  %v7614_v58 = vld [vmem:[#allocation6 + $0x4cc] ss:$16 sps:$4 sm:$0xff]  }
 0x249   :  { %v1083_v9 = vadd.f32 %v1082_v11, %v8819_v39  ;;  %v1084_v49 = vpop.f32.mrb[159].mxu1  ;;  %4274 = vmatpush1.bf16.msra.mxu1 %v7594_v53  ;;  %3711 = vmatpush1.bf16.msra.mxu0 %v7636_v24  ;;  %v7606_v24 = vld [vmem:[#allocation6 + $0x4a8] ss:$16 sps:$4 sm:$0xff]  }
 0x24a   :  { %v1085_v19 = vadd.f32 %v1084_v49, %v8823_v59  ;;  %4275 = vmatprep.subr.bf16.mxu1 %v7602_v30  ;;  %3712 = vmatprep.subr.bf16.mxu0 %v7641_v35  ;;  %v7645_v30 = vld [vmem:[#allocation6 + $0x7a0] ss:$16 sps:$4 sm:$0xff]  }
 0x24b   :  { %v8977_v11 = vpack.c.bf16 %v1083_v9, %v1079_v52  ;;  %3588 = vmatmul.mubr.bf16.gmra.mrb[88].mxu0 %v8970_v16  ;;  %4127 = vmatmul.mubr.bf16.gmra.mrb[200].mxu1 %v8662_v48  ;;  %v7650_v52 = vld [vmem:[#allocation6 + $0x7c4] ss:$16 sps:$4 sm:$0xff]   ;;  %v7620_v16 = vld [vmem:[#allocation6 + $0x4ec] ss:$16 sps:$4 sm:$0xff]  }
 0x24c   :  { %v8982_v53 = vpack.c.bf16 %v1085_v19, %v1081_v40  ;;  %3597 = vmatprep.mubr.bf16.mxu0 %v8975_v60  ;;  %4136 = vmatprep.mubr.bf16.mxu1 %v8671_v33  ;;  %v8990_v33 = vmax.bf16 %v1355_v26, %v10249_v15  ;;  %v10252_v26 = vld [vmem:[#allocation27_spill] sm:$0xff] }
 0x24d   :  { %4276 = vmatpush1.bf16.msra.mxu1 %v7600_v29  ;;  %3713 = vmatpush1.bf16.msra.mxu0 %v7639_v56  ;;  %v7612_v29 = vld [vmem:[#allocation6 + $0x4c8] ss:$16 sps:$4 sm:$0xff]   ;;  %v7648_v56 = vld [vmem:[#allocation6 + $0x7c0] ss:$16 sps:$4 sm:$0xff]  }
 0x24e   :  { %v1088_v35 = vpop.f32.mrb[160].mxu1  ;;  %4277 = vmatprep.subr.bf16.mxu1 %v7608_v7  ;;  %3714 = vmatprep.subr.bf16.mxu0 %v7647_v44  ;;  %v8995_v44 = vmax.bf16 %v1364_v12, %v10250_v22  ;;  %v7618_v22 = vld [vmem:[#allocation6 + $0x4e8] ss:$16 sps:$4 sm:$0xff]   ;;  %v7654_v12 = vld [vmem:[#allocation6 + $0x7e0] ss:$16 sps:$4 sm:$0xff]  }
 0x24f   :  { %v1090_v48 = vpop.f32.mrb[161].mxu1  ;;  %v1089_v40 = vadd.f32 %v1088_v35, %v8819_v39  ;;  %v7656_v35 = vld [vmem:[#allocation6 + $0x7e4] ss:$16 sps:$4 sm:$0xff]  }
 0x250   :  { %v1092_v9 = vpop.f32.mrb[162].mxu1  ;;  %v1091_v60 = vadd.f32 %v1090_v48, %v8823_v59  ;;  %10251 = vst [vmem:[#allocation24_spill] sm:$0xff] %v8995_v44  ;;  %v7626_v48 = vld [vmem:[#allocation6 + $0x50c] ss:$16 sps:$4 sm:$0xff]  }
 0x251   :  { %v1093_v49 = vadd.f32 %v1092_v9, %v8819_v39  ;;  %v1094_v19 = vpop.f32.mrb[163].mxu1  ;;  %4278 = vmatpush1.bf16.msra.mxu1 %v7606_v24  ;;  %3715 = vmatpush1.bf16.msra.mxu0 %v7645_v30  ;;  %v1363_v24 = vmul.bf16 1045249613, %v10252_v26  ;;  %v10253_v30 = vld [vmem:[#allocation30_spill] sm:$0xff] }
 0x252   :  { %v1095_v7 = vadd.f32 %v1094_v19, %v8823_v59  ;;  %4279 = vmatprep.subr.bf16.mxu1 %v7614_v58  ;;  %3716 = vmatprep.subr.bf16.mxu0 %v7650_v52  ;;  %v1372_v58 = vmul.bf16 1045249613, %v10253_v30 }
 0x253   :  { %v8997_v9 = vpack.c.bf16 %v1093_v49, %v1089_v40  ;;  %3598 = vmatmul.mubr.bf16.gmra.mrb[92].mxu0 %v8990_v33  ;;  %4137 = vmatmul.mubr.bf16.gmra.mrb[204].mxu1 %v8675_v3 }
 0x254   :  { %v9001_v15 = vpack.c.bf16 %v1095_v7, %v1091_v60  ;;  %3607 = vmatprep.mubr.bf16.mxu0 %v8995_v44  ;;  %4146 = vmatprep.mubr.bf16.mxu1 %v8684_v32  ;;  %v9010_v32 = vmax.bf16 %v1363_v24, %v10252_v26  ;;  %v10255_v24 = vld [vmem:[#allocation29_spill] sm:$0xff] }
 0x255   :  { %4280 = vmatpush1.bf16.msra.mxu1 %v7612_v29  ;;  %3717 = vmatpush1.bf16.msra.mxu0 %v7648_v56  ;;  %v7624_v29 = vld [vmem:[#allocation6 + $0x508] ss:$16 sps:$4 sm:$0xff]  }
 0x256   :  { %v1098_v52 = vpop.f32.mrb[164].mxu1  ;;  %4281 = vmatprep.subr.bf16.mxu1 %v7620_v16  ;;  %3718 = vmatprep.subr.bf16.mxu0 %v7656_v35  ;;  %v9015_v16 = vmax.bf16 %v1372_v58, %v10253_v30  ;;  %v7635_v35 = vld [vmem:[#allocation6 + $0x52c] ss:$16 sps:$4 sm:$0xff]   ;;  %v10256_v30 = vld [vmem:[#allocation32_spill] sm:$0xff] }
 0x257   :  { %v1100_v40 = vpop.f32.mrb[165].mxu1  ;;  %v1099_v60 = vadd.f32 %v1098_v52, %v8819_v39  ;;  %v1380_v58 = vmul.bf16 1045249613, %v10256_v30 }
 0x258   :  { %v1102_v3 = vpop.f32.mrb[166].mxu1  ;;  %v1101_v56 = vadd.f32 %v1100_v40, %v8823_v59  ;;  %10254 = vst [vmem:[#allocation23_spill] sm:$0xff] %v9015_v16 }
 0x259   :  { %v1103_v49 = vadd.f32 %v1102_v3, %v8819_v39  ;;  %v1104_v19 = vpop.f32.mrb[167].mxu1  ;;  %4282 = vmatpush1.bf16.msra.mxu1 %v7618_v22  ;;  %3719 = vmatpush1.bf16.msra.mxu0 %v7654_v12  ;;  %v1371_v22 = vmul.bf16 1045249613, %v10255_v24  ;;  %v7633_v12 = vld [vmem:[#allocation6 + $0x528] ss:$16 sps:$4 sm:$0xff]  }
 0x25a   :  { %v1105_v7 = vadd.f32 %v1104_v19, %v8823_v59  ;;  %4283 = vmatprep.subr.bf16.mxu1 %v7626_v48  ;;  %v7644_v48 = vld [vmem:[#allocation6 + $0x54c] ss:$16 sps:$4 sm:$0xff]  }
 0x25b   :  { %v9017_v44 = vpack.c.bf16 %v1103_v49, %v1099_v60  ;;  %3608 = vmatmul.mubr.bf16.gmra.mrb[96].mxu0 %v9010_v32  ;;  %4147 = vmatmul.mubr.bf16.gmra.mrb[208].mxu1 %v8688_v55  ;;  %v9030_v19 = vmax.bf16 %v1371_v22, %v10255_v24  ;;  %v10259_v24 = vld [vmem:[#allocation31_spill] sm:$0xff] }
 0x25c   :  { %v9021_v26 = vpack.c.bf16 %v1105_v7, %v1101_v56  ;;  %3617 = vmatprep.mubr.bf16.mxu0 %v9015_v16  ;;  %4156 = vmatprep.mubr.bf16.mxu1 %v8696_v10  ;;  %v7642_v10 = vld [vmem:[#allocation6 + $0x548] ss:$16 sps:$4 sm:$0xff]   ;;  %v9035_v7 = vmax.bf16 %v1380_v58, %v10256_v30  ;;  %v1379_v22 = vmul.bf16 1045249613, %v10259_v24 }
 0x25d   :  { %4284 = vmatpush1.bf16.msra.mxu1 %v7624_v29  ;;  %10257 = vst [vmem:[#allocation26_spill] sm:$0xff] %v9030_v19  ;;  %v10260_v30 = vld [vmem:[#allocation34_spill] sm:$0xff] }
 0x25e   :  { %v1108_v52 = vpop.f32.mrb[168].mxu1  ;;  %4285 = vmatprep.subr.bf16.mxu1 %v7635_v35  ;;  %10258 = vst [vmem:[#allocation25_spill] sm:$0xff] %v9035_v7  ;;  %v7653_v35 = vld [vmem:[#allocation6 + $0x56c] ss:$16 sps:$4 sm:$0xff]   ;;  %v1388_v58 = vmul.bf16 1045249613, %v10260_v30 }
 0x25f   :  { %v1110_v40 = vpop.f32.mrb[169].mxu1  ;;  %v1109_v60 = vadd.f32 %v1108_v52, %v8819_v39 }
 0x260   :  { %v1112_v3 = vpop.f32.mrb[170].mxu1  ;;  %v1111_v29 = vadd.f32 %v1110_v40, %v8823_v59  ;;  %v7659_v40 = vld [vmem:[#allocation6 + $0x58c] ss:$16 sps:$4 sm:$0xff]  }
 0x261   :  { %v1113_v55 = vadd.f32 %v1112_v3, %v8819_v39  ;;  %v1114_v49 = vpop.f32.mrb[171].mxu1  ;;  %4286 = vmatpush1.bf16.msra.mxu1 %v7633_v12  ;;  %v7651_v12 = vld [vmem:[#allocation6 + $0x568] ss:$16 sps:$4 sm:$0xff]  }
 0x262   :  { %v1115_v56 = vadd.f32 %v1114_v49, %v8823_v59  ;;  %4287 = vmatprep.subr.bf16.mxu1 %v7644_v48 }
 0x263   :  { %v9037_v16 = vpack.c.bf16 %v1113_v55, %v1109_v60  ;;  %3618 = vmatmul.mubr.bf16.gmra.mrb[100].mxu0 %v9030_v19  ;;  %4157 = vmatmul.mubr.bf16.gmra.mrb[212].mxu1 %v8700_v57 }
 0x264   :  { %v9041_v52 = vpack.c.bf16 %v1115_v56, %v1111_v29  ;;  %3627 = vmatprep.mubr.bf16.mxu0 %v9035_v7  ;;  %4166 = vmatprep.mubr.bf16.mxu1 %v8708_v43  ;;  %v9050_v29 = vmax.bf16 %v1379_v22, %v10259_v24  ;;  %v7657_v43 = vld [vmem:[#allocation6 + $0x588] ss:$16 sps:$4 sm:$0xff]   ;;  %v9055_v7 = vmax.bf16 %v1388_v58, %v10260_v30 }
 0x265   :  { %4288 = vmatpush1.bf16.msra.mxu1 %v7642_v10  ;;  %v10263_v24 = vld [vmem:[#allocation33_spill] sm:$0xff] }
 0x266   :  { %v1118_v48 = vpop.f32.mrb[172].mxu1  ;;  %4289 = vmatprep.subr.bf16.mxu1 %v7653_v35  ;;  %10261 = vst [vmem:[#allocation28_spill] sm:$0xff] %v9050_v29  ;;  %10262 = vst [vmem:[#allocation27_spill] sm:$0xff] %v9055_v7  ;;  %v7662_v35 = vld [vmem:[#allocation6 + $0x5ac] ss:$16 sps:$4 sm:$0xff]  }
 0x267   :  { %v1120_v3 = vpop.f32.mrb[173].mxu1  ;;  %v1119_v55 = vadd.f32 %v1118_v48, %v8819_v39  ;;  %v1387_v22 = vmul.bf16 1045249613, %v10263_v24  ;;  %v10264_v30 = vld [vmem:[#allocation37_spill] sm:$0xff] }
 0x268   :  { %v1122_v60 = vpop.f32.mrb[174].mxu1  ;;  %v1121_v10 = vadd.f32 %v1120_v3, %v8823_v59  ;;  %v1396_v58 = vmul.bf16 1045249613, %v10264_v30  ;;  %v7665_v3 = vld [vmem:[#allocation6 + $0x5cc] ss:$16 sps:$4 sm:$0xff]  }
 0x269   :  { %v1123_v57 = vadd.f32 %v1122_v60, %v8819_v39  ;;  %v1124_v49 = vpop.f32.mrb[175].mxu1  ;;  %4290 = vmatpush1.bf16.msra.mxu1 %v7651_v12  ;;  %v7660_v12 = vld [vmem:[#allocation6 + $0x5a8] ss:$16 sps:$4 sm:$0xff]  }
 0x26a   :  { %v1125_v56 = vadd.f32 %v1124_v49, %v8823_v59  ;;  %4291 = vmatprep.subr.bf16.mxu1 %v7659_v40 }
 0x26b   :  { %v9057_v19 = vpack.c.bf16 %v1123_v57, %v1119_v55  ;;  %3628 = vmatmul.mubr.bf16.gmra.mrb[104].mxu0 %v9050_v29  ;;  %4167 = vmatmul.mubr.bf16.gmra.mrb[216].mxu1 %v8712_v50 }
 0x26c   :  { %v9061_v48 = vpack.c.bf16 %v1125_v56, %v1121_v10  ;;  %3637 = vmatprep.mubr.bf16.mxu0 %v9055_v7  ;;  %4176 = vmatprep.mubr.bf16.mxu1 %v8720_v28  ;;  %v9070_v10 = vmax.bf16 %v1387_v22, %v10263_v24  ;;  %v7663_v28 = vld [vmem:[#allocation6 + $0x5c8] ss:$16 sps:$4 sm:$0xff]   ;;  %v9075_v7 = vmax.bf16 %v1396_v58, %v10264_v30 }
 0x26d   :  { %4292 = vmatpush1.bf16.msra.mxu1 %v7657_v43  ;;  %v10265_v24 = vld [vmem:[#allocation35_spill] sm:$0xff]  ;;  %v10266_v30 = vld [vmem:[#allocation41_spill] sm:$0xff] }
 0x26e   :  { %v1128_v40 = vpop.f32.mrb[176].mxu1  ;;  %4293 = vmatprep.subr.bf16.mxu1 %v7662_v35  ;;  %v7668_v35 = vld [vmem:[#allocation6 + $0x5ec] ss:$16 sps:$4 sm:$0xff]   ;;  %v1395_v22 = vmul.bf16 1045249613, %v10265_v24 }
 0x26f   :  { %v1130_v60 = vpop.f32.mrb[177].mxu1  ;;  %v1129_v57 = vadd.f32 %v1128_v40, %v8819_v39  ;;  %v1404_v58 = vmul.bf16 1045249613, %v10266_v30 }
 0x270   :  { %v1132_v55 = vpop.f32.mrb[178].mxu1  ;;  %v1131_v43 = vadd.f32 %v1130_v60, %v8823_v59  ;;  %v7671_v60 = vld [vmem:[#allocation6 + $0x60c] ss:$16 sps:$4 sm:$0xff]  }
 0x271   :  { %v1133_v50 = vadd.f32 %v1132_v55, %v8819_v39  ;;  %v1134_v49 = vpop.f32.mrb[179].mxu1  ;;  %4294 = vmatpush1.bf16.msra.mxu1 %v7660_v12  ;;  %v7666_v12 = vld [vmem:[#allocation6 + $0x5e8] ss:$16 sps:$4 sm:$0xff]  }
 0x272   :  { %v1135_v56 = vadd.f32 %v1134_v49, %v8823_v59  ;;  %4295 = vmatprep.subr.bf16.mxu1 %v7665_v3 }
 0x273   :  { %v9077_v29 = vpack.c.bf16 %v1133_v50, %v1129_v57  ;;  %3638 = vmatmul.mubr.bf16.gmra.mrb[108].mxu0 %v9070_v10  ;;  %4177 = vmatmul.mubr.bf16.gmra.mrb[220].mxu1 %v8724_v37 }
 0x274   :  { %v9081_v40 = vpack.c.bf16 %v1135_v56, %v1131_v43  ;;  %3647 = vmatprep.mubr.bf16.mxu0 %v9075_v7  ;;  %4186 = vmatprep.mubr.bf16.mxu1 %v8732_v21  ;;  %v9090_v43 = vmax.bf16 %v1395_v22, %v10265_v24  ;;  %v9095_v56 = vmax.bf16 %v1404_v58, %v10266_v30  ;;  %v10267_v24 = vld [vmem:[#allocation39_spill] sm:$0xff] }
 0x275   :  { %4296 = vmatpush1.bf16.msra.mxu1 %v7663_v28  ;;  %v1403_v22 = vmul.bf16 1045249613, %v10267_v24 }
 0x276   :  { %v1138_v3 = vpop.f32.mrb[180].mxu1  ;;  %4297 = vmatprep.subr.bf16.mxu1 %v7668_v35 }
 0x277   :  { %v1140_v55 = vpop.f32.mrb[181].mxu1  ;;  %v1139_v50 = vadd.f32 %v1138_v3, %v8819_v39 }
 0x278   :  { %v1142_v57 = vpop.f32.mrb[182].mxu1  ;;  %v1141_v21 = vadd.f32 %v1140_v55, %v8823_v59 }
 0x279   :  { %v1143_v37 = vadd.f32 %v1142_v57, %v8819_v39  ;;  %v1144_v49 = vpop.f32.mrb[183].mxu1  ;;  %4298 = vmatpush1.bf16.msra.mxu1 %v7666_v12  ;;  %v10268_v12 = vld [vmem:[#allocation45_spill] sm:$0xff] }
 0x27a   :  { %v1145_v28 = vadd.f32 %v1144_v49, %v8823_v59  ;;  %4460 = vmatprep.subr.bf16.mxu1 %v7671_v60  ;;  %v1412_v55 = vmul.bf16 1045249613, %v10268_v12 }
 0x27b   :  { %v9097_v35 = vpack.c.bf16 %v1143_v37, %v1139_v50  ;;  %3648 = vmatmul.mubr.bf16.gmra.mrb[112].mxu0 %v9090_v43  ;;  %4187 = vmatmul.mubr.bf16.gmra.mrb[224].mxu1 %v8736_v46  ;;  %v9110_v46 = vmax.bf16 %v1403_v22, %v10267_v24  ;;  %v10270_v24 = vld [vmem:[#allocation43_spill] sm:$0xff] }
 0x27c   :  { %v9101_v3 = vpack.c.bf16 %v1145_v28, %v1141_v21  ;;  %3657 = vmatprep.mubr.bf16.mxu0 %v9095_v56  ;;  %4196 = vmatprep.mubr.bf16.mxu1 %v8744_v25  ;;  %v9115_v25 = vmax.bf16 %v1412_v55, %v10268_v12  ;;  %v1411_v22 = vmul.bf16 1045249613, %v10270_v24 }
 0x27e   :  { %v1148_v57 = vpop.f32.mrb[184].mxu1  ;;  %10269 = vst [vmem:[#allocation30_spill] sm:$0xff] %v9115_v25 }
 0x27f   :  { %v1150_v30 = vpop.f32.mrb[185].mxu1  ;;  %v1149_v60 = vadd.f32 %v1148_v57, %v8819_v39 }
 0x280   :  { %v1152_v58 = vpop.f32.mrb[186].mxu1  ;;  %v1151_v49 = vadd.f32 %v1150_v30, %v8823_v59  ;;  %v1420_v30 = vmul.bf16 1045249613, %v8636_v36 }
 0x281   :  { %v1153_v50 = vadd.f32 %v1152_v58, %v8819_v39  ;;  %v1154_v37 = vpop.f32.mrb[187].mxu1 }
 0x282   :  { %v1155_v21 = vadd.f32 %v1154_v37, %v8823_v59 }
 0x283   :  { %v9117_v28 = vpack.c.bf16 %v1153_v50, %v1149_v60  ;;  %3658 = vmatmul.mubr.bf16.gmra.mrb[116].mxu0 %v9110_v46  ;;  %4197 = vmatmul.mubr.bf16.gmra.mrb[228].mxu1 %v8748_v20  ;;  %v9130_v20 = vmax.bf16 %v1411_v22, %v10270_v24  ;;  %v1302_v22 = vmul.bf16 1045249613, %v8841_v14 }
 0x284   :  { %v9121_v57 = vpack.c.bf16 %v1155_v21, %v1151_v49  ;;  %3667 = vmatprep.mubr.bf16.mxu0 %v9115_v25  ;;  %4206 = vmatprep.mubr.bf16.mxu1 %v8756_v2  ;;  %v9135_v2 = vmax.bf16 %v1420_v30, %v8636_v36 }
 0x285   :  { %v9151_v36 = vmax.bf16 %v1302_v22, %v8841_v14  ;;  %v1318_v14 = vmul.bf16 1045249613, %v8881_v13  ;;  %v7674_v22 = vld [vmem:[#allocation6 + $0x62c] ss:$16 sps:$4 sm:$0xff]  }
 0x286   :  { %v1158_v58 = vpop.f32.mrb[188].mxu1 }
 0x287   :  { %v1160_v37 = vpop.f32.mrb[189].mxu1  ;;  %v1159_v55 = vadd.f32 %v1158_v58, %v8819_v39 }
 0x288   :  { %v1162_v12 = vpop.f32.mrb[190].mxu1  ;;  %v1161_v49 = vadd.f32 %v1160_v37, %v8823_v59 }
 0x289   :  { %v1163_v60 = vadd.f32 %v1162_v12, %v8819_v39  ;;  %v1164_v50 = vpop.f32.mrb[191].mxu1  ;;  %v10271_v39 = vld [vmem:[#allocation46_spill] sm:$0xff]  ;;  %v1317_v12 = vmul.bf16 1045249613, %v8877_v23 }
 0x28a   :  { %v1165_v21 = vadd.f32 %v1164_v50, %v8823_v59  ;;  %v1419_v24 = vmul.bf16 1045249613, %v10271_v39 }
 0x28b   :  { %v9137_v25 = vpack.c.bf16 %v1163_v60, %v1159_v55  ;;  %3668 = vmatmul.mubr.bf16.gmra.mrb[120].mxu0 %v9130_v20  ;;  %4207 = vmatmul.mubr.bf16.gmra.mrb[232].mxu1 %v8760_v41  ;;  %v1301_v41 = vmul.bf16 1045249613, %v8837_v8  ;;  %v1325_v60 = vmul.bf16 1045249613, %v8897_v63 }
 0x28c   :  { %v9141_v58 = vpack.c.bf16 %v1165_v21, %v1161_v49  ;;  %3677 = vmatprep.mubr.bf16.mxu0 %v9135_v2  ;;  %4216 = vmatprep.mubr.bf16.mxu1 %v8768_v17  ;;  %v9148_v59 = vmax.bf16 %v1419_v24, %v10271_v39  ;;  %v1310_v17 = vmul.bf16 1045249613, %v8861_v47  ;;  %v10272_v49 = vld [vmem:[#allocation40_spill] sm:$0xff] }
 0x28d   :  { %v9160_v30 = vmax.bf16 %v1301_v41, %v8837_v8  ;;  %v1309_v8 = vmul.bf16 1045249613, %v8857_v6  ;;  %v1333_v21 = vmul.bf16 1045249613, %v10272_v49  ;;  %v7669_v39 = vld [vmem:[#allocation6 + $0x608] ss:$16 sps:$4 sm:$0xff]  }
 0x28e   :  { %v9163_v37 = vmax.bf16 %v1310_v17, %v8861_v47  ;;  %v9181_v47 = vmax.bf16 %v1318_v14, %v8881_v13  ;;  %v1326_v13 = vmul.bf16 1045249613, %v8901_v18  ;;  %v7729_v41 = vld [vmem:[%s10110_s5 + $0x40] ss:$8 sps:$4 sm:$0xff]   ;;  %v7731_v17 = vld [vmem:[%s10110_s5 + $0x44] ss:$8 sps:$4 sm:$0xff]  }
 0x28f   :  { %v1350_v14 = vmul.bf16 1045249613, %v8962_v42 }
 0x290   :  { %v9199_v55 = vmax.bf16 %v1326_v13, %v8901_v18  ;;  %v1334_v18 = vmul.bf16 1045249613, %v8921_v45 }
 0x291   :  { %v9253_v13 = vmax.bf16 %v1350_v14, %v8962_v42  ;;  %v1349_v42 = vmul.bf16 1045249613, %v8957_v0 }
 0x292   :  { %v9217_v50 = vmax.bf16 %v1334_v18, %v8921_v45  ;;  %v1342_v45 = vmul.bf16 1045249613, %v8942_v1  ;;  %v7734_v18 = vld [vmem:[%s10110_s5 + $0x54] ss:$8 sps:$4 sm:$0xff]  }
 0x293   :  { %3678 = vmatmul.mubr.bf16.gmra.mrb[124].mxu0 %v9148_v59  ;;  %4217 = vmatmul.mubr.bf16.gmra.mrb[236].mxu1 %v8772_v51  ;;  %v7708_v51 = vld [vmem:[%s10110_s5] ss:$8 sps:$4 sm:$0xff]  }
 0x294   :  { %3720 = vmatprep.mubr.bf16.mxu0 %v9151_v36  ;;  %4226 = vmatprep.mubr.bf16.mxu1 %v8780_v5  ;;  %v7710_v5 = vld [vmem:[%s10110_s5 + $0x4] ss:$8 sps:$4 sm:$0xff]   ;;  %v9235_v24 = vmax.bf16 %v1342_v45, %v8942_v1  ;;  %v9268_v45 = vmax.bf16 %v1349_v42, %v8957_v0  ;;  %v1374_v42 = vmul.bf16 1045249613, %v9021_v26 }
 0x295   :  { %5241 = vmatprep.subr.bf16.mxu0 %v7710_v5  ;;  %v10275_v5 = vld [vmem:[#allocation20_spill] sm:$0xff] }
 0x296   :  { %v1341_v1 = vmul.bf16 1045249613, %v10275_v5  ;;  %v7737_v0 = vld [vmem:[%s10110_s5 + $0x64] ss:$8 sps:$4 sm:$0xff]  }
 0x29b   :  { %3721 = vmatmul.mubr.bf16.vlgmr.msra.gmra.mrb[64].mxu0 %v9160_v30  ;;  %4227 = vmatmul.mubr.bf16.gmra.mrb[240].mxu1 %v8784_v34  ;;  %v9178_v34 = vmax.bf16 %v1309_v8, %v8857_v6  ;;  %v7716_v6 = vld [vmem:[%s10110_s5 + $0x14] ss:$8 sps:$4 sm:$0xff]   ;;  %v7672_v8 = vld [vmem:[#allocation6 + $0x628] ss:$16 sps:$4 sm:$0xff]  }
 0x29c   :  { %3730 = vmatprep.mubr.bf16.mxu0 %v9163_v37  ;;  %4236 = vmatprep.mubr.bf16.mxu1 %v8792_v54  ;;  %v7714_v54 = vld [vmem:[%s10110_s5 + $0x10] ss:$8 sps:$4 sm:$0xff]  }
 0x29d   :  { %5242 = vmatpush1.bf16.msra.mxu0 %v7708_v51  ;;  %v10274_v51 = vld [vmem:[#allocation48_spill] sm:$0xff] }
 0x29e   :  { %5243 = vmatprep.subr.bf16.mxu0 %v7716_v6  ;;  %v9250_v6 = vmax.bf16 %v1341_v1, %v10275_v5  ;;  %v7684_v5 = vld [vmem:[#allocation6 + $0x6a8] ss:$16 sps:$4 sm:$0xff]   ;;  %v1366_v1 = vmul.bf16 1045249613, %v9001_v15 }
 0x2a1   :  { %5244 = vmatpush1.bf16.msra.mxu0 %v7714_v54  ;;  %v7677_v54 = vld [vmem:[#allocation6 + $0x64c] ss:$16 sps:$4 sm:$0xff]  }
 0x2a3   :  { %3731 = vmatmul.mubr.bf16.gmra.mrb[68].mxu0 %v9178_v34  ;;  %4237 = vmatmul.mubr.bf16.gmra.mrb[244].mxu1 %v8796_v62  ;;  %v9196_v62 = vmax.bf16 %v1317_v12, %v8877_v23  ;;  %v7722_v23 = vld [vmem:[%s10110_s5 + $0x24] ss:$8 sps:$4 sm:$0xff]   ;;  %v7675_v12 = vld [vmem:[#allocation6 + $0x648] ss:$16 sps:$4 sm:$0xff]  }
 0x2a4   :  { %3740 = vmatprep.mubr.bf16.mxu0 %v9181_v47  ;;  %4246 = vmatprep.mubr.bf16.mxu1 %v8804_v61  ;;  %v7720_v61 = vld [vmem:[%s10110_s5 + $0x20] ss:$8 sps:$4 sm:$0xff]  }
 0x2a5   :  { %5245 = vmatprep.subr.bf16.mxu0 %v7722_v23  ;;  %v10276_v23 = vld [vmem:[#allocation16_spill] sm:$0xff] }
 0x2a6   :  { %5246 = vmatpush1.bf16.msra.mxu0 %v7720_v61  ;;  %v7680_v61 = vld [vmem:[#allocation6 + $0x66c] ss:$16 sps:$4 sm:$0xff]  }
 0x2ab   :  { %3741 = vmatmul.mubr.bf16.gmra.mrb[72].mxu0 %v9196_v62  ;;  %4247 = vmatmul.mubr.bf16.gmra.mrb[248].mxu1 %v8808_v4  ;;  %v9214_v4 = vmax.bf16 %v1325_v60, %v8897_v63  ;;  %v7728_v63 = vld [vmem:[%s10110_s5 + $0x34] ss:$8 sps:$4 sm:$0xff]   ;;  %v7732_v60 = vld [vmem:[%s10110_s5 + $0x50] ss:$8 sps:$4 sm:$0xff]  }
 0x2ac   :  { %3750 = vmatprep.mubr.bf16.mxu0 %v9199_v55  ;;  %4256 = vmatprep.mubr.bf16.mxu1 %v8825_v27  ;;  %v7726_v27 = vld [vmem:[%s10110_s5 + $0x30] ss:$8 sps:$4 sm:$0xff]  }
 0x2ad   :  { %5247 = vmatprep.subr.bf16.mxu0 %v7728_v63  ;;  %v7678_v63 = vld [vmem:[#allocation6 + $0x668] ss:$16 sps:$4 sm:$0xff]  }
 0x2ae   :  { %5248 = vmatpush1.bf16.msra.mxu0 %v7726_v27  ;;  %v10277_v27 = vld [vmem:[#allocation49_spill] sm:$0xff] }
 0x2af   :  { %5249 = vmatprep.subr.bf16.mxu0 %v7731_v17  ;;  %v7735_v17 = vld [vmem:[%s10110_s5 + $0x60] ss:$8 sps:$4 sm:$0xff]  }
 0x2b2   :  { %5250 = vmatpush1.bf16.msra.mxu0 %v7729_v41  ;;  %v10278_v41 = vld [vmem:[#allocation36_spill] sm:$0xff] }
 0x2b3   :  { %3751 = vmatmul.mubr.bf16.gmra.mrb[76].mxu0 %v9214_v4  ;;  %4257 = vmatmul.mubr.bf16.gmra.mrb[252].mxu1 %v8829_v31  ;;  %v9232_v31 = vmax.bf16 %v1333_v21, %v10272_v49  ;;  %v1358_v49 = vmul.bf16 1045249613, %v8982_v53  ;;  %v7683_v21 = vld [vmem:[#allocation6 + $0x68c] ss:$16 sps:$4 sm:$0xff]  }
 0x2b4   :  { %3760 = vmatprep.mubr.bf16.mxu0 %v9217_v50  ;;  %4299 = vmatprep.mubr.bf16.mxu1 %v8835_v38  ;;  %v10273_v38 = vld [vmem:[#allocation47_spill] sm:$0xff] }
 0x2b5   :  { %5251 = vmatprep.subr.bf16.mxu0 %v7734_v18  ;;  %v10281_v18 = vld [vmem:[#allocation18_spill] sm:$0xff] }
 0x2b6   :  { %5252 = vmatpush1.bf16.msra.mxu0 %v7732_v60  ;;  %v7738_v60 = vld [vmem:[%s10110_s5 + $0x70] ss:$8 sps:$4 sm:$0xff]  }
 0x2b7   :  { %5253 = vmatprep.subr.bf16.mxu0 %v7737_v0  ;;  %v10282_v0 = vld [vmem:[#allocation42_spill] sm:$0xff] }
 0x2ba   :  { %5254 = vmatpush1.bf16.msra.mxu0 %v7735_v17  ;;  %v7741_v17 = vld [vmem:[%s10110_s5 + $0x80] ss:$8 sps:$4 sm:$0xff]  }
 0x2bb   :  { %3761 = vmatmul.mubr.bf16.gmra.mrb[80].mxu0 %v9232_v31  ;;  %4300 = vmatmul.mubr.bf16.vlgmr.msra.gmra.mrb[192].mxu1 %v10273_v38  ;;  %v7686_v38 = vld [vmem:[#allocation6 + $0x6ac] ss:$16 sps:$4 sm:$0xff]  }
 0x2bc   :  { %3770 = vmatprep.mubr.bf16.mxu0 %v9235_v24  ;;  %4309 = vmatprep.mubr.bf16.mxu1 %v10274_v51  ;;  %v10279_v51 = vld [vmem:[#allocation38_spill] sm:$0xff] }
 0x2bd   :  { %4461 = vmatpush1.bf16.msra.mxu1 %v7669_v39  ;;  %v7681_v39 = vld [vmem:[#allocation6 + $0x688] ss:$16 sps:$4 sm:$0xff]  }
 0x2be   :  { %4462 = vmatprep.subr.bf16.mxu1 %v7674_v22  ;;  %v9271_v22 = vmax.bf16 %v1358_v49, %v8982_v53  ;;  %v1357_v53 = vmul.bf16 1045249613, %v8977_v11 }
 0x2c0   :  { %v9286_v14 = vmax.bf16 %v1357_v53, %v8977_v11  ;;  %v7740_v11 = vld [vmem:[%s10110_s5 + $0x74] ss:$8 sps:$4 sm:$0xff]   ;;  %v7696_v53 = vld [vmem:[#allocation6 + $0x728] ss:$16 sps:$4 sm:$0xff]  }
 0x2c1   :  { %4463 = vmatpush1.bf16.msra.mxu1 %v7672_v8  ;;  %v7689_v8 = vld [vmem:[#allocation6 + $0x6cc] ss:$16 sps:$4 sm:$0xff]   ;;  %5255 = vmatprep.subr.bf16.mxu0 %v7740_v11 }
 0x2c2   :  { %4464 = vmatprep.subr.bf16.mxu1 %v7677_v54  ;;  %v7687_v54 = vld [vmem:[#allocation6 + $0x6c8] ss:$16 sps:$4 sm:$0xff]   ;;  %5256 = vmatpush1.bf16.msra.mxu0 %v7738_v60  ;;  %v7704_v11 = vld [vmem:[#allocation6 + $0x76c] ss:$16 sps:$4 sm:$0xff]  }
 0x2c3   :  { %3771 = vmatmul.mubr.bf16.gmra.mrb[84].mxu0 %v9250_v6  ;;  %4310 = vmatmul.mubr.bf16.gmra.mrb[196].mxu1 %v10276_v23  ;;  %v10280_v23 = vld [vmem:[#allocation15_spill] sm:$0xff] }
 0x2c4   :  { %3780 = vmatprep.mubr.bf16.mxu0 %v9253_v13  ;;  %4319 = vmatprep.mubr.bf16.mxu1 %v10277_v27  ;;  %v7690_v27 = vld [vmem:[#allocation6 + $0x6e8] ss:$16 sps:$4 sm:$0xff]  }
 0x2c5   :  { %4465 = vmatpush1.bf16.msra.mxu1 %v7675_v12  ;;  %v9289_v12 = vmax.bf16 %v1366_v1, %v9001_v15  ;;  %v1365_v15 = vmul.bf16 1045249613, %v8997_v9  ;;  %v7701_v1 = vld [vmem:[#allocation6 + $0x74c] ss:$16 sps:$4 sm:$0xff]  }
 0x2c6   :  { %4466 = vmatprep.subr.bf16.mxu1 %v7680_v61  ;;  %v7692_v61 = vld [vmem:[#allocation6 + $0x6ec] ss:$16 sps:$4 sm:$0xff]  }
 0x2c7   :  { %v9304_v49 = vmax.bf16 %v1365_v15, %v8997_v9  ;;  %v10283_v9 = vld [vmem:[#allocation17_spill] sm:$0xff]  ;;  %v10285_v15 = vld [vmem:[#allocation19_spill] sm:$0xff] }
 0x2c9   :  { %4467 = vmatpush1.bf16.msra.mxu1 %v7678_v63  ;;  %v7695_v63 = vld [vmem:[#allocation6 + $0x70c] ss:$16 sps:$4 sm:$0xff]  }
 0x2ca   :  { %4468 = vmatprep.subr.bf16.mxu1 %v7683_v21  ;;  %v7693_v21 = vld [vmem:[#allocation6 + $0x708] ss:$16 sps:$4 sm:$0xff]  }
 0x2cb   :  { %3781 = vmatmul.mubr.bf16.gmra.mrb[88].mxu0 %v9268_v45  ;;  %4320 = vmatmul.mubr.bf16.gmra.mrb[200].mxu1 %v10278_v41  ;;  %v7698_v41 = vld [vmem:[#allocation6 + $0x72c] ss:$16 sps:$4 sm:$0xff]  }
 0x2cc   :  { %3790 = vmatprep.mubr.bf16.mxu0 %v9271_v22  ;;  %4329 = vmatprep.mubr.bf16.mxu1 %v10279_v51  ;;  %v7746_v51 = vld [vmem:[%s10110_s5 + $0x94] ss:$8 sps:$4 sm:$0xff]  }
 0x2cd   :  { %4469 = vmatpush1.bf16.msra.mxu1 %v7681_v39  ;;  %v7743_v39 = vld [vmem:[%s10110_s5 + $0x84] ss:$8 sps:$4 sm:$0xff]  }
 0x2ce   :  { %4470 = vmatprep.subr.bf16.mxu1 %v7686_v38  ;;  %v9310_v38 = vmax.bf16 %v1374_v42, %v9021_v26  ;;  %v1373_v26 = vmul.bf16 1045249613, %v9017_v44  ;;  %5257 = vmatprep.subr.bf16.mxu0 %v7743_v39  ;;  %v7702_v42 = vld [vmem:[#allocation6 + $0x768] ss:$16 sps:$4 sm:$0xff]  }
 0x2cf   :  { %5258 = vmatpush1.bf16.msra.mxu0 %v7741_v17  ;;  %v7750_v39 = vld [vmem:[%s10110_s5 + $0xb0] ss:$8 sps:$4 sm:$0xff]  }
 0x2d0   :  { %5259 = vmatprep.subr.bf16.mxu0 %v7746_v51  ;;  %v7705_v17 = vld [vmem:[#allocation6 + $0x788] ss:$16 sps:$4 sm:$0xff]   ;;  %v7713_v51 = vld [vmem:[#allocation6 + $0x7ac] ss:$16 sps:$4 sm:$0xff]  }
 0x2d1   :  { %4471 = vmatpush1.bf16.msra.mxu1 %v7684_v5  ;;  %v1382_v5 = vmul.bf16 1045249613, %v9041_v52 }
 0x2d2   :  { %4472 = vmatprep.subr.bf16.mxu1 %v7689_v8  ;;  %v7744_v8 = vld [vmem:[%s10110_s5 + $0x90] ss:$8 sps:$4 sm:$0xff]  }
 0x2d3   :  { %3791 = vmatmul.mubr.bf16.gmra.mrb[92].mxu0 %v9286_v14  ;;  %4330 = vmatmul.mubr.bf16.gmra.mrb[204].mxu1 %v10280_v23  ;;  %v7749_v23 = vld [vmem:[%s10110_s5 + $0xa4] ss:$8 sps:$4 sm:$0xff]   ;;  %v9334_v60 = vmax.bf16 %v1382_v5, %v9041_v52  ;;  %v7752_v52 = vld [vmem:[%s10110_s5 + $0xb4] ss:$8 sps:$4 sm:$0xff]   ;;  %v1389_v5 = vmul.bf16 1045249613, %v9057_v19 }
 0x2d4   :  { %3800 = vmatprep.mubr.bf16.mxu0 %v9289_v12  ;;  %4339 = vmatprep.mubr.bf16.mxu1 %v10281_v18  ;;  %v7747_v18 = vld [vmem:[%s10110_s5 + $0xa0] ss:$8 sps:$4 sm:$0xff]  }
 0x2d5   :  { %4473 = vmatpush1.bf16.msra.mxu1 %v7687_v54  ;;  %v9328_v54 = vmax.bf16 %v1373_v26, %v9017_v44  ;;  %5260 = vmatpush1.bf16.msra.mxu0 %v7744_v8  ;;  %v10284_v44 = vld [vmem:[#allocation44_spill] sm:$0xff]  ;;  %v1398_v8 = vmul.bf16 1045249613, %v9081_v40 }
 0x2d6   :  { %4474 = vmatprep.subr.bf16.mxu1 %v7692_v61  ;;  %v7699_v61 = vld [vmem:[#allocation6 + $0x748] ss:$16 sps:$4 sm:$0xff]   ;;  %5261 = vmatprep.subr.bf16.mxu0 %v7749_v23 }
 0x2d7   :  { %v7753_v26 = vld [vmem:[%s10110_s5 + $0xc0] ss:$8 sps:$4 sm:$0xff]   ;;  %v7756_v23 = vld [vmem:[%s10110_s5 + $0xd0] ss:$8 sps:$4 sm:$0xff]  }
 0x2d9   :  { %4475 = vmatpush1.bf16.msra.mxu1 %v7690_v27  ;;  %v1381_v27 = vmul.bf16 1045249613, %v9037_v16  ;;  %5262 = vmatpush1.bf16.msra.mxu0 %v7747_v18  ;;  %v7717_v18 = vld [vmem:[#allocation6 + $0x7c8] ss:$16 sps:$4 sm:$0xff]  }
 0x2da   :  { %4476 = vmatprep.subr.bf16.mxu1 %v7695_v63  ;;  %v1390_v63 = vmul.bf16 1045249613, %v9061_v48  ;;  %5263 = vmatprep.subr.bf16.mxu0 %v7752_v52  ;;  %v7725_v52 = vld [vmem:[#allocation6 + $0x7ec] ss:$16 sps:$4 sm:$0xff]  }
 0x2db   :  { %3801 = vmatmul.mubr.bf16.gmra.mrb[96].mxu0 %v9304_v49  ;;  %4340 = vmatmul.mubr.bf16.gmra.mrb[208].mxu1 %v10282_v0  ;;  %v7755_v0 = vld [vmem:[%s10110_s5 + $0xc4] ss:$8 sps:$4 sm:$0xff]  }
 0x2dc   :  { %3810 = vmatprep.mubr.bf16.mxu0 %v9310_v38  ;;  %4349 = vmatprep.mubr.bf16.mxu1 %v10283_v9  ;;  %v9358_v9 = vmax.bf16 %v1390_v63, %v9061_v48  ;;  %v7711_v48 = vld [vmem:[#allocation6 + $0x7a8] ss:$16 sps:$4 sm:$0xff]   ;;  %v7764_v63 = vld [vmem:[%s10110_s5 + $0xf4] ss:$8 sps:$4 sm:$0xff]  }
 0x2dd   :  { %4477 = vmatpush1.bf16.msra.mxu1 %v7693_v21  ;;  %v7707_v21 = vld [vmem:[#allocation6 + $0x78c] ss:$16 sps:$4 sm:$0xff]   ;;  %5264 = vmatpush1.bf16.msra.mxu0 %v7750_v39 }
 0x2de   :  { %4478 = vmatprep.subr.bf16.mxu1 %v7698_v41  ;;  %v9352_v41 = vmax.bf16 %v1381_v27, %v9037_v16  ;;  %v10286_v16 = vld [vmem:[#allocation22_spill] sm:$0xff]  ;;  %5265 = vmatprep.subr.bf16.mxu0 %v7755_v0  ;;  %v7759_v27 = vld [vmem:[%s10110_s5 + $0xe0] ss:$8 sps:$4 sm:$0xff]  }
 0x2df   :  { %v10289_v0 = vld [vmem:[#allocation23_spill] sm:$0xff] }
 0x2e1   :  { %4479 = vmatpush1.bf16.msra.mxu1 %v7696_v53  ;;  %v10287_v53 = vld [vmem:[#allocation21_spill] sm:$0xff]  ;;  %5266 = vmatpush1.bf16.msra.mxu0 %v7753_v26  ;;  %v1414_v26 = vmul.bf16 1045249613, %v9121_v57 }
 0x2e2   :  { %4480 = vmatprep.subr.bf16.mxu1 %v7701_v1  ;;  %v7758_v1 = vld [vmem:[%s10110_s5 + $0xd4] ss:$8 sps:$4 sm:$0xff]  }
 0x2e3   :  { %3811 = vmatmul.mubr.bf16.gmra.mrb[100].mxu0 %v9328_v54  ;;  %4350 = vmatmul.mubr.bf16.gmra.mrb[212].mxu1 %v10284_v44  ;;  %v7761_v44 = vld [vmem:[%s10110_s5 + $0xe4] ss:$8 sps:$4 sm:$0xff]  }
 0x2e4   :  { %3820 = vmatprep.mubr.bf16.mxu0 %v9334_v60  ;;  %4359 = vmatprep.mubr.bf16.mxu1 %v10285_v15  ;;  %v9382_v15 = vmax.bf16 %v1398_v8, %v9081_v40  ;;  %v7723_v40 = vld [vmem:[#allocation6 + $0x7e8] ss:$16 sps:$4 sm:$0xff]   ;;  %v1421_v8 = vmul.bf16 1045249613, %v9137_v25 }
 0x2e5   :  { %4481 = vmatpush1.bf16.msra.mxu1 %v7699_v61  ;;  %v7719_v61 = vld [vmem:[#allocation6 + $0x7cc] ss:$16 sps:$4 sm:$0xff]   ;;  %5267 = vmatprep.subr.bf16.mxu0 %v7758_v1 }
 0x2e6   :  { %4482 = vmatprep.subr.bf16.mxu1 %v7704_v11  ;;  %v9376_v11 = vmax.bf16 %v1389_v5, %v9057_v19  ;;  %5268 = vmatpush1.bf16.msra.mxu0 %v7756_v23  ;;  %v10288_v19 = vld [vmem:[#allocation24_spill] sm:$0xff]  ;;  %v1422_v5 = vmul.bf16 1045249613, %v9141_v58  ;;  %v10293_v1 = vld [vmem:[#allocation27_spill] sm:$0xff] }
 0x2e7   :  { %5269 = vmatprep.subr.bf16.mxu0 %v7761_v44 }
 0x2e9   :  { %4483 = vmatpush1.bf16.msra.mxu1 %v7702_v42  ;;  %v1397_v42 = vmul.bf16 1045249613, %v9077_v29 }
 0x2ea   :  { %4484 = vmatprep.subr.bf16.mxu1 %v7707_v21  ;;  %v1406_v21 = vmul.bf16 1045249613, %v9101_v3  ;;  %5270 = vmatpush1.bf16.msra.mxu0 %v7759_v27 }
 0x2eb   :  { %3821 = vmatmul.mubr.bf16.gmra.mrb[104].mxu0 %v9352_v41  ;;  %4360 = vmatmul.mubr.bf16.gmra.mrb[216].mxu1 %v10286_v16  ;;  %v9400_v39 = vmax.bf16 %v1397_v42, %v9077_v29  ;;  %v9415_v16 = vmax.bf16 %v1414_v26, %v9121_v57  ;;  %v10292_v57 = vld [vmem:[#allocation28_spill] sm:$0xff] }
 0x2ec   :  { %3830 = vmatprep.mubr.bf16.mxu0 %v9358_v9  ;;  %4369 = vmatprep.mubr.bf16.mxu1 %v10287_v53  ;;  %v1413_v53 = vmul.bf16 1045249613, %v9117_v28 }
 0x2ed   :  { %4485 = vmatpush1.bf16.msra.mxu1 %v7705_v17  ;;  %5271 = vmatprep.subr.bf16.mxu0 %v7764_v63  ;;  %v9403_v17 = vmax.bf16 %v1406_v21, %v9101_v3  ;;  %v10290_v3 = vld [vmem:[#allocation26_spill] sm:$0xff] }
 0x2ee   :  { %4486 = vmatprep.subr.bf16.mxu1 %v7713_v51  ;;  %v1405_v51 = vmul.bf16 1045249613, %v9097_v35 }
 0x2f0   :  { %v9412_v29 = vmax.bf16 %v1405_v51, %v9097_v35  ;;  %v9427_v35 = vmax.bf16 %v1422_v5, %v9141_v58  ;;  %v10294_v58 = vld [vmem:[#allocation30_spill] sm:$0xff] }
 0x2f1   :  { %4487 = vmatpush1.bf16.msra.mxu1 %v7711_v48  ;;  %v9424_v48 = vmax.bf16 %v1413_v53, %v9117_v28  ;;  %v7767_v28 = vld [vmem:[%s10110_s5 + $0x104] ss:$8 sps:$4 sm:$0xff]   ;;  %v7776_v53 = vld [vmem:[%s10110_s5 + $0x134] ss:$8 sps:$4 sm:$0xff]  }
 0x2f2   :  { %4488 = vmatprep.subr.bf16.mxu1 %v7719_v61  ;;  %v9435_v61 = vmax.bf16 %v1421_v8, %v9137_v25 }
 0x2f3   :  { %3831 = vmatmul.mubr.bf16.gmra.mrb[108].mxu0 %v9376_v11  ;;  %4370 = vmatmul.mubr.bf16.gmra.mrb[220].mxu1 %v8990_v33  ;;  %v7762_v33 = vld [vmem:[%s10110_s5 + $0xf0] ss:$8 sps:$4 sm:$0xff]  }
 0x2f4   :  { %3840 = vmatprep.mubr.bf16.mxu0 %v9382_v15  ;;  %4379 = vmatprep.mubr.bf16.mxu1 %v10288_v19  ;;  %v7768_v19 = vld [vmem:[%s10110_s5 + $0x110] ss:$8 sps:$4 sm:$0xff]  }
 0x2f5   :  { %4489 = vmatpush1.bf16.msra.mxu1 %v7717_v18  ;;  %5272 = vmatpush1.bf16.msra.mxu0 %v7762_v33 }
 0x2f6   :  { %4490 = vmatprep.subr.bf16.mxu1 %v7725_v52  ;;  %5434 = vmatprep.subr.bf16.mxu0 %v7767_v28  ;;  %v7774_v28 = vld [vmem:[%s10110_s5 + $0x130] ss:$8 sps:$4 sm:$0xff]  }
 0x2f9   :  { %4491 = vmatpush1.bf16.msra.mxu1 %v7723_v40  ;;  %v7773_v40 = vld [vmem:[%s10110_s5 + $0x124] ss:$8 sps:$4 sm:$0xff]  }
 0x2fb   :  { %3841 = vmatmul.mubr.bf16.gmra.mrb[112].mxu0 %v9400_v39  ;;  %4380 = vmatmul.mubr.bf16.gmra.mrb[224].mxu1 %v9010_v32  ;;  %v10291_v32 = vld [vmem:[#allocation25_spill] sm:$0xff] }
 0x2fc   :  { %3850 = vmatprep.mubr.bf16.mxu0 %v9403_v17  ;;  %4389 = vmatprep.mubr.bf16.mxu1 %v10289_v0 }
 0x303   :  { %3851 = vmatmul.mubr.bf16.gmra.mrb[116].mxu0 %v9412_v29  ;;  %4390 = vmatmul.mubr.bf16.gmra.mrb[228].mxu1 %v10290_v3 }
 0x304   :  { %3860 = vmatprep.mubr.bf16.mxu0 %v9415_v16  ;;  %4399 = vmatprep.mubr.bf16.mxu1 %v10291_v32 }
 0x30b   :  { %3861 = vmatmul.mubr.bf16.gmra.mrb[120].mxu0 %v9424_v48  ;;  %4400 = vmatmul.mubr.bf16.gmra.mrb[232].mxu1 %v10292_v57 }
 0x30c   :  { %3870 = vmatprep.mubr.bf16.mxu0 %v9427_v35  ;;  %4409 = vmatprep.mubr.bf16.mxu1 %v10293_v1 }
 0x313   :  { %3871 = vmatmul.mubr.bf16.gmra.mrb[124].mxu0 %v9435_v61  ;;  %4410 = vmatmul.mubr.bf16.gmra.mrb[236].mxu1 %v9070_v10  ;;  %v10295_v10 = vld [vmem:[#allocation13_spill] sm:$0xff] }
 0x314   :  { %4419 = vmatprep.mubr.bf16.mxu1 %v9075_v7  ;;  %v9466_v7 = vld [vmem:[%s10109_s4] sm:$0xf] }
 0x31b   :  { %4420 = vmatmul.mubr.bf16.gmra.mrb[240].mxu1 %v9090_v43  ;;  %v9472_v43 = vrot.slane %v9466_v7, %v10295_v10 }
 0x31c   :  { %4429 = vmatprep.mubr.bf16.mxu1 %v9095_v56 }
 0x323   :  { %4430 = vmatmul.mubr.bf16.gmra.mrb[244].mxu1 %v9110_v46  ;;  %v10296_v46 = vld [vmem:[#allocation14_spill] sm:$0xff] }
 0x324   :  { %4439 = vmatprep.mubr.bf16.mxu1 %v10294_v58  ;;  %v9476_v25 = vrot.slane %v9466_v7, %v10296_v46 }
 0x32b   :  { %4440 = vmatmul.mubr.bf16.gmra.mrb[248].mxu1 %v9130_v20 }
 0x32c   :  { %4449 = vmatprep.mubr.bf16.mxu1 %v9135_v2 }
 0x333   :  { %4450 = vmatmul.mubr.bf16.gmra.mrb[252].mxu1 %v9148_v59 }
 0x334   :  { %4492 = vmatprep.mubr.bf16.mxu1 %v9151_v36 }
 0x33b   :  { %4493 = vmatmul.mubr.bf16.vlgmr.msra.gmra.mrb[192].mxu1 %v9160_v30 }
 0x33c   :  { %4502 = vmatprep.mubr.bf16.mxu1 %v9163_v37 }
 0x343   :  { %4503 = vmatmul.mubr.bf16.gmra.mrb[196].mxu1 %v9178_v34 }
 0x344   :  { %4512 = vmatprep.mubr.bf16.mxu1 %v9181_v47 }
 0x34b   :  { %4513 = vmatmul.mubr.bf16.gmra.mrb[200].mxu1 %v9196_v62 }
 0x34c   :  { %4522 = vmatprep.mubr.bf16.mxu1 %v9199_v55 }
 0x353   :  { %4523 = vmatmul.mubr.bf16.gmra.mrb[204].mxu1 %v9214_v4 }
 0x354   :  { %4532 = vmatprep.mubr.bf16.mxu1 %v9217_v50 }
 0x35b   :  { %4533 = vmatmul.mubr.bf16.gmra.mrb[208].mxu1 %v9232_v31 }
 0x35c   :  { %4542 = vmatprep.mubr.bf16.mxu1 %v9235_v24 }
 0x363   :  { %4543 = vmatmul.mubr.bf16.gmra.mrb[212].mxu1 %v9250_v6 }
 0x364   :  { %4552 = vmatprep.mubr.bf16.mxu1 %v9253_v13  ;;  %v7765_v13 = vld [vmem:[%s10110_s5 + $0x100] ss:$8 sps:$4 sm:$0xff]  }
 0x36b   :  { %4553 = vmatmul.mubr.bf16.gmra.mrb[216].mxu1 %v9268_v45 }
 0x36c   :  { %4562 = vmatprep.mubr.bf16.mxu1 %v9271_v22 }
 0x36e   :  { %v3722_v56 = vpop.f32.mrb[64].mxu0 }
 0x36f   :  { %v3724_v20 = vpop.f32.mrb[65].mxu0  ;;  %v6682_v59 = vadd.f32 %v3722_v56, %v9472_v43  ;;  %v7779_v56 = vld [vmem:[%s10110_s5 + $0x144] ss:$8 sps:$4 sm:$0xff]  }
 0x370   :  { %v3726_v2 = vpop.f32.mrb[66].mxu0  ;;  %v6683_v37 = vadd.f32 %v3724_v20, %v9476_v25 }
 0x371   :  { %v6684_v36 = vadd.f32 %v3726_v2, %v9472_v43  ;;  %v3728_v30 = vpop.f32.mrb[67].mxu0 }
 0x372   :  { %v6685_v34 = vadd.f32 %v3728_v30, %v9476_v25 }
 0x373   :  { %v4653_v47 = vpack.c.bf16 %v6684_v36, %v6682_v59  ;;  %4563 = vmatmul.mubr.bf16.gmra.mrb[220].mxu1 %v9286_v14  ;;  %v7770_v14 = vld [vmem:[%s10110_s5 + $0x114] ss:$8 sps:$4 sm:$0xff]  }
 0x374   :  { %v4654_v62 = vpack.c.bf16 %v6685_v34, %v6683_v37  ;;  %4572 = vmatprep.mubr.bf16.mxu1 %v9289_v12 }
 0x375   :  { %v4717_v55 = vmul.bf16 1045249613, %v4653_v47 }
 0x376   :  { %v4718_v4 = vmul.bf16 1045249613, %v4654_v62  ;;  %v3732_v50 = vpop.f32.mrb[68].mxu0 }
 0x377   :  { %v3734_v31 = vpop.f32.mrb[69].mxu0  ;;  %v4781_v45 = vmax.bf16 %v4717_v55, %v4653_v47  ;;  %v6686_v22 = vadd.f32 %v3732_v50, %v9472_v43 }
 0x378   :  { %v3736_v24 = vpop.f32.mrb[70].mxu0  ;;  %v4782_v6 = vmax.bf16 %v4718_v4, %v4654_v62  ;;  %v6687_v12 = vadd.f32 %v3734_v31, %v9476_v25  ;;  %v7782_v62 = vld [vmem:[%s10110_s5 + $0x154] ss:$8 sps:$4 sm:$0xff]  }
 0x379   :  { %v6688_v23 = vadd.f32 %v3736_v24, %v9472_v43  ;;  %v3738_v18 = vpop.f32.mrb[71].mxu0  ;;  %v7780_v24 = vld [vmem:[%s10110_s5 + $0x150] ss:$8 sps:$4 sm:$0xff]  }
 0x37a   :  { %v6689_v44 = vadd.f32 %v3738_v18, %v9476_v25  ;;  %5273 = vmatprep.mubr.bf16.mxu0 %v4782_v6 }
 0x37b   :  { %v4657_v52 = vpack.c.bf16 %v6688_v23, %v6686_v22  ;;  %4573 = vmatmul.mubr.bf16.gmra.mrb[224].mxu1 %v9304_v49  ;;  %5274 = vmatmul.mubr.bf16.vlgmr.msra.gmra.mrb[128].mxu0 %v4781_v45 }
 0x37c   :  { %v4658_v27 = vpack.c.bf16 %v6689_v44, %v6687_v12  ;;  %4582 = vmatprep.mubr.bf16.mxu1 %v9310_v38  ;;  %5435 = vmatpush1.bf16.msra.mxu0 %v7765_v13  ;;  %v7771_v38 = vld [vmem:[%s10110_s5 + $0x120] ss:$8 sps:$4 sm:$0xff]   ;;  %v7785_v13 = vld [vmem:[%s10110_s5 + $0x164] ss:$8 sps:$4 sm:$0xff]  }
 0x37d   :  { %v4721_v42 = vmul.bf16 1045249613, %v4657_v52  ;;  %5436 = vmatprep.subr.bf16.mxu0 %v7770_v14 }
 0x37e   :  { %v4722_v63 = vmul.bf16 1045249613, %v4658_v27  ;;  %v3742_v21 = vpop.f32.mrb[72].mxu0 }
 0x37f   :  { %v3744_v33 = vpop.f32.mrb[73].mxu0  ;;  %v6690_v51 = vadd.f32 %v3742_v21, %v9472_v43  ;;  %v4785_v32 = vmax.bf16 %v4721_v42, %v4657_v52  ;;  %v7786_v21 = vld [vmem:[%s10110_s5 + $0x170] ss:$8 sps:$4 sm:$0xff]  }
 0x380   :  { %v3746_v0 = vpop.f32.mrb[74].mxu0  ;;  %v4786_v49 = vmax.bf16 %v4722_v63, %v4658_v27  ;;  %5437 = vmatpush1.bf16.msra.mxu0 %v7768_v19  ;;  %v6691_v5 = vadd.f32 %v3744_v33, %v9476_v25  ;;  %v7788_v27 = vld [vmem:[%s10110_s5 + $0x174] ss:$8 sps:$4 sm:$0xff]  }
 0x381   :  { %v6692_v26 = vadd.f32 %v3746_v0, %v9472_v43  ;;  %v3748_v3 = vpop.f32.mrb[75].mxu0  ;;  %5438 = vmatprep.subr.bf16.mxu0 %v7773_v40  ;;  %v7791_v0 = vld [vmem:[%s10110_s5 + $0x184] ss:$8 sps:$4 sm:$0xff]  }
 0x382   :  { %v6693_v57 = vadd.f32 %v3748_v3, %v9476_v25  ;;  %5283 = vmatprep.mubr.bf16.mxu0 %v4786_v49 }
 0x383   :  { %v4661_v1 = vpack.c.bf16 %v6692_v26, %v6690_v51  ;;  %4583 = vmatmul.mubr.bf16.gmra.mrb[228].mxu1 %v9328_v54  ;;  %5284 = vmatmul.mubr.bf16.gmra.mrb[132].mxu0 %v4785_v32 }
 0x384   :  { %v4662_v8 = vpack.c.bf16 %v6693_v57, %v6691_v5  ;;  %4592 = vmatprep.mubr.bf16.mxu1 %v9334_v60  ;;  %5439 = vmatpush1.bf16.msra.mxu0 %v7771_v38  ;;  %v7777_v60 = vld [vmem:[%s10110_s5 + $0x140] ss:$8 sps:$4 sm:$0xff]   ;;  %v7794_v57 = vld [vmem:[%s10110_s5 + $0x194] ss:$8 sps:$4 sm:$0xff]  }
 0x385   :  { %v4725_v58 = vmul.bf16 1045249613, %v4661_v1  ;;  %5440 = vmatprep.subr.bf16.mxu0 %v7776_v53 }
 0x386   :  { %v4726_v20 = vmul.bf16 1045249613, %v4662_v8  ;;  %v3752_v2 = vpop.f32.mrb[76].mxu0 }
 0x387   :  { %v3754_v59 = vpop.f32.mrb[77].mxu0  ;;  %v6694_v30 = vadd.f32 %v3752_v2, %v9472_v43  ;;  %v4789_v47 = vmax.bf16 %v4725_v58, %v4661_v1  ;;  %v7797_v2 = vld [vmem:[%s10110_s5 + $0x1a4] ss:$8 sps:$4 sm:$0xff]  }
 0x388   :  { %v3756_v36 = vpop.f32.mrb[78].mxu0  ;;  %v4790_v54 = vmax.bf16 %v4726_v20, %v4662_v8  ;;  %5441 = vmatpush1.bf16.msra.mxu0 %v7774_v28  ;;  %v6695_v55 = vadd.f32 %v3754_v59, %v9476_v25 }
 0x389   :  { %v6696_v37 = vadd.f32 %v3756_v36, %v9472_v43  ;;  %v3758_v34 = vpop.f32.mrb[79].mxu0  ;;  %5442 = vmatprep.subr.bf16.mxu0 %v7779_v56  ;;  %v7792_v56 = vld [vmem:[%s10110_s5 + $0x190] ss:$8 sps:$4 sm:$0xff]  }
 0x38a   :  { %v6697_v4 = vadd.f32 %v3758_v34, %v9476_v25  ;;  %5293 = vmatprep.mubr.bf16.mxu0 %v4790_v54 }
 0x38b   :  { %v4665_v50 = vpack.c.bf16 %v6696_v37, %v6694_v30  ;;  %4593 = vmatmul.mubr.bf16.gmra.mrb[232].mxu1 %v9352_v41  ;;  %5294 = vmatmul.mubr.bf16.gmra.mrb[136].mxu0 %v4789_v47 }
 0x38c   :  { %v4666_v31 = vpack.c.bf16 %v6697_v4, %v6695_v55  ;;  %4602 = vmatprep.mubr.bf16.mxu1 %v9358_v9  ;;  %5443 = vmatpush1.bf16.msra.mxu0 %v7777_v60  ;;  %v7783_v9 = vld [vmem:[%s10110_s5 + $0x160] ss:$8 sps:$4 sm:$0xff]  }
 0x38d   :  { %v4729_v6 = vmul.bf16 1045249613, %v4665_v50  ;;  %5444 = vmatprep.subr.bf16.mxu0 %v7782_v62  ;;  %v7800_v62 = vld [vmem:[%s10110_s5 + $0x1b4] ss:$8 sps:$4 sm:$0xff]  }
 0x38e   :  { %v4730_v45 = vmul.bf16 1045249613, %v4666_v31  ;;  %v3762_v22 = vpop.f32.mrb[80].mxu0 }
 0x38f   :  { %v3764_v23 = vpop.f32.mrb[81].mxu0  ;;  %v6698_v14 = vadd.f32 %v3762_v22, %v9472_v43  ;;  %v4793_v52 = vmax.bf16 %v4729_v6, %v4665_v50 }
 0x390   :  { %v3766_v18 = vpop.f32.mrb[82].mxu0  ;;  %v4794_v41 = vmax.bf16 %v4730_v45, %v4666_v31  ;;  %5445 = vmatpush1.bf16.msra.mxu0 %v7780_v24  ;;  %v6699_v19 = vadd.f32 %v3764_v23, %v9476_v25  ;;  %v7798_v24 = vld [vmem:[%s10110_s5 + $0x1b0] ss:$8 sps:$4 sm:$0xff]  }
 0x391   :  { %v6700_v12 = vadd.f32 %v3766_v18, %v9472_v43  ;;  %v3768_v44 = vpop.f32.mrb[83].mxu0  ;;  %5446 = vmatprep.subr.bf16.mxu0 %v7785_v13  ;;  %v7803_v13 = vld [vmem:[%s10110_s5 + $0x1c4] ss:$8 sps:$4 sm:$0xff]  }
 0x392   :  { %v6701_v42 = vadd.f32 %v3768_v44, %v9476_v25  ;;  %5303 = vmatprep.mubr.bf16.mxu0 %v4794_v41  ;;  %v7806_v44 = vld [vmem:[%s10110_s5 + $0x1d4] ss:$8 sps:$4 sm:$0xff]  }
 0x393   :  { %v4669_v40 = vpack.c.bf16 %v6700_v12, %v6698_v14  ;;  %4603 = vmatmul.mubr.bf16.gmra.mrb[236].mxu1 %v9376_v11  ;;  %5304 = vmatmul.mubr.bf16.gmra.mrb[140].mxu0 %v4793_v52 }
 0x394   :  { %v4670_v63 = vpack.c.bf16 %v6701_v42, %v6699_v19  ;;  %4612 = vmatprep.mubr.bf16.mxu1 %v9382_v15  ;;  %5447 = vmatpush1.bf16.msra.mxu0 %v7783_v9  ;;  %v7789_v15 = vld [vmem:[%s10110_s5 + $0x180] ss:$8 sps:$4 sm:$0xff]  }
 0x395   :  { %v4733_v33 = vmul.bf16 1045249613, %v4669_v40  ;;  %5448 = vmatprep.subr.bf16.mxu0 %v7788_v27 }
 0x396   :  { %v4734_v49 = vmul.bf16 1045249613, %v4670_v63  ;;  %v3772_v38 = vpop.f32.mrb[84].mxu0 }
 0x397   :  { %v3774_v51 = vpop.f32.mrb[85].mxu0  ;;  %v6702_v3 = vadd.f32 %v3772_v38, %v9472_v43  ;;  %v4797_v5 = vmax.bf16 %v4733_v33, %v4669_v40  ;;  %v7804_v40 = vld [vmem:[%s10110_s5 + $0x1d0] ss:$8 sps:$4 sm:$0xff]  }
 0x398   :  { %v3776_v26 = vpop.f32.mrb[86].mxu0  ;;  %v4798_v11 = vmax.bf16 %v4734_v49, %v4670_v63  ;;  %5449 = vmatpush1.bf16.msra.mxu0 %v7786_v21  ;;  %v6703_v1 = vadd.f32 %v3774_v51, %v9476_v25  ;;  %v7809_v21 = vld [vmem:[%s10110_s5 + $0x1e4] ss:$8 sps:$4 sm:$0xff]  }
 0x399   :  { %v6704_v32 = vadd.f32 %v3776_v26, %v9472_v43  ;;  %v3778_v53 = vpop.f32.mrb[87].mxu0  ;;  %5450 = vmatprep.subr.bf16.mxu0 %v7791_v0 }
 0x39a   :  { %v6705_v8 = vadd.f32 %v3778_v53, %v9476_v25  ;;  %5313 = vmatprep.mubr.bf16.mxu0 %v4798_v11 }
 0x39b   :  { %v4673_v28 = vpack.c.bf16 %v6704_v32, %v6702_v3  ;;  %4613 = vmatmul.mubr.bf16.gmra.mrb[240].mxu1 %v9400_v39  ;;  %5314 = vmatmul.mubr.bf16.gmra.mrb[144].mxu0 %v4797_v5  ;;  %v7812_v3 = vld [vmem:[%s10110_s5 + $0x1f4] ss:$8 sps:$4 sm:$0xff]  }
 0x39c   :  { %v4674_v58 = vpack.c.bf16 %v6705_v8, %v6703_v1  ;;  %4622 = vmatprep.mubr.bf16.mxu1 %v9403_v17  ;;  %5451 = vmatpush1.bf16.msra.mxu0 %v7789_v15  ;;  %v7795_v17 = vld [vmem:[%s10110_s5 + $0x1a0] ss:$8 sps:$4 sm:$0xff]   ;;  %v7810_v1 = vld [vmem:[%s10110_s5 + $0x1f0] ss:$8 sps:$4 sm:$0xff]  }
 0x39d   :  { %v4737_v20 = vmul.bf16 1045249613, %v4673_v28  ;;  %5452 = vmatprep.subr.bf16.mxu0 %v7794_v57 }
 0x39e   :  { %v4738_v59 = vmul.bf16 1045249613, %v4674_v58  ;;  %v3782_v36 = vpop.f32.mrb[88].mxu0 }
 0x39f   :  { %v3784_v54 = vpop.f32.mrb[89].mxu0  ;;  %v6706_v30 = vadd.f32 %v3782_v36, %v9472_v43  ;;  %v4801_v47 = vmax.bf16 %v4737_v20, %v4673_v28 }
 0x3a0   :  { %v3786_v60 = vpop.f32.mrb[90].mxu0  ;;  %v4802_v39 = vmax.bf16 %v4738_v59, %v4674_v58  ;;  %5453 = vmatpush1.bf16.msra.mxu0 %v7792_v56  ;;  %v6707_v55 = vadd.f32 %v3784_v54, %v9476_v25 }
 0x3a1   :  { %v6708_v37 = vadd.f32 %v3786_v60, %v9472_v43  ;;  %v3788_v34 = vpop.f32.mrb[91].mxu0  ;;  %5454 = vmatprep.subr.bf16.mxu0 %v7797_v2 }
 0x3a2   :  { %v6709_v4 = vadd.f32 %v3788_v34, %v9476_v25  ;;  %5323 = vmatprep.mubr.bf16.mxu0 %v4802_v39 }
 0x3a3   :  { %v4677_v50 = vpack.c.bf16 %v6708_v37, %v6706_v30  ;;  %4623 = vmatmul.mubr.bf16.gmra.mrb[244].mxu1 %v9412_v29  ;;  %5324 = vmatmul.mubr.bf16.gmra.mrb[148].mxu0 %v4801_v47 }
 0x3a4   :  { %v4678_v31 = vpack.c.bf16 %v6709_v4, %v6707_v55  ;;  %4632 = vmatprep.mubr.bf16.mxu1 %v9415_v16  ;;  %5455 = vmatpush1.bf16.msra.mxu0 %v7795_v17  ;;  %v7801_v16 = vld [vmem:[%s10110_s5 + $0x1c0] ss:$8 sps:$4 sm:$0xff]  }
 0x3a5   :  { %v4741_v6 = vmul.bf16 1045249613, %v4677_v50  ;;  %5456 = vmatprep.subr.bf16.mxu0 %v7800_v62 }
 0x3a6   :  { %v4742_v45 = vmul.bf16 1045249613, %v4678_v31  ;;  %v3792_v22 = vpop.f32.mrb[92].mxu0 }
 0x3a7   :  { %v3794_v23 = vpop.f32.mrb[93].mxu0  ;;  %v6710_v41 = vadd.f32 %v3792_v22, %v9472_v43  ;;  %v4805_v12 = vmax.bf16 %v4741_v6, %v4677_v50 }
 0x3a8   :  { %v3796_v18 = vpop.f32.mrb[94].mxu0  ;;  %v4806_v29 = vmax.bf16 %v4742_v45, %v4678_v31  ;;  %5457 = vmatpush1.bf16.msra.mxu0 %v7798_v24  ;;  %v6711_v52 = vadd.f32 %v3794_v23, %v9476_v25 }
 0x3a9   :  { %v6712_v9 = vadd.f32 %v3796_v18, %v9472_v43  ;;  %v3798_v14 = vpop.f32.mrb[95].mxu0  ;;  %5458 = vmatprep.subr.bf16.mxu0 %v7803_v13 }
 0x3aa   :  { %v6713_v27 = vadd.f32 %v3798_v14, %v9476_v25  ;;  %5333 = vmatprep.mubr.bf16.mxu0 %v4806_v29 }
 0x3ab   :  { %v4681_v19 = vpack.c.bf16 %v6712_v9, %v6710_v41  ;;  %4633 = vmatmul.mubr.bf16.gmra.mrb[248].mxu1 %v9424_v48  ;;  %5334 = vmatmul.mubr.bf16.gmra.mrb[152].mxu0 %v4805_v12 }
 0x3ac   :  { %v4682_v42 = vpack.c.bf16 %v6713_v27, %v6711_v52  ;;  %4642 = vmatprep.mubr.bf16.mxu1 %v9427_v35  ;;  %5459 = vmatpush1.bf16.msra.mxu0 %v7801_v16  ;;  %v7807_v35 = vld [vmem:[%s10110_s5 + $0x1e0] ss:$8 sps:$4 sm:$0xff]  }
 0x3ad   :  { %v4745_v63 = vmul.bf16 1045249613, %v4681_v19  ;;  %5460 = vmatprep.subr.bf16.mxu0 %v7806_v44 }
 0x3ae   :  { %v4746_v33 = vmul.bf16 1045249613, %v4682_v42  ;;  %v3802_v0 = vpop.f32.mrb[96].mxu0 }
 0x3af   :  { %v3804_v49 = vpop.f32.mrb[97].mxu0  ;;  %v6714_v51 = vadd.f32 %v3802_v0, %v9472_v43  ;;  %v4809_v15 = vmax.bf16 %v4745_v63, %v4681_v19 }
 0x3b0   :  { %v3806_v38 = vpop.f32.mrb[98].mxu0  ;;  %v4810_v48 = vmax.bf16 %v4746_v33, %v4682_v42  ;;  %5461 = vmatpush1.bf16.msra.mxu0 %v7804_v40  ;;  %v6715_v32 = vadd.f32 %v3804_v49, %v9476_v25 }
 0x3b1   :  { %v6716_v26 = vadd.f32 %v3806_v38, %v9472_v43  ;;  %v3808_v11 = vpop.f32.mrb[99].mxu0  ;;  %5462 = vmatprep.subr.bf16.mxu0 %v7809_v21 }
 0x3b2   :  { %v6717_v53 = vadd.f32 %v3808_v11, %v9476_v25  ;;  %5343 = vmatprep.mubr.bf16.mxu0 %v4810_v48 }
 0x3b3   :  { %v4685_v5 = vpack.c.bf16 %v6716_v26, %v6714_v51  ;;  %4643 = vmatmul.mubr.bf16.gmra.mrb[252].mxu1 %v9435_v61  ;;  %5344 = vmatmul.mubr.bf16.gmra.mrb[156].mxu0 %v4809_v15 }
 0x3b4   :  { %v4686_v57 = vpack.c.bf16 %v6717_v53, %v6715_v32  ;;  %5463 = vmatpush1.bf16.msra.mxu0 %v7807_v35 }
 0x3b5   :  { %v4749_v8 = vmul.bf16 1045249613, %v4685_v5  ;;  %5464 = vmatprep.subr.bf16.mxu0 %v7812_v3 }
 0x3b6   :  { %v4750_v28 = vmul.bf16 1045249613, %v4686_v57  ;;  %v3812_v58 = vpop.f32.mrb[100].mxu0 }
 0x3b7   :  { %v3814_v56 = vpop.f32.mrb[101].mxu0  ;;  %v6718_v59 = vadd.f32 %v3812_v58, %v9472_v43  ;;  %v4813_v54 = vmax.bf16 %v4749_v8, %v4685_v5 }
 0x3b8   :  { %v3816_v20 = vpop.f32.mrb[102].mxu0  ;;  %v4814_v2 = vmax.bf16 %v4750_v28, %v4686_v57  ;;  %5465 = vmatpush1.bf16.msra.mxu0 %v7810_v1  ;;  %v6719_v60 = vadd.f32 %v3814_v56, %v9476_v25 }
 0x3b9   :  { %v6720_v36 = vadd.f32 %v3816_v20, %v9472_v43  ;;  %v3818_v61 = vpop.f32.mrb[103].mxu0 }
 0x3ba   :  { %v6721_v39 = vadd.f32 %v3818_v61, %v9476_v25  ;;  %5353 = vmatprep.mubr.bf16.mxu0 %v4814_v2 }
 0x3bb   :  { %v4689_v17 = vpack.c.bf16 %v6720_v36, %v6718_v59  ;;  %5354 = vmatmul.mubr.bf16.gmra.mrb[160].mxu0 %v4813_v54 }
 0x3bc   :  { %v4690_v30 = vpack.c.bf16 %v6721_v39, %v6719_v60 }
 0x3bd   :  { %v4753_v37 = vmul.bf16 1045249613, %v4689_v17 }
 0x3be   :  { %v4754_v34 = vmul.bf16 1045249613, %v4690_v30  ;;  %v3822_v47 = vpop.f32.mrb[104].mxu0 }
 0x3bf   :  { %v3824_v62 = vpop.f32.mrb[105].mxu0  ;;  %v6722_v50 = vadd.f32 %v3822_v47, %v9472_v43  ;;  %v4817_v6 = vmax.bf16 %v4753_v37, %v4689_v17 }
 0x3c0   :  { %v3826_v55 = vpop.f32.mrb[106].mxu0  ;;  %v4818_v4 = vmax.bf16 %v4754_v34, %v4690_v30  ;;  %v6723_v13 = vadd.f32 %v3824_v62, %v9476_v25 }
 0x3c1   :  { %v6724_v31 = vadd.f32 %v3826_v55, %v9472_v43  ;;  %v3828_v24 = vpop.f32.mrb[107].mxu0 }
 0x3c2   :  { %v6725_v45 = vadd.f32 %v3828_v24, %v9476_v25  ;;  %5363 = vmatprep.mubr.bf16.mxu0 %v4818_v4 }
 0x3c3   :  { %v4693_v22 = vpack.c.bf16 %v6724_v31, %v6722_v50  ;;  %5364 = vmatmul.mubr.bf16.gmra.mrb[164].mxu0 %v4817_v6 }
 0x3c4   :  { %v4694_v23 = vpack.c.bf16 %v6725_v45, %v6723_v13 }
 0x3c5   :  { %v4757_v18 = vmul.bf16 1045249613, %v4693_v22 }
 0x3c6   :  { %v4758_v29 = vmul.bf16 1045249613, %v4694_v23  ;;  %v3832_v16 = vpop.f32.mrb[108].mxu0 }
 0x3c7   :  { %v3834_v41 = vpop.f32.mrb[109].mxu0  ;;  %v6726_v12 = vadd.f32 %v3832_v16, %v9472_v43  ;;  %v4821_v27 = vmax.bf16 %v4757_v18, %v4693_v22 }
 0x3c8   :  { %v3836_v9 = vpop.f32.mrb[110].mxu0  ;;  %v4822_v14 = vmax.bf16 %v4758_v29, %v4694_v23  ;;  %v6727_v19 = vadd.f32 %v3834_v41, %v9476_v25 }
 0x3c9   :  { %v6728_v44 = vadd.f32 %v3836_v9, %v9472_v43  ;;  %v3838_v52 = vpop.f32.mrb[111].mxu0 }
 0x3ca   :  { %v6729_v42 = vadd.f32 %v3838_v52, %v9476_v25  ;;  %5373 = vmatprep.mubr.bf16.mxu0 %v4822_v14 }
 0x3cb   :  { %v4697_v40 = vpack.c.bf16 %v6728_v44, %v6726_v12  ;;  %5374 = vmatmul.mubr.bf16.gmra.mrb[168].mxu0 %v4821_v27 }
 0x3cc   :  { %v4698_v63 = vpack.c.bf16 %v6729_v42, %v6727_v19  ;;  %v5883_v42 = vld [vmem:[%s10112_s7] sm:$0xff] }
 0x3cd   :  { %v4761_v21 = vmul.bf16 1045249613, %v4697_v40  ;;  %5917 = vperm.xlu1 %7331, %v5883_v42  }
 0x3ce   :  { %v4762_v33 = vmul.bf16 1045249613, %v4698_v63  ;;  %v3842_v0 = vpop.f32.mrb[112].mxu0 }
 0x3cf   :  { %v3844_v49 = vpop.f32.mrb[113].mxu0  ;;  %v6730_v35 = vadd.f32 %v3842_v0, %v9472_v43  ;;  %v4825_v11 = vmax.bf16 %v4761_v21, %v4697_v40  ;;  %v5886_v0 = vld [vmem:[%s10112_s7 + $0x18] sm:$0xff] }
 0x3d0   :  { %v3846_v38 = vpop.f32.mrb[114].mxu0  ;;  %v4826_v48 = vmax.bf16 %v4762_v33, %v4698_v63  ;;  %v6731_v15 = vadd.f32 %v3844_v49, %v9476_v25  ;;  %v5887_v49 = vld [vmem:[%s10112_s7 + $0x20] sm:$0xff] }
 0x3d1   :  { %v6732_v51 = vadd.f32 %v3846_v38, %v9472_v43  ;;  %v3848_v26 = vpop.f32.mrb[115].mxu0  ;;  %v5888_v38 = vld [vmem:[%s10112_s7 + $0x28] sm:$0xff] }
 0x3d2   :  { %v6733_v3 = vadd.f32 %v3848_v26, %v9476_v25  ;;  %5383 = vmatprep.mubr.bf16.mxu0 %v4826_v48  ;;  %v5889_v48 = vld [vmem:[%s10112_s7 + $0x30] sm:$0xff]  ;;  %v10297_v26 = vld [vmem:[#allocation12_spill] sm:$0xff] }
 0x3d3   :  { %v4701_v32 = vpack.c.bf16 %v6732_v51, %v6730_v35  ;;  %5384 = vmatmul.mubr.bf16.gmra.mrb[172].mxu0 %v4825_v11  ;;  %v5890_v35 = vld [vmem:[%s10112_s7 + $0x38] sm:$0xff]  ;;  %v5891_v51 = vld [vmem:[%s10112_s7 + $0x40] sm:$0xff]  ;;  %v10298_v11 = vsub.s32 2, %v10297_v26 }
 0x3d4   :  { %v4702_v53 = vpack.c.bf16 %v6733_v3, %v6731_v15 }
 0x3d5   :  { %v4765_v5 = vmul.bf16 1045249613, %v4701_v32  ;;  %v9682_v15 = vrot.slane %v9466_v7, %v10298_v11 }
 0x3d6   :  { %v4766_v57 = vmul.bf16 1045249613, %v4702_v53  ;;  %v3852_v1 = vpop.f32.mrb[116].mxu0 }
 0x3d7   :  { %v3854_v8 = vpop.f32.mrb[117].mxu0  ;;  %v6734_v56 = vadd.f32 %v3852_v1, %v9472_v43  ;;  %v4829_v59 = vmax.bf16 %v4765_v5, %v4701_v32  ;;  %v10299_v32 = vsub.s32 3, %v10297_v26  ;;  %v5892_v5 = vld [vmem:[%s10112_s7 + $0x48] sm:$0xff] }
 0x3d8   :  { %v3856_v28 = vpop.f32.mrb[118].mxu0  ;;  %v4830_v58 = vmax.bf16 %v4766_v57, %v4702_v53  ;;  %v6735_v36 = vadd.f32 %v3854_v8, %v9476_v25 }
 0x3d9   :  { %v6736_v20 = vadd.f32 %v3856_v28, %v9472_v43  ;;  %v3858_v2 = vpop.f32.mrb[119].mxu0  ;;  %v9687_v53 = vrot.slane %v9466_v7, %v10299_v32  ;;  %v5894_v7 = vld [vmem:[%s10112_s7 + $0x58] sm:$0xff] }
 0x3da   :  { %v6737_v61 = vadd.f32 %v3858_v2, %v9476_v25  ;;  %5393 = vmatprep.mubr.bf16.mxu0 %v4830_v58 }
 0x3db   :  { %v4705_v54 = vpack.c.bf16 %v6736_v20, %v6734_v56  ;;  %5394 = vmatmul.mubr.bf16.gmra.mrb[176].mxu0 %v4829_v59 }
 0x3dc   :  { %v4706_v60 = vpack.c.bf16 %v6737_v61, %v6735_v36  ;;  %v5893_v61 = vld [vmem:[%s10112_s7 + $0x50] sm:$0xff] }
 0x3dd   :  { %v4769_v39 = vmul.bf16 1045249613, %v4705_v54  ;;  %5967 = vperm.xlu0 %7332, %v5893_v61  }
 0x3de   :  { %v4770_v17 = vmul.bf16 1045249613, %v4706_v60  ;;  %v3862_v30 = vpop.f32.mrb[120].mxu0 }
 0x3df   :  { %v3864_v37 = vpop.f32.mrb[121].mxu0  ;;  %v6738_v62 = vadd.f32 %v3862_v30, %v9472_v43  ;;  %v4833_v50 = vmax.bf16 %v4769_v39, %v4705_v54  ;;  %v5895_v39 = vld [vmem:[%s10112_s7 + $0x60] sm:$0xff]  ;;  %v5904_v30 = vld [vmem:[%s10112_s7 + $0xa8] sm:$0xff] }
 0x3e0   :  { %v3866_v34 = vpop.f32.mrb[122].mxu0  ;;  %v4834_v47 = vmax.bf16 %v4770_v17, %v4706_v60  ;;  %v6739_v31 = vadd.f32 %v3864_v37, %v9476_v25 }
 0x3e1   :  { %v6740_v55 = vadd.f32 %v3866_v34, %v9472_v43  ;;  %v3868_v4 = vpop.f32.mrb[123].mxu0  ;;  %6022 = vperm.xlu0 %7332, %v5904_v30  }
 0x3e2   :  { %v6741_v24 = vadd.f32 %v3868_v4, %v9476_v25  ;;  %5403 = vmatprep.mubr.bf16.mxu0 %v4834_v47 }
 0x3e3   :  { %v4709_v6 = vpack.c.bf16 %v6740_v55, %v6738_v62  ;;  %5404 = vmatmul.mubr.bf16.gmra.mrb[180].mxu0 %v4833_v50 }
 0x3e4   :  { %v4710_v13 = vpack.c.bf16 %v6741_v24, %v6739_v31  ;;  %v5896_v24 = vld [vmem:[%s10112_s7 + $0x68] sm:$0xff] }
 0x3e5   :  { %v4773_v45 = vmul.bf16 1045249613, %v4709_v6 }
 0x3e6   :  { %v4774_v22 = vmul.bf16 1045249613, %v4710_v13  ;;  %v3872_v23 = vpop.f32.mrb[124].mxu0 }
 0x3e7   :  { %v3874_v18 = vpop.f32.mrb[125].mxu0  ;;  %v6742_v41 = vadd.f32 %v3872_v23, %v9472_v43  ;;  %v4837_v12 = vmax.bf16 %v4773_v45, %v4709_v6 }
 0x3e8   :  { %v3876_v29 = vpop.f32.mrb[126].mxu0  ;;  %v4838_v16 = vmax.bf16 %v4774_v22, %v4710_v13  ;;  %v6743_v44 = vadd.f32 %v3874_v18, %v9476_v25  ;;  %v5906_v13 = vld [vmem:[%s10112_s7 + $0xb8] sm:$0xff] }
 0x3e9   :  { %v6744_v9 = vadd.f32 %v3876_v29, %v9472_v43  ;;  %v3878_v14 = vpop.f32.mrb[127].mxu0  ;;  %v5884_v43 = vld [vmem:[%s10112_s7 + $0x8] sm:$0xff]  ;;  %v5897_v29 = vld [vmem:[%s10112_s7 + $0x70] sm:$0xff]  ;;  %6032 = vperm.xlu0 %7332, %v5906_v13  }
 0x3ea   :  { %v6745_v52 = vadd.f32 %v3878_v14, %v9476_v25  ;;  %5413 = vmatprep.mubr.bf16.mxu0 %v4838_v16  ;;  %5922 = vperm.xlu1 %7331, %v5884_v43   ;;  %v5885_v25 = vld [vmem:[%s10112_s7 + $0x10] sm:$0xff] }
 0x3eb   :  { %v4713_v27 = vpack.c.bf16 %v6744_v9, %v6742_v41  ;;  %5414 = vmatmul.mubr.bf16.gmra.mrb[184].mxu0 %v4837_v12  ;;  %v5908_v41 = vld [vmem:[%s10112_s7 + $0xc8] sm:$0xff] }
 0x3ec   :  { %v4714_v19 = vpack.c.bf16 %v6745_v52, %v6743_v44 }
 0x3ed   :  { %v4777_v40 = vmul.bf16 1045249613, %v4713_v27  ;;  %6042 = vperm.xlu0 %7332, %v5908_v41   ;;  %v5905_v41 = vld [vmem:[%s10112_s7 + $0xb0] sm:$0xff] }
 0x3ee   :  { %v4778_v63 = vmul.bf16 1045249613, %v4714_v19  ;;  %5927 = vperm.xlu1 %7331, %v5885_v25  }
 0x3ef   :  { %v4841_v33 = vmax.bf16 %v4777_v40, %v4713_v27  ;;  %v5898_v40 = vld [vmem:[%s10112_s7 + $0x78] sm:$0xff] }
 0x3f0   :  { %v4842_v21 = vmax.bf16 %v4778_v63, %v4714_v19 }
 0x3f2   :  { %5423 = vmatprep.mubr.bf16.mxu0 %v4842_v21  ;;  %5932 = vperm.xlu1 %7331, %v5886_v0   ;;  %v5910_v21 = vld [vmem:[%s10112_s7 + $0xd8] sm:$0xff] }
 0x3f3   :  { %5424 = vmatmul.mubr.bf16.gmra.mrb[188].mxu0 %v4841_v33  ;;  %6052 = vperm.xlu0 %7332, %v5910_v21  }
 0x3f6   :  { %5937 = vperm.xlu1 %7331, %v5887_v49   ;;  %v5899_v49 = vld [vmem:[%s10112_s7 + $0x80] sm:$0xff] }
 0x3fa   :  { %5942 = vperm.xlu1 %7331, %v5888_v38  }
 0x3fe   :  { %5947 = vperm.xlu1 %7331, %v5889_v48   ;;  %v5912_v48 = vld [vmem:[%s10112_s7 + $0xe8] sm:$0xff] }
 0x3ff   :  { %6062 = vperm.xlu0 %7332, %v5912_v48  }
 0x402   :  { %5952 = vperm.xlu1 %7331, %v5890_v35  }
 0x406   :  { %5957 = vperm.xlu1 %7331, %v5891_v51  }
 0x40a   :  { %5962 = vperm.xlu1 %7331, %v5892_v5  }
 0x40e   :  { %v4494_v3 = vpop.f32.mrb[192].mxu1  ;;  %5972 = vperm.xlu1 %7331, %v5894_v7   ;;  %v5901_v7 = vld [vmem:[%s10112_s7 + $0x90] sm:$0xff] }
 0x40f   :  { %v4496_v57 = vpop.f32.mrb[193].mxu1  ;;  %v6746_v8 = vadd.f32 %v4494_v3, %v9682_v15 }
 0x410   :  { %v4498_v1 = vpop.f32.mrb[194].mxu1  ;;  %v6747_v56 = vadd.f32 %v4496_v57, %v9687_v53 }
 0x411   :  { %v6748_v28 = vadd.f32 %v4498_v1, %v9682_v15  ;;  %v4500_v58 = vpop.f32.mrb[195].mxu1 }
 0x412   :  { %v6749_v20 = vadd.f32 %v4500_v58, %v9687_v53  ;;  %5977 = vperm.xlu1 %7331, %v5895_v39  }
 0x413   :  { %v4655_v2 = vpack.c.bf16 %v6748_v28, %v6746_v8  ;;  %v5900_v8 = vld [vmem:[%s10112_s7 + $0x88] sm:$0xff] }
 0x414   :  { %v4656_v59 = vpack.c.bf16 %v6749_v20, %v6747_v56 }
 0x415   :  { %v4719_v36 = vmul.bf16 1045249613, %v4655_v2 }
 0x416   :  { %v4720_v54 = vmul.bf16 1045249613, %v4656_v59  ;;  %v4504_v60 = vpop.f32.mrb[196].mxu1  ;;  %5982 = vperm.xlu1 %7331, %v5896_v24  }
 0x417   :  { %v4506_v17 = vpop.f32.mrb[197].mxu1  ;;  %v4783_v47 = vmax.bf16 %v4719_v36, %v4655_v2  ;;  %v6750_v62 = vadd.f32 %v4504_v60, %v9682_v15 }
 0x418   :  { %v4508_v37 = vpop.f32.mrb[198].mxu1  ;;  %v4784_v34 = vmax.bf16 %v4720_v54, %v4656_v59  ;;  %v6751_v50 = vadd.f32 %v4506_v17, %v9687_v53 }
 0x419   :  { %v6752_v55 = vadd.f32 %v4508_v37, %v9682_v15  ;;  %v4510_v4 = vpop.f32.mrb[199].mxu1 }
 0x41a   :  { %v6753_v31 = vadd.f32 %v4510_v4, %v9687_v53  ;;  %5466 = vmatprep.mubr.bf16.mxu0 %v4784_v34  ;;  %5987 = vperm.xlu1 %7331, %v5897_v29   ;;  %v5902_v34 = vld [vmem:[%s10112_s7 + $0x98] sm:$0xff] }
 0x41b   :  { %v4659_v6 = vpack.c.bf16 %v6752_v55, %v6750_v62  ;;  %5467 = vmatmul.mubr.bf16.vlgmr.msra.gmra.mrb[128].mxu0 %v4783_v47 }
 0x41c   :  { %v4660_v45 = vpack.c.bf16 %v6753_v31, %v6751_v50  ;;  %v5903_v31 = vld [vmem:[%s10112_s7 + $0xa0] sm:$0xff] }
 0x41d   :  { %v4723_v22 = vmul.bf16 1045249613, %v4659_v6 }
 0x41e   :  { %v4724_v23 = vmul.bf16 1045249613, %v4660_v45  ;;  %v4514_v18 = vpop.f32.mrb[200].mxu1  ;;  %5992 = vperm.xlu1 %7331, %v5898_v40  }
 0x41f   :  { %v4516_v16 = vpop.f32.mrb[201].mxu1  ;;  %v6754_v12 = vadd.f32 %v4514_v18, %v9682_v15  ;;  %v4787_v27 = vmax.bf16 %v4723_v22, %v4659_v6 }
 0x420   :  { %v4518_v9 = vpop.f32.mrb[202].mxu1  ;;  %v4788_v14 = vmax.bf16 %v4724_v23, %v4660_v45  ;;  %v6755_v19 = vadd.f32 %v4516_v16, %v9687_v53 }
 0x421   :  { %v6756_v44 = vadd.f32 %v4518_v9, %v9682_v15  ;;  %v4520_v52 = vpop.f32.mrb[203].mxu1 }
 0x422   :  { %v6757_v42 = vadd.f32 %v4520_v52, %v9687_v53  ;;  %5476 = vmatprep.mubr.bf16.mxu0 %v4788_v14  ;;  %5997 = vperm.xlu1 %7331, %v5899_v49   ;;  %v5909_v49 = vld [vmem:[%s10112_s7 + $0xd0] sm:$0xff] }
 0x423   :  { %v4663_v63 = vpack.c.bf16 %v6756_v44, %v6754_v12  ;;  %5477 = vmatmul.mubr.bf16.gmra.mrb[132].mxu0 %v4787_v27  ;;  %v5907_v27 = vld [vmem:[%s10112_s7 + $0xc0] sm:$0xff] }
 0x424   :  { %v4664_v43 = vpack.c.bf16 %v6757_v42, %v6755_v19 }
 0x425   :  { %v4727_v33 = vmul.bf16 1045249613, %v4663_v63 }
 0x426   :  { %v4728_v25 = vmul.bf16 1045249613, %v4664_v43  ;;  %v4524_v0 = vpop.f32.mrb[204].mxu1  ;;  %6002 = vperm.xlu1 %7331, %v5900_v8  }
 0x427   :  { %v4526_v38 = vpop.f32.mrb[205].mxu1  ;;  %v6758_v11 = vadd.f32 %v4524_v0, %v9682_v15  ;;  %v4791_v5 = vmax.bf16 %v4727_v33, %v4663_v63 }
 0x428   :  { %v4528_v35 = vpop.f32.mrb[206].mxu1  ;;  %v4792_v51 = vmax.bf16 %v4728_v25, %v4664_v43  ;;  %v6759_v57 = vadd.f32 %v4526_v38, %v9687_v53 }
 0x429   :  { %v6760_v3 = vadd.f32 %v4528_v35, %v9682_v15  ;;  %v4530_v32 = vpop.f32.mrb[207].mxu1 }
 0x42a   :  { %v6761_v1 = vadd.f32 %v4530_v32, %v9687_v53  ;;  %5486 = vmatprep.mubr.bf16.mxu0 %v4792_v51  ;;  %6007 = vperm.xlu1 %7331, %v5901_v7  }
 0x42b   :  { %v4667_v28 = vpack.c.bf16 %v6760_v3, %v6758_v11  ;;  %5487 = vmatmul.mubr.bf16.gmra.mrb[136].mxu0 %v4791_v5  ;;  %v5911_v3 = vld [vmem:[%s10112_s7 + $0xe0] sm:$0xff] }
 0x42c   :  { %v4668_v58 = vpack.c.bf16 %v6761_v1, %v6759_v57 }
 0x42d   :  { %v4731_v56 = vmul.bf16 1045249613, %v4667_v28 }
 0x42e   :  { %v4732_v20 = vmul.bf16 1045249613, %v4668_v58  ;;  %v4534_v2 = vpop.f32.mrb[208].mxu1  ;;  %6012 = vperm.xlu1 %7331, %v5902_v34  }
 0x42f   :  { %v4536_v59 = vpop.f32.mrb[209].mxu1  ;;  %v6762_v54 = vadd.f32 %v4534_v2, %v9682_v15  ;;  %v4795_v17 = vmax.bf16 %v4731_v56, %v4667_v28  ;;  %v5913_v2 = vld [vmem:[%s10112_s7 + $0xf0] sm:$0xff] }
 0x430   :  { %v4538_v36 = vpop.f32.mrb[210].mxu1  ;;  %v4796_v61 = vmax.bf16 %v4732_v20, %v4668_v58  ;;  %v6763_v30 = vadd.f32 %v4536_v59, %v9687_v53 }
 0x431   :  { %v6764_v60 = vadd.f32 %v4538_v36, %v9682_v15  ;;  %v4540_v39 = vpop.f32.mrb[211].mxu1 }
 0x432   :  { %v6765_v37 = vadd.f32 %v4540_v39, %v9687_v53  ;;  %5496 = vmatprep.mubr.bf16.mxu0 %v4796_v61  ;;  %6017 = vperm.xlu1 %7331, %v5903_v31  }
 0x433   :  { %v4671_v47 = vpack.c.bf16 %v6764_v60, %v6762_v54  ;;  %5497 = vmatmul.mubr.bf16.gmra.mrb[140].mxu0 %v4795_v17 }
 0x434   :  { %v4672_v62 = vpack.c.bf16 %v6765_v37, %v6763_v30 }
 0x435   :  { %v4735_v55 = vmul.bf16 1045249613, %v4671_v47 }
 0x436   :  { %v4736_v4 = vmul.bf16 1045249613, %v4672_v62  ;;  %v4544_v50 = vpop.f32.mrb[212].mxu1  ;;  %6027 = vperm.xlu1 %7331, %v5905_v41  }
 0x437   :  { %v4546_v24 = vpop.f32.mrb[213].mxu1  ;;  %v6766_v45 = vadd.f32 %v4544_v50, %v9682_v15  ;;  %v4799_v18 = vmax.bf16 %v4735_v55, %v4671_v47 }
 0x438   :  { %v4548_v6 = vpop.f32.mrb[214].mxu1  ;;  %v4800_v13 = vmax.bf16 %v4736_v4, %v4672_v62  ;;  %v6767_v29 = vadd.f32 %v4546_v24, %v9687_v53 }
 0x439   :  { %v6768_v22 = vadd.f32 %v4548_v6, %v9682_v15  ;;  %v4550_v23 = vpop.f32.mrb[215].mxu1 }
 0x43a   :  { %v6769_v16 = vadd.f32 %v4550_v23, %v9687_v53  ;;  %5506 = vmatprep.mubr.bf16.mxu0 %v4800_v13  ;;  %6037 = vperm.xlu1 %7331, %v5907_v27  }
 0x43b   :  { %v4675_v9 = vpack.c.bf16 %v6768_v22, %v6766_v45  ;;  %5507 = vmatmul.mubr.bf16.gmra.mrb[144].mxu0 %v4799_v18 }
 0x43c   :  { %v4676_v14 = vpack.c.bf16 %v6769_v16, %v6767_v29 }
 0x43d   :  { %v4739_v12 = vmul.bf16 1045249613, %v4675_v9 }
 0x43e   :  { %v4740_v44 = vmul.bf16 1045249613, %v4676_v14  ;;  %v4554_v52 = vpop.f32.mrb[216].mxu1  ;;  %6047 = vperm.xlu1 %7331, %v5909_v49  }
 0x43f   :  { %v4556_v19 = vpop.f32.mrb[217].mxu1  ;;  %v6770_v63 = vadd.f32 %v4554_v52, %v9682_v15  ;;  %v4803_v33 = vmax.bf16 %v4739_v12, %v4675_v9 }
 0x440   :  { %v4558_v42 = vpop.f32.mrb[218].mxu1  ;;  %v4804_v40 = vmax.bf16 %v4740_v44, %v4676_v14  ;;  %v6771_v25 = vadd.f32 %v4556_v19, %v9687_v53 }
 0x441   :  { %v6772_v21 = vadd.f32 %v4558_v42, %v9682_v15  ;;  %v4560_v43 = vpop.f32.mrb[219].mxu1 }
 0x442   :  { %v6773_v0 = vadd.f32 %v4560_v43, %v9687_v53  ;;  %5516 = vmatprep.mubr.bf16.mxu0 %v4804_v40  ;;  %6057 = vperm.xlu1 %7331, %v5911_v3  }
 0x443   :  { %v4679_v38 = vpack.c.bf16 %v6772_v21, %v6770_v63  ;;  %5517 = vmatmul.mubr.bf16.gmra.mrb[148].mxu0 %v4803_v33 }
 0x444   :  { %v4680_v48 = vpack.c.bf16 %v6773_v0, %v6771_v25 }
 0x445   :  { %v4743_v35 = vmul.bf16 1045249613, %v4679_v38 }
 0x446   :  { %v4744_v51 = vmul.bf16 1045249613, %v4680_v48  ;;  %v4564_v11 = vpop.f32.mrb[220].mxu1  ;;  %6067 = vperm.xlu1 %7331, %v5913_v2  }
 0x447   :  { %v4566_v32 = vpop.f32.mrb[221].mxu1  ;;  %v6774_v1 = vadd.f32 %v4564_v11, %v9682_v15  ;;  %v4807_v58 = vmax.bf16 %v4743_v35, %v4679_v38 }
 0x448   :  { %v4568_v5 = vpop.f32.mrb[222].mxu1  ;;  %v4808_v57 = vmax.bf16 %v4744_v51, %v4680_v48  ;;  %v6775_v56 = vadd.f32 %v4566_v32, %v9687_v53 }
 0x449   :  { %v6776_v8 = vadd.f32 %v4568_v5, %v9682_v15  ;;  %v4570_v28 = vpop.f32.mrb[223].mxu1 }
 0x44a   :  { %v6777_v20 = vadd.f32 %v4570_v28, %v9687_v53  ;;  %5526 = vmatprep.mubr.bf16.mxu0 %v4808_v57 }
 0x44b   :  { %v4683_v7 = vpack.c.bf16 %v6776_v8, %v6774_v1  ;;  %5527 = vmatmul.mubr.bf16.gmra.mrb[152].mxu0 %v4807_v58 }
 0x44c   :  { %v4684_v59 = vpack.c.bf16 %v6777_v20, %v6775_v56 }
 0x44d   :  { %v4747_v36 = vmul.bf16 1045249613, %v4683_v7 }
 0x44e   :  { %v4748_v61 = vmul.bf16 1045249613, %v4684_v59  ;;  %v4574_v54 = vpop.f32.mrb[224].mxu1 }
 0x44f   :  { %v4576_v60 = vpop.f32.mrb[225].mxu1  ;;  %v6778_v30 = vadd.f32 %v4574_v54, %v9682_v15  ;;  %v4811_v47 = vmax.bf16 %v4747_v36, %v4683_v7 }
 0x450   :  { %v4578_v39 = vpop.f32.mrb[226].mxu1  ;;  %v4812_v17 = vmax.bf16 %v4748_v61, %v4684_v59  ;;  %v6779_v62 = vadd.f32 %v4576_v60, %v9687_v53 }
 0x451   :  { %v6780_v37 = vadd.f32 %v4578_v39, %v9682_v15  ;;  %v4580_v34 = vpop.f32.mrb[227].mxu1 }
 0x452   :  { %v6781_v55 = vadd.f32 %v4580_v34, %v9687_v53  ;;  %5536 = vmatprep.mubr.bf16.mxu0 %v4812_v17 }
 0x453   :  { %v4687_v4 = vpack.c.bf16 %v6780_v37, %v6778_v30  ;;  %5537 = vmatmul.mubr.bf16.gmra.mrb[156].mxu0 %v4811_v47 }
 0x454   :  { %v4688_v50 = vpack.c.bf16 %v6781_v55, %v6779_v62 }
 0x455   :  { %v4751_v31 = vmul.bf16 1045249613, %v4687_v4 }
 0x456   :  { %v4752_v24 = vmul.bf16 1045249613, %v4688_v50  ;;  %v4584_v6 = vpop.f32.mrb[228].mxu1 }
 0x457   :  { %v4586_v13 = vpop.f32.mrb[229].mxu1  ;;  %v6782_v23 = vadd.f32 %v4584_v6, %v9682_v15  ;;  %v4815_v16 = vmax.bf16 %v4751_v31, %v4687_v4 }
 0x458   :  { %v4588_v45 = vpop.f32.mrb[230].mxu1  ;;  %v4816_v22 = vmax.bf16 %v4752_v24, %v4688_v50  ;;  %v6783_v41 = vadd.f32 %v4586_v13, %v9687_v53 }
 0x459   :  { %v6784_v18 = vadd.f32 %v4588_v45, %v9682_v15  ;;  %v4590_v29 = vpop.f32.mrb[231].mxu1 }
 0x45a   :  { %v6785_v9 = vadd.f32 %v4590_v29, %v9687_v53  ;;  %5546 = vmatprep.mubr.bf16.mxu0 %v4816_v22 }
 0x45b   :  { %v4691_v14 = vpack.c.bf16 %v6784_v18, %v6782_v23  ;;  %5547 = vmatmul.mubr.bf16.gmra.mrb[160].mxu0 %v4815_v16 }
 0x45c   :  { %v4692_v12 = vpack.c.bf16 %v6785_v9, %v6783_v41 }
 0x45d   :  { %v4755_v44 = vmul.bf16 1045249613, %v4691_v14 }
 0x45e   :  { %v4756_v52 = vmul.bf16 1045249613, %v4692_v12  ;;  %v4594_v27 = vpop.f32.mrb[232].mxu1 }
 0x45f   :  { %v4596_v19 = vpop.f32.mrb[233].mxu1  ;;  %v6786_v63 = vadd.f32 %v4594_v27, %v9682_v15  ;;  %v4819_v33 = vmax.bf16 %v4755_v44, %v4691_v14 }
 0x460   :  { %v4598_v42 = vpop.f32.mrb[234].mxu1  ;;  %v4820_v40 = vmax.bf16 %v4756_v52, %v4692_v12  ;;  %v6787_v25 = vadd.f32 %v4596_v19, %v9687_v53 }
 0x461   :  { %v6788_v21 = vadd.f32 %v4598_v42, %v9682_v15  ;;  %v4600_v43 = vpop.f32.mrb[235].mxu1 }
 0x462   :  { %v6789_v0 = vadd.f32 %v4600_v43, %v9687_v53  ;;  %5556 = vmatprep.mubr.bf16.mxu0 %v4820_v40 }
 0x463   :  { %v4695_v49 = vpack.c.bf16 %v6788_v21, %v6786_v63  ;;  %5557 = vmatmul.mubr.bf16.gmra.mrb[164].mxu0 %v4819_v33 }
 0x464   :  { %v4696_v38 = vpack.c.bf16 %v6789_v0, %v6787_v25 }
 0x465   :  { %v4759_v48 = vmul.bf16 1045249613, %v4695_v49 }
 0x466   :  { %v4760_v35 = vmul.bf16 1045249613, %v4696_v38  ;;  %v4604_v51 = vpop.f32.mrb[236].mxu1 }
 0x467   :  { %v4606_v11 = vpop.f32.mrb[237].mxu1  ;;  %v6790_v5 = vadd.f32 %v4604_v51, %v9682_v15  ;;  %v4823_v8 = vmax.bf16 %v4759_v48, %v4695_v49 }
 0x468   :  { %v4608_v3 = vpop.f32.mrb[238].mxu1  ;;  %v4824_v32 = vmax.bf16 %v4760_v35, %v4696_v38  ;;  %v6791_v28 = vadd.f32 %v4606_v11, %v9687_v53 }
 0x469   :  { %v6792_v57 = vadd.f32 %v4608_v3, %v9682_v15  ;;  %v4610_v1 = vpop.f32.mrb[239].mxu1 }
 0x46a   :  { %v6793_v58 = vadd.f32 %v4610_v1, %v9687_v53  ;;  %5566 = vmatprep.mubr.bf16.mxu0 %v4824_v32 }
 0x46b   :  { %v4699_v56 = vpack.c.bf16 %v6792_v57, %v6790_v5  ;;  %5567 = vmatmul.mubr.bf16.gmra.mrb[168].mxu0 %v4823_v8 }
 0x46c   :  { %v4700_v20 = vpack.c.bf16 %v6793_v58, %v6791_v28 }
 0x46d   :  { %v4763_v2 = vmul.bf16 1045249613, %v4699_v56 }
 0x46e   :  { %v4764_v7 = vmul.bf16 1045249613, %v4700_v20  ;;  %v4614_v59 = vpop.f32.mrb[240].mxu1 }
 0x46f   :  { %v4616_v36 = vpop.f32.mrb[241].mxu1  ;;  %v6794_v60 = vadd.f32 %v4614_v59, %v9682_v15  ;;  %v4827_v30 = vmax.bf16 %v4763_v2, %v4699_v56 }
 0x470   :  { %v4618_v61 = vpop.f32.mrb[242].mxu1  ;;  %v4828_v54 = vmax.bf16 %v4764_v7, %v4700_v20  ;;  %v6795_v37 = vadd.f32 %v4616_v36, %v9687_v53  ;;  %v9819_v7 = vpop.permute.xlu1 %5917 }
 0x471   :  { %v6796_v39 = vadd.f32 %v4618_v61, %v9682_v15  ;;  %v4620_v17 = vpop.f32.mrb[243].mxu1 }
 0x472   :  { %v6797_v34 = vadd.f32 %v4620_v17, %v9687_v53  ;;  %5576 = vmatprep.mubr.bf16.mxu0 %v4828_v54 }
 0x473   :  { %v4703_v47 = vpack.c.bf16 %v6796_v39, %v6794_v60  ;;  %5577 = vmatmul.mubr.bf16.gmra.mrb[172].mxu0 %v4827_v30 }
 0x474   :  { %v4704_v62 = vpack.c.bf16 %v6797_v34, %v6795_v37 }
 0x475   :  { %v4767_v55 = vmul.bf16 1045249613, %v4703_v47 }
 0x476   :  { %v4768_v4 = vmul.bf16 1045249613, %v4704_v62  ;;  %v4624_v50 = vpop.f32.mrb[244].mxu1 }
 0x477   :  { %v4626_v31 = vpop.f32.mrb[245].mxu1  ;;  %v6798_v13 = vadd.f32 %v4624_v50, %v9682_v15  ;;  %v4831_v23 = vmax.bf16 %v4767_v55, %v4703_v47 }
 0x478   :  { %v4628_v24 = vpop.f32.mrb[246].mxu1  ;;  %v4832_v6 = vmax.bf16 %v4768_v4, %v4704_v62  ;;  %v6799_v18 = vadd.f32 %v4626_v31, %v9687_v53 }
 0x479   :  { %v6800_v45 = vadd.f32 %v4628_v24, %v9682_v15  ;;  %v4630_v22 = vpop.f32.mrb[247].mxu1 }
 0x47a   :  { %v6801_v29 = vadd.f32 %v4630_v22, %v9687_v53  ;;  %5586 = vmatprep.mubr.bf16.mxu0 %v4832_v6 }
 0x47b   :  { %v4707_v16 = vpack.c.bf16 %v6800_v45, %v6798_v13  ;;  %5587 = vmatmul.mubr.bf16.gmra.mrb[176].mxu0 %v4831_v23 }
 0x47c   :  { %v4708_v41 = vpack.c.bf16 %v6801_v29, %v6799_v18 }
 0x47d   :  { %v4771_v9 = vmul.bf16 1045249613, %v4707_v16 }
 0x47e   :  { %v4772_v14 = vmul.bf16 1045249613, %v4708_v41  ;;  %v4634_v12 = vpop.f32.mrb[248].mxu1 }
 0x47f   :  { %v4636_v44 = vpop.f32.mrb[249].mxu1  ;;  %v6802_v19 = vadd.f32 %v4634_v12, %v9682_v15  ;;  %v4835_v63 = vmax.bf16 %v4771_v9, %v4707_v16 }
 0x480   :  { %v4638_v52 = vpop.f32.mrb[250].mxu1  ;;  %v4836_v27 = vmax.bf16 %v4772_v14, %v4708_v41  ;;  %v6803_v21 = vadd.f32 %v4636_v44, %v9687_v53 }
 0x481   :  { %v6804_v42 = vadd.f32 %v4638_v52, %v9682_v15  ;;  %v4640_v40 = vpop.f32.mrb[251].mxu1 }
 0x482   :  { %v6805_v43 = vadd.f32 %v4640_v40, %v9687_v53  ;;  %5596 = vmatprep.mubr.bf16.mxu0 %v4836_v27 }
 0x483   :  { %v4711_v33 = vpack.c.bf16 %v6804_v42, %v6802_v19  ;;  %5597 = vmatmul.mubr.bf16.gmra.mrb[180].mxu0 %v4835_v63 }
 0x484   :  { %v4712_v25 = vpack.c.bf16 %v6805_v43, %v6803_v21 }
 0x485   :  { %v4775_v0 = vmul.bf16 1045249613, %v4711_v33 }
 0x486   :  { %v4776_v49 = vmul.bf16 1045249613, %v4712_v25  ;;  %v4644_v38 = vpop.f32.mrb[252].mxu1 }
 0x487   :  { %v4646_v48 = vpop.f32.mrb[253].mxu1  ;;  %v6806_v11 = vadd.f32 %v4644_v38, %v9682_v15  ;;  %v4839_v5 = vmax.bf16 %v4775_v0, %v4711_v33 }
 0x488   :  { %v4648_v35 = vpop.f32.mrb[254].mxu1  ;;  %v4840_v51 = vmax.bf16 %v4776_v49, %v4712_v25  ;;  %v6807_v57 = vadd.f32 %v4646_v48, %v9687_v53 }
 0x489   :  { %v6808_v3 = vadd.f32 %v4648_v35, %v9682_v15  ;;  %v4650_v32 = vpop.f32.mrb[255].mxu1  ;;  %v4909_v15 = vld [vmem:[%s10111_s6] sm:$0x3] }
 0x48a   :  { %v6809_v1 = vadd.f32 %v4650_v32, %v9687_v53  ;;  %5606 = vmatprep.mubr.bf16.mxu0 %v4840_v51  ;;  %v9825_v59 = vrot.slane %v4909_v15, %v10295_v10  ;;  %v9827_v53 = vpop.permute.xlu1 %5922  ;;  %v9830_v36 = vrot.slane %v4909_v15, %v10296_v46 }
 0x48b   :  { %v4715_v8 = vpack.c.bf16 %v6808_v3, %v6806_v11  ;;  %5607 = vmatmul.mubr.bf16.gmra.mrb[184].mxu0 %v4839_v5 }
 0x48c   :  { %v4716_v28 = vpack.c.bf16 %v6809_v1, %v6807_v57 }
 0x48d   :  { %v4779_v58 = vmul.bf16 1045249613, %v4715_v8 }
 0x48e   :  { %v4780_v56 = vmul.bf16 1045249613, %v4716_v28  ;;  %v9835_v47 = vpop.permute.xlu1 %5927 }
 0x48f   :  { %v4843_v2 = vmax.bf16 %v4779_v58, %v4715_v8 }
 0x490   :  { %v4844_v20 = vmax.bf16 %v4780_v56, %v4716_v28 }
 0x492   :  { %5616 = vmatprep.mubr.bf16.mxu0 %v4844_v20  ;;  %v9839_v45 = vpop.permute.xlu1 %5932 }
 0x493   :  { %5617 = vmatmul.mubr.bf16.gmra.mrb[188].mxu0 %v4843_v2 }
 0x496   :  { %v9844_v19 = vpop.permute.xlu1 %5937 }
 0x49a   :  { %v9850_v3 = vpop.permute.xlu1 %5942 }
 0x49e   :  { %v9854_v15 = vpop.permute.xlu1 %5947 }
 0x4ee   :  { %v5468_v61 = vpop.f32.mrb[128].mxu0 }
 0x4ef   :  { %v6810_v54 = vadd.f32 %v5468_v61, %v9825_v59  ;;  %v5470_v60 = vpop.f32.mrb[129].mxu0 }
 0x4f0   :  { %v6811_v39 = vadd.f32 %v5470_v60, %v9830_v36  ;;  %v5472_v17 = vpop.f32.mrb[130].mxu0 }
 0x4f1   :  { %v5627_v30 = vmul.f32 0.2, %v6810_v54  ;;  %v6812_v37 = vadd.f32 %v5472_v17, %v9825_v59  ;;  %v5474_v34 = vpop.f32.mrb[131].mxu0 }
 0x4f2   :  { %v5628_v10 = vmul.f32 0.2, %v6811_v39  ;;  %v6813_v62 = vadd.f32 %v5474_v34, %v9830_v36 }
 0x4f3   :  { %v5691_v55 = vmax.f32 %v6810_v54, %v5627_v30  ;;  %v5629_v4 = vmul.f32 0.2, %v6812_v37 }
 0x4f4   :  { %v5692_v46 = vmax.f32 %v6811_v39, %v5628_v10  ;;  %v5630_v50 = vmul.f32 0.2, %v6813_v62 }
 0x4f5   :  { %5755 = vxpose.xlu0.b32.start [1/16] %v5691_v55, 128  ;;  %v5693_v24 = vmax.f32 %v6812_v37, %v5629_v4  ;;  %v9858_v55 = vpop.permute.xlu1 %5952 }
 0x4f6   :  { %v5478_v31 = vpop.f32.mrb[132].mxu0  ;;  %5787 = vxpose.xlu1.b32.start [1/16] %v5692_v46, 128  ;;  %v5694_v22 = vmax.f32 %v6813_v62, %v5630_v50 }
 0x4f7   :  { %v6814_v6 = vadd.f32 %v5478_v31, %v9825_v59  ;;  %v5480_v13 = vpop.f32.mrb[133].mxu0 }
 0x4f8   :  { %v6815_v23 = vadd.f32 %v5480_v13, %v9830_v36  ;;  %v5482_v18 = vpop.f32.mrb[134].mxu0 }
 0x4f9   :  { %v5631_v29 = vmul.f32 0.2, %v6814_v6  ;;  %v6816_v16 = vadd.f32 %v5482_v18, %v9825_v59  ;;  %v5484_v41 = vpop.f32.mrb[135].mxu0  ;;  %5756 = vxpose.xlu0.b32.cont [2/16] %v5693_v24, 128 }
 0x4fa   :  { %v5632_v9 = vmul.f32 0.2, %v6815_v23  ;;  %v6817_v14 = vadd.f32 %v5484_v41, %v9830_v36  ;;  %5788 = vxpose.xlu1.b32.cont [2/16] %v5694_v22, 128 }
 0x4fb   :  { %v5695_v12 = vmax.f32 %v6814_v6, %v5631_v29  ;;  %v5633_v44 = vmul.f32 0.2, %v6816_v16 }
 0x4fc   :  { %v5696_v52 = vmax.f32 %v6815_v23, %v5632_v9  ;;  %v5634_v27 = vmul.f32 0.2, %v6817_v14 }
 0x4fd   :  { %5757 = vxpose.xlu0.b32.cont [3/16] %v5695_v12, 128  ;;  %v5697_v40 = vmax.f32 %v6816_v16, %v5633_v44 }
 0x4fe   :  { %v5488_v42 = vpop.f32.mrb[136].mxu0  ;;  %5789 = vxpose.xlu1.b32.cont [3/16] %v5696_v52, 128  ;;  %v5698_v43 = vmax.f32 %v6817_v14, %v5634_v27  ;;  %v9864_v14 = vpop.permute.xlu1 %5957 }
 0x4ff   :  { %v6818_v63 = vadd.f32 %v5488_v42, %v9825_v59  ;;  %v5490_v21 = vpop.f32.mrb[137].mxu0 }
 0x500   :  { %v6819_v33 = vadd.f32 %v5490_v21, %v9830_v36  ;;  %v5492_v25 = vpop.f32.mrb[138].mxu0 }
 0x501   :  { %v5635_v0 = vmul.f32 0.2, %v6818_v63  ;;  %v6820_v49 = vadd.f32 %v5492_v25, %v9825_v59  ;;  %v5494_v38 = vpop.f32.mrb[139].mxu0  ;;  %5758 = vxpose.xlu0.b32.cont [4/16] %v5697_v40, 128 }
 0x502   :  { %v5636_v48 = vmul.f32 0.2, %v6819_v33  ;;  %v6821_v35 = vadd.f32 %v5494_v38, %v9830_v36  ;;  %5790 = vxpose.xlu1.b32.cont [4/16] %v5698_v43, 128 }
 0x503   :  { %v5699_v51 = vmax.f32 %v6818_v63, %v5635_v0  ;;  %v5637_v11 = vmul.f32 0.2, %v6820_v49 }
 0x504   :  { %v5700_v32 = vmax.f32 %v6819_v33, %v5636_v48  ;;  %v5638_v5 = vmul.f32 0.2, %v6821_v35 }
 0x505   :  { %5759 = vxpose.xlu0.b32.cont [5/16] %v5699_v51, 128  ;;  %v5701_v1 = vmax.f32 %v6820_v49, %v5637_v11  ;;  %v9870_v49 = vpop.permute.xlu1 %5962 }
 0x506   :  { %v5498_v57 = vpop.f32.mrb[140].mxu0  ;;  %5791 = vxpose.xlu1.b32.cont [5/16] %v5700_v32, 128  ;;  %v5702_v58 = vmax.f32 %v6821_v35, %v5638_v5 }
 0x507   :  { %v6822_v8 = vadd.f32 %v5498_v57, %v9825_v59  ;;  %v5500_v28 = vpop.f32.mrb[141].mxu0 }
 0x508   :  { %v6823_v56 = vadd.f32 %v5500_v28, %v9830_v36  ;;  %v5502_v20 = vpop.f32.mrb[142].mxu0 }
 0x509   :  { %v5639_v2 = vmul.f32 0.2, %v6822_v8  ;;  %v6824_v61 = vadd.f32 %v5502_v20, %v9825_v59  ;;  %v5504_v54 = vpop.f32.mrb[143].mxu0  ;;  %5760 = vxpose.xlu0.b32.cont [6/16] %v5701_v1, 128 }
 0x50a   :  { %v5640_v60 = vmul.f32 0.2, %v6823_v56  ;;  %v6825_v39 = vadd.f32 %v5504_v54, %v9830_v36  ;;  %5792 = vxpose.xlu1.b32.cont [6/16] %v5702_v58, 128  ;;  %v9874_v58 = vpop.permute.xlu1 %5972 }
 0x50b   :  { %v5703_v17 = vmax.f32 %v6822_v8, %v5639_v2  ;;  %v5641_v30 = vmul.f32 0.2, %v6824_v61 }
 0x50c   :  { %v5704_v37 = vmax.f32 %v6823_v56, %v5640_v60  ;;  %v5642_v34 = vmul.f32 0.2, %v6825_v39 }
 0x50d   :  { %5761 = vxpose.xlu0.b32.cont [7/16] %v5703_v17, 128  ;;  %v5705_v62 = vmax.f32 %v6824_v61, %v5641_v30 }
 0x50e   :  { %v5508_v10 = vpop.f32.mrb[144].mxu0  ;;  %5793 = vxpose.xlu1.b32.cont [7/16] %v5704_v37, 128  ;;  %v5706_v50 = vmax.f32 %v6825_v39, %v5642_v34  ;;  %v9878_v34 = vpop.permute.xlu1 %5977 }
 0x50f   :  { %v6826_v4 = vadd.f32 %v5508_v10, %v9825_v59  ;;  %v5510_v46 = vpop.f32.mrb[145].mxu0 }
 0x510   :  { %v6827_v31 = vadd.f32 %v5510_v46, %v9830_v36  ;;  %v5512_v24 = vpop.f32.mrb[146].mxu0 }
 0x511   :  { %v5643_v6 = vmul.f32 0.2, %v6826_v4  ;;  %v6828_v13 = vadd.f32 %v5512_v24, %v9825_v59  ;;  %v5514_v22 = vpop.f32.mrb[147].mxu0  ;;  %5762 = vxpose.xlu0.b32.cont [8/16] %v5705_v62, 128 }
 0x512   :  { %v5644_v23 = vmul.f32 0.2, %v6827_v31  ;;  %v6829_v18 = vadd.f32 %v5514_v22, %v9830_v36  ;;  %5794 = vxpose.xlu1.b32.cont [8/16] %v5706_v50, 128 }
 0x513   :  { %v5707_v29 = vmax.f32 %v6826_v4, %v5643_v6  ;;  %v5645_v16 = vmul.f32 0.2, %v6828_v13 }
 0x514   :  { %v5708_v41 = vmax.f32 %v6827_v31, %v5644_v23  ;;  %v5646_v9 = vmul.f32 0.2, %v6829_v18 }
 0x515   :  { %5763 = vxpose.xlu0.b32.cont [9/16] %v5707_v29, 128  ;;  %v5709_v44 = vmax.f32 %v6828_v13, %v5645_v16 }
 0x516   :  { %v5518_v12 = vpop.f32.mrb[148].mxu0  ;;  %5795 = vxpose.xlu1.b32.cont [9/16] %v5708_v41, 128  ;;  %v5710_v42 = vmax.f32 %v6829_v18, %v5646_v9  ;;  %v9884_v9 = vpop.permute.xlu1 %5982 }
 0x517   :  { %v6830_v52 = vadd.f32 %v5518_v12, %v9825_v59  ;;  %v5520_v27 = vpop.f32.mrb[149].mxu0 }
 0x518   :  { %v6831_v40 = vadd.f32 %v5520_v27, %v9830_v36  ;;  %v5522_v63 = vpop.f32.mrb[150].mxu0 }
 0x519   :  { %v5647_v21 = vmul.f32 0.2, %v6830_v52  ;;  %v6832_v43 = vadd.f32 %v5522_v63, %v9825_v59  ;;  %v5524_v33 = vpop.f32.mrb[151].mxu0  ;;  %5764 = vxpose.xlu0.b32.cont [10/16] %v5709_v44, 128 }
 0x51a   :  { %v5648_v25 = vmul.f32 0.2, %v6831_v40  ;;  %v6833_v0 = vadd.f32 %v5524_v33, %v9830_v36  ;;  %5796 = vxpose.xlu1.b32.cont [10/16] %v5710_v42, 128  ;;  %v9892_v33 = vpop.permute.xlu1 %5987 }
 0x51b   :  { %v5711_v38 = vmax.f32 %v6830_v52, %v5647_v21  ;;  %v5649_v48 = vmul.f32 0.2, %v6832_v43 }
 0x51c   :  { %v5712_v35 = vmax.f32 %v6831_v40, %v5648_v25  ;;  %v5650_v51 = vmul.f32 0.2, %v6833_v0 }
 0x51d   :  { %5765 = vxpose.xlu0.b32.cont [11/16] %v5711_v38, 128  ;;  %v5713_v32 = vmax.f32 %v6832_v43, %v5649_v48 }
 0x51e   :  { %v5528_v11 = vpop.f32.mrb[152].mxu0  ;;  %5797 = vxpose.xlu1.b32.cont [11/16] %v5712_v35, 128  ;;  %v5714_v1 = vmax.f32 %v6833_v0, %v5650_v51 }
 0x51f   :  { %v6834_v5 = vadd.f32 %v5528_v11, %v9825_v59  ;;  %v5530_v57 = vpop.f32.mrb[153].mxu0 }
 0x520   :  { %v6835_v8 = vadd.f32 %v5530_v57, %v9830_v36  ;;  %v5532_v28 = vpop.f32.mrb[154].mxu0 }
 0x521   :  { %v5651_v56 = vmul.f32 0.2, %v6834_v5  ;;  %v6836_v20 = vadd.f32 %v5532_v28, %v9825_v59  ;;  %v5534_v2 = vpop.f32.mrb[155].mxu0  ;;  %5766 = vxpose.xlu0.b32.cont [12/16] %v5713_v32, 128  ;;  %v9897_v32 = vpop.permute.xlu1 %5992 }
 0x522   :  { %v5652_v61 = vmul.f32 0.2, %v6835_v8  ;;  %v6837_v54 = vadd.f32 %v5534_v2, %v9830_v36  ;;  %5798 = vxpose.xlu1.b32.cont [12/16] %v5714_v1, 128 }
 0x523   :  { %v5715_v60 = vmax.f32 %v6834_v5, %v5651_v56  ;;  %v5653_v39 = vmul.f32 0.2, %v6836_v20 }
 0x524   :  { %v5716_v17 = vmax.f32 %v6835_v8, %v5652_v61  ;;  %v5654_v30 = vmul.f32 0.2, %v6837_v54 }
 0x525   :  { %5767 = vxpose.xlu0.b32.cont [13/16] %v5715_v60, 128  ;;  %v5717_v10 = vmax.f32 %v6836_v20, %v5653_v39  ;;  %v9902_v20 = vpop.permute.xlu1 %5997 }
 0x526   :  { %v5538_v37 = vpop.f32.mrb[156].mxu0  ;;  %5799 = vxpose.xlu1.b32.cont [13/16] %v5716_v17, 128  ;;  %v5718_v46 = vmax.f32 %v6837_v54, %v5654_v30 }
 0x527   :  { %v6838_v62 = vadd.f32 %v5538_v37, %v9825_v59  ;;  %v5540_v4 = vpop.f32.mrb[157].mxu0 }
 0x528   :  { %v6839_v50 = vadd.f32 %v5540_v4, %v9830_v36  ;;  %v5542_v31 = vpop.f32.mrb[158].mxu0 }
 0x529   :  { %v5655_v24 = vmul.f32 0.2, %v6838_v62  ;;  %v6840_v6 = vadd.f32 %v5542_v31, %v9825_v59  ;;  %v5544_v13 = vpop.f32.mrb[159].mxu0  ;;  %5768 = vxpose.xlu0.b32.cont [14/16] %v5717_v10, 128 }
 0x52a   :  { %v5656_v22 = vmul.f32 0.2, %v6839_v50  ;;  %v6841_v23 = vadd.f32 %v5544_v13, %v9830_v36  ;;  %5800 = vxpose.xlu1.b32.cont [14/16] %v5718_v46, 128 }
 0x52b   :  { %v5719_v18 = vmax.f32 %v6838_v62, %v5655_v24  ;;  %v5657_v29 = vmul.f32 0.2, %v6840_v6  ;;  %v9910_v62 = vpop.permute.xlu1 %6002 }
 0x52c   :  { %v5720_v16 = vmax.f32 %v6839_v50, %v5656_v22  ;;  %v5658_v41 = vmul.f32 0.2, %v6841_v23 }
 0x52d   :  { %5769 = vxpose.xlu0.b32.cont [15/16] %v5719_v18, 128  ;;  %v5721_v44 = vmax.f32 %v6840_v6, %v5657_v29 }
 0x52e   :  { %v5548_v12 = vpop.f32.mrb[160].mxu0  ;;  %5801 = vxpose.xlu1.b32.cont [15/16] %v5720_v16, 128  ;;  %v5722_v42 = vmax.f32 %v6841_v23, %v5658_v41  ;;  %v5914_v16 = vld [vmem:[%s10112_s7 + $0xf8] sm:$0xff] }
 0x52f   :  { %v6842_v52 = vadd.f32 %v5548_v12, %v9825_v59  ;;  %v9887_v27 = vpop.f32.mrb[161].mxu0  ;;  %v9918_v23 = vpop.permute.xlu1 %6007 }
 0x530   :  { %v5552_v40 = vpop.f32.mrb[162].mxu0 }
 0x531   :  { %v5659_v63 = vmul.f32 0.2, %v6842_v52  ;;  %v6844_v21 = vadd.f32 %v5552_v40, %v9825_v59  ;;  %v9890_v43 = vpop.f32.mrb[163].mxu0  ;;  %5770 = vxpose.xlu0.b32.end [16/16] %v5721_v44, 128 }
 0x532   :  { %5802 = vxpose.xlu1.b32.end [16/16] %v5722_v42, 128 }
 0x533   :  { %v5723_v25 = vmax.f32 %v6842_v52, %v5659_v63  ;;  %v5661_v0 = vmul.f32 0.2, %v6844_v21  ;;  %v9926_v40 = vpop.permute.xlu1 %6012 }
 0x535   :  { %5819 = vxpose.xlu0.b32.start [1/16] %v5723_v25, 128  ;;  %v5725_v48 = vmax.f32 %v6844_v21, %v5661_v0  ;;  %v9931_v0 = vpop.permute.xlu0 %5967 }
 0x536   :  { %v5558_v38 = vpop.f32.mrb[164].mxu0 }
 0x537   :  { %v6846_v35 = vadd.f32 %v5558_v38, %v9825_v59  ;;  %v9895_v51 = vpop.f32.mrb[165].mxu0 }
 0x538   :  { %v5562_v11 = vpop.f32.mrb[166].mxu0 }
 0x539   :  { %v5663_v5 = vmul.f32 0.2, %v6846_v35  ;;  %v6848_v57 = vadd.f32 %v5562_v11, %v9825_v59  ;;  %v9900_v1 = vpop.f32.mrb[167].mxu0  ;;  %5820 = vxpose.xlu0.b32.cont [2/16] %v5725_v48, 128  ;;  %v9933_v11 = vpop.permute.xlu1 %6017 }
 0x53b   :  { %v5727_v8 = vmax.f32 %v6846_v35, %v5663_v5  ;;  %v5665_v28 = vmul.f32 0.2, %v6848_v57 }
 0x53d   :  { %5821 = vxpose.xlu0.b32.cont [3/16] %v5727_v8, 128  ;;  %v5729_v2 = vmax.f32 %v6848_v57, %v5665_v28 }
 0x53e   :  { %v5568_v56 = vpop.f32.mrb[168].mxu0 }
 0x53f   :  { %v6850_v61 = vadd.f32 %v5568_v56, %v9825_v59  ;;  %v9905_v54 = vpop.f32.mrb[169].mxu0  ;;  %v9938_v56 = vpop.permute.xlu0 %6022 }
 0x540   :  { %v5572_v60 = vpop.f32.mrb[170].mxu0 }
 0x541   :  { %v5667_v39 = vmul.f32 0.2, %v6850_v61  ;;  %v6852_v17 = vadd.f32 %v5572_v60, %v9825_v59  ;;  %v9908_v30 = vpop.f32.mrb[171].mxu0  ;;  %5822 = vxpose.xlu0.b32.cont [4/16] %v5729_v2, 128 }
 0x543   :  { %v5731_v37 = vmax.f32 %v6850_v61, %v5667_v39  ;;  %v5669_v10 = vmul.f32 0.2, %v6852_v17 }
 0x545   :  { %5823 = vxpose.xlu0.b32.cont [5/16] %v5731_v37, 128  ;;  %v5733_v46 = vmax.f32 %v6852_v17, %v5669_v10  ;;  %v9943_v37 = vpop.permute.xlu1 %6027 }
 0x546   :  { %v5578_v4 = vpop.f32.mrb[172].mxu0 }
 0x547   :  { %v6854_v50 = vadd.f32 %v5578_v4, %v9825_v59  ;;  %v9913_v31 = vpop.f32.mrb[173].mxu0  ;;  %v9945_v4 = vpop.permute.xlu0 %6032 }
 0x548   :  { %v5582_v24 = vpop.f32.mrb[174].mxu0 }
 0x549   :  { %v5671_v6 = vmul.f32 0.2, %v6854_v50  ;;  %v6856_v13 = vadd.f32 %v5582_v24, %v9825_v59  ;;  %v9916_v22 = vpop.f32.mrb[175].mxu0  ;;  %5824 = vxpose.xlu0.b32.cont [6/16] %v5733_v46, 128 }
 0x54b   :  { %v5735_v18 = vmax.f32 %v6854_v50, %v5671_v6  ;;  %v5673_v29 = vmul.f32 0.2, %v6856_v13 }
 0x54d   :  { %5825 = vxpose.xlu0.b32.cont [7/16] %v5735_v18, 128  ;;  %v5737_v12 = vmax.f32 %v6856_v13, %v5673_v29 }
 0x54e   :  { %v5588_v41 = vpop.f32.mrb[176].mxu0 }
 0x54f   :  { %v6858_v44 = vadd.f32 %v5588_v41, %v9825_v59  ;;  %v9924_v52 = vpop.f32.mrb[177].mxu0 }
 0x550   :  { %v5592_v42 = vpop.f32.mrb[178].mxu0  ;;  %6072 = vperm.xlu1 %7331, %v5914_v16   ;;  %v9953_v16 = vpop.permute.xlu1 %6037 }
 0x551   :  { %v5675_v63 = vmul.f32 0.2, %v6858_v44  ;;  %v6860_v21 = vadd.f32 %v5592_v42, %v9825_v59  ;;  %v9929_v25 = vpop.f32.mrb[179].mxu0  ;;  %5826 = vxpose.xlu0.b32.cont [8/16] %v5737_v12, 128 }
 0x553   :  { %v5739_v38 = vmax.f32 %v6858_v44, %v5675_v63  ;;  %v5677_v48 = vmul.f32 0.2, %v6860_v21  ;;  %v9955_v44 = vpop.permute.xlu0 %6042 }
 0x555   :  { %5827 = vxpose.xlu0.b32.cont [9/16] %v5739_v38, 128  ;;  %v5741_v5 = vmax.f32 %v6860_v21, %v5677_v48 }
 0x556   :  { %v5598_v35 = vpop.f32.mrb[180].mxu0 }
 0x557   :  { %v6862_v57 = vadd.f32 %v5598_v35, %v9825_v59  ;;  %v9936_v8 = vpop.f32.mrb[181].mxu0  ;;  %v9960_v35 = vpop.permute.xlu1 %6047 }
 0x558   :  { %v5602_v28 = vpop.f32.mrb[182].mxu0 }
 0x559   :  { %v5679_v2 = vmul.f32 0.2, %v6862_v57  ;;  %v6864_v61 = vadd.f32 %v5602_v28, %v9825_v59  ;;  %v9941_v60 = vpop.f32.mrb[183].mxu0  ;;  %5828 = vxpose.xlu0.b32.cont [10/16] %v5741_v5, 128 }
 0x55b   :  { %v5743_v39 = vmax.f32 %v6862_v57, %v5679_v2  ;;  %v5681_v17 = vmul.f32 0.2, %v6864_v61  ;;  %v6843_v2 = vadd.f32 %v9887_v27, %v9830_v36  ;;  %v6847_v27 = vadd.f32 %v9895_v51, %v9830_v36 }
 0x55c   :  { %v6851_v51 = vadd.f32 %v9905_v54, %v9830_v36  ;;  %v6855_v54 = vadd.f32 %v9913_v31, %v9830_v36  ;;  %v6859_v31 = vadd.f32 %v9924_v52, %v9830_v36 }
 0x55d   :  { %5829 = vxpose.xlu0.b32.cont [11/16] %v5743_v39, 128  ;;  %v5745_v46 = vmax.f32 %v6864_v61, %v5681_v17  ;;  %v9967_v61 = vpop.permute.xlu0 %6052 }
 0x55e   :  { %v5608_v10 = vpop.f32.mrb[184].mxu0 }
 0x55f   :  { %v6866_v50 = vadd.f32 %v5608_v10, %v9825_v59  ;;  %v9948_v24 = vpop.f32.mrb[185].mxu0  ;;  %v5660_v10 = vmul.f32 0.2, %v6843_v2 }
 0x560   :  { %v5612_v6 = vpop.f32.mrb[186].mxu0 }
 0x561   :  { %v5683_v13 = vmul.f32 0.2, %v6866_v50  ;;  %v6868_v18 = vadd.f32 %v5612_v6, %v9825_v59  ;;  %v9951_v29 = vpop.f32.mrb[187].mxu0  ;;  %5830 = vxpose.xlu0.b32.cont [12/16] %v5745_v46, 128  ;;  %v6845_v46 = vadd.f32 %v9890_v43, %v9830_v36  ;;  %v6849_v43 = vadd.f32 %v9900_v1, %v9830_v36 }
 0x562   :  { %v5668_v1 = vmul.f32 0.2, %v6851_v51 }
 0x563   :  { %v5747_v41 = vmax.f32 %v6866_v50, %v5683_v13  ;;  %v5685_v12 = vmul.f32 0.2, %v6868_v18  ;;  %v9971_v50 = vpop.permute.xlu1 %6057  ;;  %v9973_v13 = vpop.permute.xlu0 %6062 }
 0x565   :  { %5831 = vxpose.xlu0.b32.cont [13/16] %v5747_v41, 128  ;;  %v5749_v63 = vmax.f32 %v6868_v18, %v5685_v12  ;;  %v5662_v18 = vmul.f32 0.2, %v6845_v46 }
 0x566   :  { %v5618_v42 = vpop.f32.mrb[188].mxu0 }
 0x567   :  { %v6870_v21 = vadd.f32 %v5618_v42, %v9825_v59  ;;  %v9958_v38 = vpop.f32.mrb[189].mxu0  ;;  %v9977_v41 = vpop.permute.xlu1 %6067  ;;  %v5726_v42 = vmax.f32 %v6845_v46, %v5662_v18 }
 0x568   :  { %v5622_v48 = vpop.f32.mrb[190].mxu0 }
 0x569   :  { %v5687_v5 = vmul.f32 0.2, %v6870_v21  ;;  %v6872_v57 = vadd.f32 %v5622_v48, %v9825_v59  ;;  %v9963_v28 = vpop.f32.mrb[191].mxu0  ;;  %5832 = vxpose.xlu0.b32.cont [14/16] %v5749_v63, 128  ;;  %v5724_v59 = vmax.f32 %v6843_v2, %v5660_v10  ;;  %v5664_v63 = vmul.f32 0.2, %v6847_v27 }
 0x56b   :  { %v5751_v39 = vmax.f32 %v6870_v21, %v5687_v5  ;;  %v5689_v17 = vmul.f32 0.2, %v6872_v57  ;;  %v5728_v2 = vmax.f32 %v6847_v27, %v5664_v63  ;;  %v5732_v63 = vmax.f32 %v6851_v51, %v5668_v1 }
 0x56d   :  { %5833 = vxpose.xlu0.b32.cont [15/16] %v5751_v39, 128  ;;  %v5753_v6 = vmax.f32 %v6872_v57, %v5689_v17  ;;  %v5666_v39 = vmul.f32 0.2, %v6849_v43 }
 0x571   :  { %5834 = vxpose.xlu0.b32.end [16/16] %v5753_v6, 128  ;;  %v5730_v6 = vmax.f32 %v6849_v43, %v5666_v39  ;;  %v5672_v39 = vmul.f32 0.2, %v6855_v54 }
 0x575   :  { %5851 = vxpose.xlu0.b32.start [1/16] %v5724_v59, 128  ;;  %v5771_v12 = vpop.trf.xlu0  ;;  %v6853_v59 = vadd.f32 %v9908_v30, %v9830_v36 }
 0x576   :  { %v9981_v21 = vpop.trf.xlu1  ;;  %v6075_v5 = vmul.f32 %v9819_v7, %v5771_v12 }
 0x579   :  { %5852 = vxpose.xlu0.b32.cont [2/16] %v5726_v42, 128  ;;  %v5772_v48 = vpop.trf.xlu0 }
 0x57a   :  { %v6077_v57 = vmul.f32 %v9827_v53, %v5772_v48  ;;  %v9990_v18 = vpop.trf.xlu1  ;;  %v5670_v48 = vmul.f32 0.2, %v6853_v59 }
 0x57c   :  { %v6139_v17 = vadd.f32 %v6077_v57, %v6075_v5  ;;  %v5734_v30 = vmax.f32 %v6853_v59, %v5670_v48  ;;  %v5676_v48 = vmul.f32 0.2, %v6859_v31 }
 0x57d   :  { %5853 = vxpose.xlu0.b32.cont [3/16] %v5728_v2, 128  ;;  %v5773_v10 = vpop.trf.xlu0 }
 0x57e   :  { %v6079_v46 = vmul.f32 %v9835_v47, %v5773_v10  ;;  %v9995_v57 = vpop.trf.xlu1  ;;  %v5740_v52 = vmax.f32 %v6859_v31, %v5676_v48 }
 0x580   :  { %v6140_v12 = vadd.f32 %v6139_v17, %v6079_v46  ;;  %v6857_v17 = vadd.f32 %v9916_v22, %v9830_v36  ;;  %v6861_v22 = vadd.f32 %v9929_v25, %v9830_v36  ;;  %v6865_v25 = vadd.f32 %v9941_v60, %v9830_v36 }
 0x581   :  { %5854 = vxpose.xlu0.b32.cont [4/16] %v5730_v6, 128  ;;  %v5774_v42 = vpop.trf.xlu0  ;;  %v5736_v6 = vmax.f32 %v6855_v54, %v5672_v39  ;;  %v6863_v39 = vadd.f32 %v9936_v8, %v9830_v36  ;;  %v6867_v8 = vadd.f32 %v9948_v24, %v9830_v36  ;;  %v6871_v24 = vadd.f32 %v9958_v38, %v9830_v36 }
 0x582   :  { %v6081_v27 = vmul.f32 %v9839_v45, %v5774_v42  ;;  %v5674_v1 = vmul.f32 0.2, %v6857_v17 }
 0x583   :  { %v5684_v60 = vmul.f32 0.2, %v6867_v8 }
 0x584   :  { %v6141_v5 = vadd.f32 %v6140_v12, %v6081_v27  ;;  %v10003_v12 = vpop.trf.xlu1 }
 0x585   :  { %5855 = vxpose.xlu0.b32.cont [5/16] %v5732_v63, 128  ;;  %v5775_v43 = vpop.trf.xlu0  ;;  %v5738_v63 = vmax.f32 %v6857_v17, %v5674_v1 }
 0x586   :  { %v6083_v2 = vmul.f32 %v9844_v19, %v5775_v43 }
 0x588   :  { %v6142_v10 = vadd.f32 %v6141_v5, %v6083_v2  ;;  %v10008_v43 = vpop.trf.xlu1 }
 0x589   :  { %5856 = vxpose.xlu0.b32.cont [6/16] %v5734_v30, 128  ;;  %v5776_v46 = vpop.trf.xlu0  ;;  %v5678_v30 = vmul.f32 0.2, %v6861_v22 }
 0x58a   :  { %v6085_v51 = vmul.f32 %v9850_v3, %v5776_v46 }
 0x58c   :  { %v6143_v42 = vadd.f32 %v6142_v10, %v6085_v51  ;;  %v5742_v51 = vmax.f32 %v6861_v22, %v5678_v30  ;;  %v10016_v1 = vpop.trf.xlu1 }
 0x58d   :  { %5857 = vxpose.xlu0.b32.cont [7/16] %v5736_v6, 128  ;;  %v5777_v27 = vpop.trf.xlu0  ;;  %v5680_v6 = vmul.f32 0.2, %v6863_v39 }
 0x58e   :  { %v6087_v59 = vmul.f32 %v9854_v15, %v5777_v27 }
 0x590   :  { %v6144_v5 = vadd.f32 %v6143_v42, %v6087_v59  ;;  %v5744_v59 = vmax.f32 %v6863_v39, %v5680_v6 }
 0x591   :  { %5858 = vxpose.xlu0.b32.cont [8/16] %v5738_v63, 128  ;;  %v5778_v54 = vpop.trf.xlu0  ;;  %v5682_v63 = vmul.f32 0.2, %v6865_v25 }
 0x592   :  { %v6089_v2 = vmul.f32 %v9858_v55, %v5778_v54 }
 0x594   :  { %v6145_v10 = vadd.f32 %v6144_v5, %v6089_v2  ;;  %v5809_v5 = vpop.trf.xlu1  ;;  %v5746_v2 = vmax.f32 %v6865_v25, %v5682_v63 }
 0x595   :  { %5859 = vxpose.xlu0.b32.cont [9/16] %v5740_v52, 128  ;;  %v5779_v46 = vpop.trf.xlu0  ;;  %v6869_v52 = vadd.f32 %v9951_v29, %v9830_v36  ;;  %v6873_v29 = vadd.f32 %v9963_v28, %v9830_v36  ;;  %v6107_v28 = vmul.f32 %v9902_v20, %v9981_v21  ;;  %v6115_v21 = vmul.f32 %v9933_v11, %v10008_v43 }
 0x596   :  { %v6091_v17 = vmul.f32 %v9864_v14, %v5779_v46  ;;  %v5748_v46 = vmax.f32 %v6867_v8, %v5684_v60 }
 0x598   :  { %v6146_v42 = vadd.f32 %v6145_v10, %v6091_v17  ;;  %v5686_v17 = vmul.f32 0.2, %v6869_v52 }
 0x599   :  { %5860 = vxpose.xlu0.b32.cont [10/16] %v5742_v51, 128  ;;  %v5780_v27 = vpop.trf.xlu0  ;;  %v5810_v51 = vpop.trf.xlu1 }
 0x59a   :  { %v6093_v31 = vmul.f32 %v9870_v49, %v5780_v27  ;;  %v5750_v27 = vmax.f32 %v6869_v52, %v5686_v17 }
 0x59c   :  { %v6147_v48 = vadd.f32 %v6146_v42, %v6093_v31  ;;  %v5688_v31 = vmul.f32 0.2, %v6871_v24 }
 0x59d   :  { %5861 = vxpose.xlu0.b32.cont [11/16] %v5744_v59, 128  ;;  %v5781_v22 = vpop.trf.xlu0  ;;  %v5811_v63 = vpop.trf.xlu1 }
 0x59e   :  { %v6095_v54 = vmul.f32 %v9931_v0, %v5781_v22  ;;  %v5752_v22 = vmax.f32 %v6871_v24, %v5688_v31  ;;  %v6109_v24 = vmul.f32 %v9910_v62, %v9990_v18 }
 0x5a0   :  { %v6148_v30 = vadd.f32 %v6147_v48, %v6095_v54  ;;  %v5690_v54 = vmul.f32 0.2, %v6873_v29 }
 0x5a1   :  { %5862 = vxpose.xlu0.b32.cont [12/16] %v5746_v2, 128  ;;  %v5782_v10 = vpop.trf.xlu0 }
 0x5a2   :  { %v6097_v39 = vmul.f32 %v9874_v58, %v5782_v10  ;;  %v5812_v10 = vpop.trf.xlu1 }
 0x5a3   :  { %v6125_v43 = vmul.f32 %v9955_v44, %v5812_v10 }
 0x5a4   :  { %v6149_v6 = vadd.f32 %v6148_v30, %v6097_v39  ;;  %v5754_v30 = vmax.f32 %v6873_v29, %v5690_v54  ;;  %v6113_v29 = vmul.f32 %v9926_v40, %v10003_v12  ;;  %v6117_v54 = vmul.f32 %v9938_v56, %v10016_v1 }
 0x5a5   :  { %5863 = vxpose.xlu0.b32.cont [13/16] %v5748_v46, 128  ;;  %v5783_v42 = vpop.trf.xlu0  ;;  %v6123_v12 = vmul.f32 %v9953_v16, %v5811_v63 }
 0x5a6   :  { %v6099_v25 = vmul.f32 %v9878_v34, %v5783_v42  ;;  %v5813_v17 = vpop.trf.xlu1 }
 0x5a8   :  { %v6150_v59 = vadd.f32 %v6149_v6, %v6099_v25  ;;  %v6111_v25 = vmul.f32 %v9918_v23, %v9995_v57 }
 0x5a9   :  { %5864 = vxpose.xlu0.b32.cont [14/16] %v5750_v27, 128  ;;  %v5784_v48 = vpop.trf.xlu0 }
 0x5aa   :  { %v6101_v8 = vmul.f32 %v9884_v9, %v5784_v48  ;;  %v5814_v48 = vpop.trf.xlu1 }
 0x5ac   :  { %v6151_v38 = vadd.f32 %v6150_v59, %v6101_v8 }
 0x5ad   :  { %5865 = vxpose.xlu0.b32.cont [15/16] %v5752_v22, 128  ;;  %v5785_v2 = vpop.trf.xlu0 }
 0x5ae   :  { %v6103_v60 = vmul.f32 %v9892_v33, %v5785_v2  ;;  %v5815_v57 = vpop.trf.xlu1 }
 0x5b0   :  { %v6152_v52 = vadd.f32 %v6151_v38, %v6103_v60  ;;  %v6119_v38 = vmul.f32 %v9943_v37, %v5809_v5  ;;  %v6129_v5 = vmul.f32 %v9967_v61, %v5814_v48 }
 0x5b1   :  { %5866 = vxpose.xlu0.b32.end [16/16] %v5754_v30, 128  ;;  %v5786_v39 = vpop.trf.xlu0  ;;  %v6121_v30 = vmul.f32 %v9945_v4, %v5810_v51 }
 0x5b2   :  { %v6105_v36 = vmul.f32 %v9897_v32, %v5786_v39 }
 0x5b4   :  { %v6153_v46 = vadd.f32 %v6152_v52, %v6105_v36 }
 0x5b5   :  { %v5835_v6 = vpop.trf.xlu0 }
 0x5b6   :  { %v6154_v42 = vadd.f32 %v6153_v46, %v6107_v28  ;;  %v5816_v46 = vpop.trf.xlu1 }
 0x5b7   :  { %v6133_v63 = vmul.f32 %v9973_v13, %v5816_v46 }
 0x5b8   :  { %v6155_v27 = vadd.f32 %v6154_v42, %v6109_v24  ;;  %v6127_v24 = vmul.f32 %v9960_v35, %v5813_v17 }
 0x5b9   :  { %v5836_v31 = vpop.trf.xlu0 }
 0x5ba   :  { %v6156_v59 = vadd.f32 %v6155_v27, %v6111_v25  ;;  %v6131_v27 = vmul.f32 %v9971_v50, %v5815_v57  ;;  %v5817_v51 = vpop.trf.xlu1  ;;  %v6078_v48 = vmul.f32 %v9827_v53, %v5836_v31 }
 0x5bc   :  { %v6157_v8 = vadd.f32 %v6156_v59, %v6113_v29 }
 0x5bd   :  { %v5837_v22 = vpop.trf.xlu0 }
 0x5be   :  { %v6158_v18 = vadd.f32 %v6157_v8, %v6115_v21  ;;  %v6135_v8 = vmul.f32 %v9977_v41, %v5817_v51  ;;  %v6080_v57 = vmul.f32 %v9835_v47, %v5837_v22 }
 0x5c0   :  { %v6159_v2 = vadd.f32 %v6158_v18, %v6117_v54 }
 0x5c1   :  { %v5838_v60 = vpop.trf.xlu0 }
 0x5c2   :  { %v6160_v52 = vadd.f32 %v6159_v2, %v6119_v38 }
 0x5c4   :  { %v6161_v39 = vadd.f32 %v6160_v52, %v6121_v30  ;;  %v6076_v30 = vmul.f32 %v9819_v7, %v5835_v6 }
 0x5c5   :  { %v5839_v36 = vpop.trf.xlu0 }
 0x5c6   :  { %v6162_v28 = vadd.f32 %v6161_v39, %v6123_v12  ;;  %v6176_v12 = vadd.f32 %v6078_v48, %v6076_v30  ;;  %v6082_v39 = vmul.f32 %v9839_v45, %v5838_v60 }
 0x5c8   :  { %v6163_v1 = vadd.f32 %v6162_v28, %v6125_v43  ;;  %v6177_v43 = vadd.f32 %v6176_v12, %v6080_v57  ;;  %v6084_v28 = vmul.f32 %v9844_v19, %v5839_v36 }
 0x5c9   :  { %v5840_v42 = vpop.trf.xlu0 }
 0x5ca   :  { %v6164_v25 = vadd.f32 %v6163_v1, %v6127_v24  ;;  %v6178_v24 = vadd.f32 %v6177_v43, %v6082_v39  ;;  %v6086_v1 = vmul.f32 %v9850_v3, %v5840_v42 }
 0x5cc   :  { %v6165_v29 = vadd.f32 %v6164_v25, %v6129_v5  ;;  %v6179_v5 = vadd.f32 %v6178_v24, %v6084_v28  ;;  %v5818_v28 = vpop.trf.xlu1 }
 0x5cd   :  { %v5841_v59 = vpop.trf.xlu0 }
 0x5ce   :  { %v6166_v21 = vadd.f32 %v6165_v29, %v6131_v27  ;;  %v6088_v25 = vmul.f32 %v9854_v15, %v5841_v59  ;;  %v6180_v53 = vadd.f32 %v6179_v5, %v6086_v1 }
 0x5d0   :  { %v6167_v10 = vadd.f32 %v6166_v21, %v6133_v63  ;;  %v6181_v6 = vadd.f32 %v6180_v53, %v6088_v25 }
 0x5d1   :  { %v5842_v54 = vpop.trf.xlu0 }
 0x5d2   :  { %v10054_v18 = vadd.f32 %v6167_v10, %v6135_v8  ;;  %v6090_v7 = vmul.f32 %v9858_v55, %v5842_v54 }
 0x5d4   :  { %v6182_v22 = vadd.f32 %v6181_v6, %v6090_v7 }
 0x5d5   :  { %v5843_v17 = vpop.trf.xlu0 }
 0x5d6   :  { %v6092_v47 = vmul.f32 %v9864_v14, %v5843_v17 }
 0x5d8   :  { %v6183_v60 = vadd.f32 %v6182_v22, %v6092_v47 }
 0x5d9   :  { %v5844_v38 = vpop.trf.xlu0 }
 0x5da   :  { %v6094_v45 = vmul.f32 %v9870_v49, %v5844_v38 }
 0x5dc   :  { %v6184_v29 = vadd.f32 %v6183_v60, %v6094_v45 }
 0x5dd   :  { %v5845_v2 = vpop.trf.xlu0 }
 0x5de   :  { %v6096_v19 = vmul.f32 %v9931_v0, %v5845_v2 }
 0x5e0   :  { %v6185_v42 = vadd.f32 %v6184_v29, %v6096_v19 }
 0x5e1   :  { %v5846_v52 = vpop.trf.xlu0 }
 0x5e2   :  { %v6098_v3 = vmul.f32 %v9874_v58, %v5846_v52 }
 0x5e4   :  { %v6186_v59 = vadd.f32 %v6185_v42, %v6098_v3 }
 0x5e5   :  { %v5847_v46 = vpop.trf.xlu0 }
 0x5e6   :  { %v6100_v15 = vmul.f32 %v9878_v34, %v5847_v46 }
 0x5e8   :  { %v6187_v63 = vadd.f32 %v6186_v59, %v6100_v15 }
 0x5e9   :  { %v5848_v27 = vpop.trf.xlu0 }
 0x5ea   :  { %v6102_v55 = vmul.f32 %v9884_v9, %v5848_v27 }
 0x5ec   :  { %v6188_v8 = vadd.f32 %v6187_v63, %v6102_v55 }
 0x5ed   :  { %v5849_v31 = vpop.trf.xlu0 }
 0x5ee   :  { %v6104_v14 = vmul.f32 %v9892_v33, %v5849_v31 }
 0x5f0   :  { %v6189_v10 = vadd.f32 %v6188_v8, %v6104_v14 }
 0x5f1   :  { %v5850_v36 = vpop.trf.xlu0 }
 0x5f2   :  { %v6106_v49 = vmul.f32 %v9897_v32, %v5850_v36 }
 0x5f4   :  { %v6190_v17 = vadd.f32 %v6189_v10, %v6106_v49 }
 0x5f5   :  { %v5867_v51 = vpop.trf.xlu0 }
 0x5f6   :  { %v6108_v0 = vmul.f32 %v9902_v20, %v5867_v51 }
 0x5f8   :  { %v6191_v38 = vadd.f32 %v6190_v17, %v6108_v0 }
 0x5f9   :  { %v5868_v21 = vpop.trf.xlu0 }
 0x5fa   :  { %v6110_v58 = vmul.f32 %v9910_v62, %v5868_v21  ;;  %v6214_v21 = vstv %s10113_s8  ;;  %s7902_s8 = smov [#allocation8]  }
 0x5fb   :  { %s6256_s24 = sshll.u32 %s7902_s8, 4  ;;  %s6257_s24 = int_to_ptr.vmem [resolvable:$true] %s6256_s24 }
 0x5fc   :  { %v6192_v48 = vadd.f32 %v6191_v38, %v6110_v58  ;;  %s7866_s25 = scalar_lea.vmem %s6257_s24, 32  ;;  %p7871_p3 = scmp.lt.s32.totalorder %s6257_s24, %s6257_s24 }
 0x5fd   :  { %v5869_v54 = vpop.trf.xlu0  ;;  %p7867_p2 = scmp.ne.s32.totalorder %s6257_s24, %s7866_s25  ;;  %p7872_p4 = scmp.lt.s32.totalorder %s7866_s25, %s7866_s25 }
 0x5fe   :  { %v6112_v34 = vmul.f32 %v9918_v23, %v5869_v54 }
 0x5ff   :  { %p7873_p5 = por %p7872_p4, %p7871_p3 }
 0x600   :  { %v6193_v30 = vadd.f32 %v6192_v48, %v6112_v34 }
 0x601   :  { %v5870_v2 = vpop.trf.xlu0  ;;  %p7874_p6 = pnand %p7873_p5, %p7867_p2 }
 0x602   :  { %v6114_v9 = vmul.f32 %v9926_v40, %v5870_v2  ;;  %v6073_v40 = vpop.permute.xlu1 %6072 }
 0x604   :  { %v6194_v57 = vadd.f32 %v6193_v30, %v6114_v9 }
 0x605   :  { %v5871_v33 = vpop.trf.xlu0 }
 0x606   :  { %v6116_v52 = vmul.f32 %v9933_v11, %v5871_v33  ;;  %v6137_v11 = vmul.f32 %v6073_v40, %v5818_v28  ;;  %v10300_v28 = vlaneseq }
 0x608   :  { %v6195_v32 = vadd.f32 %v6194_v57, %v6116_v52  ;;  %v7901_v57 = vmov 1966171168   ;;  %vm6247_vm1 = vcmp.lt.s32.totalorder %v10300_v28, 256 }
 0x609   :  { %v5872_v12 = vpop.trf.xlu0  ;;  %v6231_v52 = vunpack.c.l.s4 %v7901_v57 }
 0x60a   :  { %v6118_v20 = vmul.f32 %v9938_v56, %v5872_v12  ;;  %v6169_v56 = vadd.f32 %v10054_v18, %v6137_v11 }
 0x60c   :  { %v6196_v43 = vadd.f32 %v6195_v32, %v6118_v20  ;;  %v6170_v31 = vrot.slane %v6169_v56, 4  ;;  %v6232_v32 = vunpack.c.0.s8 %v6231_v52 }
 0x60d   :  { %v5873_v39 = vpop.trf.xlu0 }
 0x60e   :  { %v6120_v62 = vmul.f32 %v9943_v37, %v5873_v39  ;;  %v6171_v60 = vadd.f32 %v6170_v31, %v6169_v56  ;;  %v6235_v20 = vsub.s32 %v6232_v32, %v10297_v26 }
 0x610   :  { %v6197_v46 = vadd.f32 %v6196_v43, %v6120_v62  ;;  %v6172_v29 = vrot.slane %v6171_v60, 2 }
 0x611   :  { %v5874_v23 = vpop.trf.xlu0 }
 0x612   :  { %v6122_v24 = vmul.f32 %v9945_v4, %v5874_v23  ;;  %v6173_v18 = vadd.f32 %v6172_v29, %v6171_v60 }
 0x614   :  { %v6198_v5 = vadd.f32 %v6197_v46, %v6122_v24  ;;  %v6174_v59 = vrot.slane %v6173_v18, 1 }
 0x615   :  { %v5875_v1 = vpop.trf.xlu0 }
 0x616   :  { %v6124_v25 = vmul.f32 %v9953_v16, %v5875_v1 }
 0x618   :  { %v6199_v27 = vadd.f32 %v6198_v5, %v6124_v25 }
 0x619   :  { %v5876_v53 = vpop.trf.xlu0 }
 0x61a   :  { %v6126_v7 = vmul.f32 %v9955_v44, %v5876_v53 }
 0x61c   :  { %v6200_v47 = vadd.f32 %v6199_v27, %v6126_v7 }
 0x61d   :  { %v5877_v6 = vpop.trf.xlu0 }
 0x61e   :  { %v6128_v37 = vmul.f32 %v9960_v35, %v5877_v6 }
 0x620   :  { %v6201_v22 = vadd.f32 %v6200_v47, %v6128_v37 }
 0x621   :  { %v5878_v45 = vpop.trf.xlu0 }
 0x622   :  { %v6130_v4 = vmul.f32 %v9967_v61, %v5878_v45  ;;  %v6175_v61 = vadd.f32 %v6174_v59, %v6173_v18 }
 0x624   :  { %v6202_v36 = vadd.f32 %v6201_v22, %v6130_v4  ;;  %v6215_v49 = vadd.f32 %v6214_v21, %v6175_v61 }
 0x625   :  { %v5879_v19 = vpop.trf.xlu0 }
 0x626   :  { %v6132_v16 = vmul.f32 %v9971_v50, %v5879_v19 }
 0x628   :  { %v6203_v3 = vadd.f32 %v6202_v36, %v6132_v16 }
 0x629   :  { %v5880_v42 = vpop.trf.xlu0 }
 0x62a   :  { %v6134_v44 = vmul.f32 %v9973_v13, %v5880_v42  ;;  %v6217_v13 = vsub.f32 0.0, %v6215_v49 }
 0x62c   :  { %v6204_v51 = vadd.f32 %v6203_v3, %v6134_v44  ;;  %v6219_v58 = vmul.f32 1.442695, %v6217_v13 }
 0x62d   :  { %v5881_v15 = vpop.trf.xlu0 }
 0x62e   :  { %v6136_v35 = vmul.f32 %v9977_v41, %v5881_v15  ;;  %7813 = vpow2.f32 %v6219_v58 }
 0x630   :  { %v6205_v55 = vadd.f32 %v6204_v51, %v6136_v35 }
 0x631   :  { %v5882_v63 = vpop.trf.xlu0 }
 0x632   :  { %v6138_v14 = vmul.f32 %v6073_v40, %v5882_v63 }
 0x634   :  { %v6206_v50 = vadd.f32 %v6205_v55, %v6138_v14 }
 0x636   :  { %v6207_v8 = vrot.slane %v6206_v50, 4 }
 0x638   :  { %v6208_v10 = vadd.f32 %v6207_v8, %v6206_v50  ;;  %v7814_v48 = vpop.eup %7813 }
 0x639   :  { %v6223_v9 = vadd.f32 1.0, %v7814_v48 }
 0x63a   :  { %v6209_v0 = vrot.slane %v6208_v10, 2 }
 0x63c   :  { %v6210_v54 = vadd.f32 %v6209_v0, %v6208_v10 }
 0x63e   :  { %v6211_v17 = vrot.slane %v6210_v54, 1 }
 0x640   :  { %v6212_v38 = vadd.f32 %v6211_v17, %v6210_v54 }
 0x642   :  { %v6216_v41 = vadd.f32 %v6214_v21, %v6212_v38 }
 0x644   :  { %v6218_v34 = vsub.f32 0.0, %v6216_v41 }
 0x646   :  { %v6221_v2 = vmul.f32 1.442695, %v6218_v34 }
 0x648   :  { %7815 = vpow2.f32 %v6221_v2 }
 0x649   :  { %7817 = vrcp.f32 %v6223_v9 }
 0x652   :  { %v7816_v30 = vpop.eup %7815 }
 0x653   :  { %v6224_v33 = vadd.f32 1.0, %v7816_v30  ;;  %v7818_v12 = vpop.eup %7817 }
 0x655   :  { %7819 = vrcp.f32 %v6224_v33 }
 0x65f   :  { %v7820_v39 = vpop.eup %7819 }
 0x660   :  { %v6229_v43 = vcombine.low %v7818_v12, %v7820_v39 }
 0x662   :  { %v6236_v62 = vrot.slane %v6229_v43, %v6235_v20 }
 0x664   :  { %v6243_v46 = vrot.slane %v6236_v62, %v6235_v20 }
 0x666   :  { %6249 = vst.msk [vmem:[#allocation8] sm:$0x3] %vm6247_vm1, %v6243_v46 }
 0x667   :  { %7877 = shalt.err (!%p7874_p6)
}
 0x668   :  { %s7878_s28 = scalar_lea.hbm %s10114_s9, 32 }
 0x669   :  { %p7879_p7 = scmp.ne.s32.totalorder %s10114_s9, %s7878_s28  ;;  %p7882_p8 = scmp.lt.u32.totalorder %s7878_s28, %s10114_s9 }
 0x66b   :  { %p7884_p9 = pnand %p7882_p8, %p7879_p7 }
 0x66d   :  { %7887 = shalt.err (!%p7884_p9)
}
 0x66e   :  { %6259 = dma.vmem_to_hbm [thread:$0]  %s6257_s24, 32, %s10114_s9, [#allocation5]  }
 0x66f   :  { %7892 = dma.done.wait [#allocation5], 32  }
 0x670   :  { %7893 = vsyncadd [#allocation5], 4294967264 }
 0x671   :  { %6263 = vsyncpa [#allocation4], 1 }
 0x672   :  { %6264 = vsyncpa [#allocation7], 1 }
 0x673   :  { %6265 = vsyncpa [#allocation5], 1 }

</bundles_post_ra>
